<compile_context>
chip_gen: v5e
topology: v5e:2x2
jax: 0.10.0
libtpu: 0.0.40
codegen_flags: <defaults>
</compile_context>

<pallas_src>
import functools

import jax
import jax.numpy as jnp
from jax import lax
from jax.experimental import pallas as pl
from jax.experimental.pallas import tpu as pltpu


def _gnn_kernel(x_emb_ref, a_ref,
                w_p_ref, b_p_ref, w_c_ref, b_c_ref,
                w1s_ref, w1p_ref, w1c_ref, b_fa1_ref,
                w_fa2_ref, b_fa2_ref,
                w_conv_ref, b_conv_ref,
                out_ref,
                nodes_scr, msgp_scr, msgc_scr, fi_scr, fo_scr,
                *, block_rows, a_resident):
    f32, bf16 = jnp.float32, jnp.bfloat16
    t = pl.program_id(0)            # message-passing iteration (sequential)
    r = pl.program_id(1)            # node row block (sequential)
    last_t = pl.num_programs(0) - 1
    last_r = pl.num_programs(1) - 1

    # ---- initial encoder output -> persistent node state (first step only) --
    @pl.when(jnp.logical_and(t == 0, r == 0))
    def _():
        nodes_scr[...] = x_emb_ref[...]

    # ---- once per iteration: parent/child message Linears, zero fo acc ------
    @pl.when(r == 0)
    def _():
        nb = nodes_scr[...].astype(bf16)
        msgp_scr[...] = (jnp.dot(nb, w_p_ref[...], preferred_element_type=f32)
                         + b_p_ref[...]).astype(bf16)
        msgc_scr[...] = (jnp.dot(nb, w_c_ref[...], preferred_element_type=f32)
                         + b_c_ref[...]).astype(bf16)
        fo_scr[...] = jnp.zeros_like(fo_scr)

    # ---- per row block: aggregation from a single A row stripe --------------
    row0 = pl.multiple_of(r * block_rows, block_rows)
    if a_resident:
        a_blk = a_ref[pl.ds(row0, block_rows), :]      # slice resident int8 A
    else:
        a_blk = a_ref[...]                             # streamed int8 stripe
    # int8 -> bf16 via f32 (VPU, hidden under the MXU work)
    a_blk = a_blk.astype(f32).astype(bf16)             # (blk, n_pad)

    # Parent_Aggregation: fi[rows] = A[rows, :] @ msg_p
    fi_scr[pl.ds(row0, block_rows), :] = jnp.dot(
        a_blk, msgp_scr[...], preferred_element_type=f32).astype(bf16)

    # Child_Aggregation accumulated from row stripes (A^T never materialized):
    # fo += A[rows, :]^T @ msg_c[rows]
    fo_scr[...] += lax.dot_general(
        a_blk, msgc_scr[pl.ds(row0, block_rows), :],
        dimension_numbers=(((0,), (0,)), ((), ())),
        preferred_element_type=f32)

    # ---- once per iteration, after the last stripe: Final_Agg + residual ----
    @pl.when(r == last_r)
    def _():
        nodes = nodes_scr[...]                                     # (n_pad, E)
        h = (jnp.dot(nodes.astype(bf16), w1s_ref[...],
                     preferred_element_type=f32)
             + jnp.dot(fi_scr[...], w1p_ref[...],
                       preferred_element_type=f32)
             + jnp.dot(fo_scr[...].astype(bf16), w1c_ref[...],
                       preferred_element_type=f32)
             + b_fa1_ref[...])
        h = jnp.maximum(h, 0.0)
        upd = (jnp.dot(h.astype(bf16), w_fa2_ref[...],
                       preferred_element_type=f32) + b_fa2_ref[...])
        nodes_scr[...] = nodes + upd

    # ---- conv1 (Linear(E, 2E)) + output write, final grid step only ---------
    @pl.when(jnp.logical_and(t == last_t, r == last_r))
    def _():
        out_ref[...] = (jnp.dot(nodes_scr[...].astype(bf16), w_conv_ref[...],
                                preferred_element_type=f32) + b_conv_ref[...])


def message_passing_gnn_induct_forward(nodes, edges, edge_attr, params,
                                       num_iterations, *, block_rows=256,
                                       a_resident=None):
    """nodes: (N, F_in) f32; edges: (2, M) int32 (edges[0]=src, edges[1]=dst).
    edge_attr is accepted for signature parity but unused (as in PyTorch)."""
    del edge_attr
    assert num_iterations >= 1
    assert block_rows % 128 == 0
    f32, bf16 = jnp.float32, jnp.bfloat16

    n, f_in = nodes.shape
    e = params["w_p"].shape[0]
    out_dim = params["w_conv"].shape[1]

    n_pad = int(pl.cdiv(n, block_rows)) * block_rows
    num_blocks = n_pad // block_rows

    # initial_encoder in plain XLA (tiny matmul); padded rows get b_init only,
    # harmless since their adjacency rows/cols are zero. Sliced off at the end.
    x_pad = jnp.zeros((n_pad, f_in), f32).at[:n].set(nodes.astype(f32))
    x_emb = x_pad @ params["w_init"].astype(f32) + params["b_init"].astype(f32)

    # Dense parent adjacency a[dst, src] += 1, stored int8 in HBM.
    src, dst = edges[0], edges[1]
    a = (jnp.zeros((n_pad, n_pad), jnp.int32).at[dst, src].add(1)
         .astype(jnp.int8))

    # ---- generation-aware VMEM budget / adjacency residency -----------------
    try:
        vmem_cap = int(pltpu.get_tpu_info().vmem_capacity_bytes)
    except Exception:
        vmem_cap = 64 * 1024 * 1024          # conservative (v7x per-TC VMEM)
    scratch_b = n_pad * e * (4 + 2 + 2 + 2 + 4)          # nodes/msgs/fi/fo
    const_b = n_pad * e * 4 + n_pad * out_dim * 4 + 16 * e * e * 2
    need_resident = scratch_b + const_b + n_pad * n_pad  # int8 A resident
    need_stream = scratch_b + const_b + 2 * block_rows * n_pad
    if a_resident is None:
        a_resident = need_resident <= int(0.5 * vmem_cap)
    need = need_resident if a_resident else need_stream
    vmem_limit = int(min(0.75 * vmem_cap,
                         max(32 * 1024 * 1024, 2 * need)))

    args = (
        x_emb.astype(f32), a,
        params["w_p"].astype(bf16), params["b_p"].astype(f32),
        params["w_c"].astype(bf16), params["b_c"].astype(f32),
        params["w_fa1_self"].astype(bf16), params["w_fa1_par"].astype(bf16),
        params["w_fa1_chi"].astype(bf16), params["b_fa1"].astype(f32),
        params["w_fa2"].astype(bf16), params["b_fa2"].astype(f32),
        params["w_conv"].astype(bf16), params["b_conv"].astype(f32),
    )

    def const2d(arr):
        # whole-array block, constant index -> resident once for all grid steps
        return pl.BlockSpec(arr.shape, lambda t, r: (0, 0))

    if a_resident:
        a_spec = const2d(a)
    else:
        a_spec = pl.BlockSpec((block_rows, n_pad), lambda t, r: (r, 0))

    in_specs = [const2d(args[0]), a_spec] + [const2d(w) for w in args[2:]]
    out_specs = pl.BlockSpec((n_pad, out_dim), lambda t, r: (0, 0))
    out_shape = jax.ShapeDtypeStruct((n_pad, out_dim), f32)

    # Advisory cost estimate for XLA scheduling around the custom call.
    flops = (num_iterations * (4 * n_pad * e * e            # message linears
                               + 4 * n_pad * n_pad * e      # fi + fo
                               + 8 * n_pad * e * e)         # final agg MLP
             + 4 * n_pad * e * e)                           # conv, last iter
    bytes_accessed = ((1 if a_resident else num_iterations) * n_pad * n_pad
                      + n_pad * e * 4 + n_pad * out_dim * 4
                      + sum(int(w.size) * w.dtype.itemsize for w in args[2:]))

    kernel = functools.partial(_gnn_kernel, block_rows=block_rows,
                               a_resident=a_resident)

    out = pl.pallas_call(
        kernel,
        grid=(num_iterations, num_blocks),
        in_specs=in_specs,
        out_specs=out_specs,
        out_shape=out_shape,
        scratch_shapes=[
            pltpu.VMEM((n_pad, e), f32),    # persistent node embeddings
            pltpu.VMEM((n_pad, e), bf16),   # parent messages
            pltpu.VMEM((n_pad, e), bf16),   # child messages
            pltpu.VMEM((n_pad, e), bf16),   # parent aggregation (fi)
            pltpu.VMEM((n_pad, e), f32),    # child aggregation accumulator (fo)
        ],
        compiler_params=pltpu.CompilerParams(
            # both axes carry sequential state through the shared scratch
            dimension_semantics=("arbitrary", "arbitrary"),
            vmem_limit_bytes=vmem_limit),
        cost_estimate=pl.CostEstimate(flops=int(flops), transcendentals=0,
                                      bytes_accessed=int(bytes_accessed)),
    )(*args)
    return out[:n]


def init_params(key, input_shape, embedding_dim):
    e = embedding_dim
    ks = jax.random.split(key, 14)
    s = 0.05

    def lin(k, fan_in, fan_out):
        return s * jax.random.normal(k, (fan_in, fan_out), jnp.float32)

    def bias(k, fan_out):
        return s * jax.random.normal(k, (1, fan_out), jnp.float32)

    return {
        # initial_encoder.fc1 : Linear(input_shape, E)
        "w_init": lin(ks[0], input_shape, e), "b_init": bias(ks[1], e),
        # parent_agg / child_agg message Linear(E, E)
        "w_p": lin(ks[2], e, e), "b_p": bias(ks[3], e),
        "w_c": lin(ks[4], e, e), "b_c": bias(ks[5], e),
        # final_agg : Linear(3E, E) split into its three E-row blocks
        # (self / parent-sum / child-sum) == the single Linear on the concat.
        "w_fa1_self": lin(ks[6], e, e), "w_fa1_par": lin(ks[7], e, e),
        "w_fa1_chi": lin(ks[8], e, e), "b_fa1": bias(ks[9], e),
        "w_fa2": lin(ks[10], e, e), "b_fa2": bias(ks[11], e),
        # conv1 : Conv1d(E, 2E, kernel_size=1) == Linear(E, 2E)
        "w_conv": lin(ks[12], e, 2 * e), "b_conv": bias(ks[13], 2 * e),
    }


def reference_forward(nodes, edges, params, num_iterations):
    """Pure-JAX reference mirroring the kernel's dtype policy (bf16 MXU ops)."""
    f32, bf16 = jnp.float32, jnp.bfloat16
    n = nodes.shape[0]
    src, dst = edges[0], edges[1]
    a = jnp.zeros((n, n), f32).at[dst, src].add(1.0)

    def mm(x, w):
        return jnp.dot(x.astype(bf16), w.astype(bf16),
                       preferred_element_type=f32)

    x = nodes.astype(f32) @ params["w_init"] + params["b_init"]
    for _ in range(num_iterations):
        msg_p = (mm(x, params["w_p"]) + params["b_p"]).astype(bf16).astype(f32)
        msg_c = (mm(x, params["w_c"]) + params["b_c"]).astype(bf16).astype(f32)
        fi = mm(a, msg_p)
        fo = mm(a.T, msg_c)
        h = (mm(x, params["w_fa1_self"]) + mm(fi, params["w_fa1_par"])
             + mm(fo, params["w_fa1_chi"]) + params["b_fa1"])
        h = jnp.maximum(h, 0.0)
        x = x + mm(h, params["w_fa2"]) + params["b_fa2"]
    return mm(x, params["w_conv"]) + params["b_conv"]


if __name__ == "__main__":
    key = jax.random.PRNGKey(0)
    k_nodes, k_edges, k_attr, k_params = jax.random.split(key, 4)

    num_nodes = 300            # pads to 384 with block_rows=128 -> 3 row blocks
    input_shape = 16
    embedding_dim = 64
    num_edges = 600
    num_iterations = 2

    nodes = jax.random.normal(k_nodes, (num_nodes, input_shape), jnp.float32)
    edges = jax.random.randint(k_edges, (2, num_edges), 0, num_nodes,
                               dtype=jnp.int32)
    edge_attr = jax.random.normal(k_attr, (num_edges, 4), jnp.float32)  # unused

    params = init_params(k_params, input_shape, embedding_dim)

    out = message_passing_gnn_induct_forward(nodes, edges, edge_attr, params,
                                             num_iterations, block_rows=128)
    out = jax.block_until_ready(out)
    assert out.shape == (num_nodes, 2 * embedding_dim), out.shape
    assert out.dtype == jnp.float32
    assert bool(jnp.all(jnp.isfinite(out)))

    ref = reference_forward(nodes, edges, params, num_iterations)
    ref = jax.block_until_ready(ref)
    rel_err = float(jnp.max(jnp.abs(out - ref))
                    / (jnp.max(jnp.abs(ref)) + 1e-6))
    assert rel_err < 0.05, f"relative max error too large: {rel_err}"
    print("KERNEL_OK")
</pallas_src>

<mosaic_0001>
module attributes {stable_mosaic.version = 11 : i64} {
  func.func @_gnn_kernel(%arg0: i32, %arg1: i32, %arg2: memref<384x64xf32, #tpu.memory_space<vmem>>, %arg3: memref<384x384xi8, #tpu.memory_space<vmem>>, %arg4: memref<64x64xbf16, #tpu.memory_space<vmem>>, %arg5: memref<1x64xf32, #tpu.memory_space<vmem>>, %arg6: memref<64x64xbf16, #tpu.memory_space<vmem>>, %arg7: memref<1x64xf32, #tpu.memory_space<vmem>>, %arg8: memref<64x64xbf16, #tpu.memory_space<vmem>>, %arg9: memref<64x64xbf16, #tpu.memory_space<vmem>>, %arg10: memref<64x64xbf16, #tpu.memory_space<vmem>>, %arg11: memref<1x64xf32, #tpu.memory_space<vmem>>, %arg12: memref<64x64xbf16, #tpu.memory_space<vmem>>, %arg13: memref<1x64xf32, #tpu.memory_space<vmem>>, %arg14: memref<64x128xbf16, #tpu.memory_space<vmem>>, %arg15: memref<1x128xf32, #tpu.memory_space<vmem>>, %arg16: memref<384x128xf32, #tpu.memory_space<vmem>>, %arg17: memref<384x64xf32, #tpu.memory_space<vmem>>, %arg18: memref<384x64xbf16, #tpu.memory_space<vmem>>, %arg19: memref<384x64xbf16, #tpu.memory_space<vmem>>, %arg20: memref<384x64xbf16, #tpu.memory_space<vmem>>, %arg21: memref<384x64xf32, #tpu.memory_space<vmem>>) attributes {dimension_semantics = [#tpu.dimension_semantics<arbitrary>, #tpu.dimension_semantics<arbitrary>], iteration_bounds = array<i64: 2, 3>, scalar_prefetch = 0 : i64, scratch_operands = 5 : i64, tpu.core_type = #tpu.core_type<tc>, window_params = [{pipeline_mode = #tpu.pipeline_mode<synchronous>, transform_indices = @transform_0, window_bounds = array<i64: 384, 64>}, {pipeline_mode = #tpu.pipeline_mode<synchronous>, transform_indices = @transform_1, window_bounds = array<i64: 384, 384>}, {pipeline_mode = #tpu.pipeline_mode<synchronous>, transform_indices = @transform_2, window_bounds = array<i64: 64, 64>}, {pipeline_mode = #tpu.pipeline_mode<synchronous>, transform_indices = @transform_3, window_bounds = array<i64: 1, 64>}, {pipeline_mode = #tpu.pipeline_mode<synchronous>, transform_indices = @transform_4, window_bounds = array<i64: 64, 64>}, {pipeline_mode = #tpu.pipeline_mode<synchronous>, transform_indices = @transform_5, window_bounds = array<i64: 1, 64>}, {pipeline_mode = #tpu.pipeline_mode<synchronous>, transform_indices = @transform_6, window_bounds = array<i64: 64, 64>}, {pipeline_mode = #tpu.pipeline_mode<synchronous>, transform_indices = @transform_7, window_bounds = array<i64: 64, 64>}, {pipeline_mode = #tpu.pipeline_mode<synchronous>, transform_indices = @transform_8, window_bounds = array<i64: 64, 64>}, {pipeline_mode = #tpu.pipeline_mode<synchronous>, transform_indices = @transform_9, window_bounds = array<i64: 1, 64>}, {pipeline_mode = #tpu.pipeline_mode<synchronous>, transform_indices = @transform_10, window_bounds = array<i64: 64, 64>}, {pipeline_mode = #tpu.pipeline_mode<synchronous>, transform_indices = @transform_11, window_bounds = array<i64: 1, 64>}, {pipeline_mode = #tpu.pipeline_mode<synchronous>, transform_indices = @transform_12, window_bounds = array<i64: 64, 128>}, {pipeline_mode = #tpu.pipeline_mode<synchronous>, transform_indices = @transform_13, window_bounds = array<i64: 1, 128>}, {pipeline_mode = #tpu.pipeline_mode<synchronous>, transform_indices = @transform_14, window_bounds = array<i64: 384, 128>}]} {
    %c0_i32 = arith.constant 0 : i32
    %0 = arith.cmpi eq, %arg0, %c0_i32 : i32
    %c0_i32_0 = arith.constant 0 : i32
    %1 = arith.cmpi eq, %arg1, %c0_i32_0 : i32
    %2 = arith.andi %0, %1 : i1
    %3 = arith.extui %2 : i1 to i32
    %c0_i32_1 = arith.constant 0 : i32
    %4 = arith.cmpi ne, %3, %c0_i32_1 : i32
    scf.if %4 {
      %c0_16 = arith.constant 0 : index
      %c0_17 = arith.constant 0 : index
      %33 = vector.load %arg2[%c0_16, %c0_17] : memref<384x64xf32, #tpu.memory_space<vmem>>, vector<384x64xf32>
      %c0_18 = arith.constant 0 : index
      %c0_19 = arith.constant 0 : index
      %34 = vector.load %arg17[%c0_18, %c0_19] : memref<384x64xf32, #tpu.memory_space<vmem>>, vector<384x64xf32>
      tpu.vector_store %arg17[%c0_18, %c0_19], %33 {strides = array<i32>} : memref<384x64xf32, #tpu.memory_space<vmem>>, vector<384x64xf32>,
    } else {
    }
    %c0_i32_2 = arith.constant 0 : i32
    %5 = arith.cmpi eq, %arg1, %c0_i32_2 : i32
    %6 = arith.extui %5 : i1 to i32
    %c0_i32_3 = arith.constant 0 : i32
    %7 = arith.cmpi ne, %6, %c0_i32_3 : i32
    scf.if %7 {
      %c0_16 = arith.constant 0 : index
      %c0_17 = arith.constant 0 : index
      %33 = vector.load %arg17[%c0_16, %c0_17] : memref<384x64xf32, #tpu.memory_space<vmem>>, vector<384x64xf32>
      %34 = arith.truncf %33 : vector<384x64xf32> to vector<384x64xbf16>
      %c0_18 = arith.constant 0 : index
      %c0_19 = arith.constant 0 : index
      %35 = vector.load %arg4[%c0_18, %c0_19] : memref<64x64xbf16, #tpu.memory_space<vmem>>, vector<64x64xbf16>
      %cst_20 = arith.constant dense<0.000000e+00> : vector<384x64xf32>
      %36 = tpu.matmul %34, %35, %cst_20 {dimension_numbers = #tpu.dot_dimension_numbers<[1], [0], [0], [1], [0, 0, 1, 1], [], []>} : vector<384x64xbf16>, vector<64x64xbf16>, vector<384x64xf32> -> vector<384x64xf32>
      %c0_21 = arith.constant 0 : index
      %c0_22 = arith.constant 0 : index
      %37 = vector.load %arg5[%c0_21, %c0_22] : memref<1x64xf32, #tpu.memory_space<vmem>>, vector<1x64xf32>
      %38 = vector.broadcast %37 : vector<1x64xf32> to vector<384x64xf32>
      %39 = arith.addf %36, %38 : vector<384x64xf32>
      %40 = arith.truncf %39 : vector<384x64xf32> to vector<384x64xbf16>
      %c0_23 = arith.constant 0 : index
      %c0_24 = arith.constant 0 : index
      %41 = vector.load %arg18[%c0_23, %c0_24] : memref<384x64xbf16, #tpu.memory_space<vmem>>, vector<384x64xbf16>
      tpu.vector_store %arg18[%c0_23, %c0_24], %40 {strides = array<i32>} : memref<384x64xbf16, #tpu.memory_space<vmem>>, vector<384x64xbf16>,
      %c0_25 = arith.constant 0 : index
      %c0_26 = arith.constant 0 : index
      %42 = vector.load %arg6[%c0_25, %c0_26] : memref<64x64xbf16, #tpu.memory_space<vmem>>, vector<64x64xbf16>
      %cst_27 = arith.constant dense<0.000000e+00> : vector<384x64xf32>
      %43 = tpu.matmul %34, %42, %cst_27 {dimension_numbers = #tpu.dot_dimension_numbers<[1], [0], [0], [1], [0, 0, 1, 1], [], []>} : vector<384x64xbf16>, vector<64x64xbf16>, vector<384x64xf32> -> vector<384x64xf32>
      %c0_28 = arith.constant 0 : index
      %c0_29 = arith.constant 0 : index
      %44 = vector.load %arg7[%c0_28, %c0_29] : memref<1x64xf32, #tpu.memory_space<vmem>>, vector<1x64xf32>
      %45 = vector.broadcast %44 : vector<1x64xf32> to vector<384x64xf32>
      %46 = arith.addf %43, %45 : vector<384x64xf32>
      %47 = arith.truncf %46 : vector<384x64xf32> to vector<384x64xbf16>
      %c0_30 = arith.constant 0 : index
      %c0_31 = arith.constant 0 : index
      %48 = vector.load %arg19[%c0_30, %c0_31] : memref<384x64xbf16, #tpu.memory_space<vmem>>, vector<384x64xbf16>
      tpu.vector_store %arg19[%c0_30, %c0_31], %47 {strides = array<i32>} : memref<384x64xbf16, #tpu.memory_space<vmem>>, vector<384x64xbf16>,
      %cst_32 = arith.constant 0.000000e+00 : f32
      %49 = vector.broadcast %cst_32 : f32 to vector<384x64xf32>
      %c0_33 = arith.constant 0 : index
      %c0_34 = arith.constant 0 : index
      %50 = vector.load %arg21[%c0_33, %c0_34] : memref<384x64xf32, #tpu.memory_space<vmem>>, vector<384x64xf32>
      tpu.vector_store %arg21[%c0_33, %c0_34], %49 {strides = array<i32>} : memref<384x64xf32, #tpu.memory_space<vmem>>, vector<384x64xf32>,
    } else {
    }
    %c128_i32 = arith.constant 128 : i32
    %8 = arith.muli %arg1, %c128_i32 : i32
    %9 = tpu.assume_multiple %8, 128 : i32
    %10 = arith.index_cast %9 : i32 to index
    %c0 = arith.constant 0 : index
    %11 = vector.load %arg3[%10, %c0] : memref<384x384xi8, #tpu.memory_space<vmem>>, vector<128x384xi8>
    %12 = arith.sitofp %11 : vector<128x384xi8> to vector<128x384xf32>
    %13 = arith.truncf %12 : vector<128x384xf32> to vector<128x384xbf16>
    %c0_4 = arith.constant 0 : index
    %c0_5 = arith.constant 0 : index
    %14 = vector.load %arg18[%c0_4, %c0_5] : memref<384x64xbf16, #tpu.memory_space<vmem>>, vector<384x64xbf16>
    %cst = arith.constant dense<0.000000e+00> : vector<128x64xf32>
    %15 = tpu.matmul %13, %14, %cst {dimension_numbers = #tpu.dot_dimension_numbers<[1], [0], [0], [1], [0, 0, 1, 1], [], []>} : vector<128x384xbf16>, vector<384x64xbf16>, vector<128x64xf32> -> vector<128x64xf32>
    %16 = arith.truncf %15 : vector<128x64xf32> to vector<128x64xbf16>
    %17 = arith.index_cast %9 : i32 to index
    %c0_6 = arith.constant 0 : index
    %18 = vector.load %arg20[%17, %c0_6] : memref<384x64xbf16, #tpu.memory_space<vmem>>, vector<128x64xbf16>
    tpu.vector_store %arg20[%17, %c0_6], %16 {strides = array<i32>} : memref<384x64xbf16, #tpu.memory_space<vmem>>, vector<128x64xbf16>,
    %c0_7 = arith.constant 0 : index
    %c0_8 = arith.constant 0 : index
    %19 = vector.load %arg21[%c0_7, %c0_8] : memref<384x64xf32, #tpu.memory_space<vmem>>, vector<384x64xf32>
    %20 = arith.index_cast %9 : i32 to index
    %c0_9 = arith.constant 0 : index
    %21 = vector.load %arg19[%20, %c0_9] : memref<384x64xbf16, #tpu.memory_space<vmem>>, vector<128x64xbf16>
    %cst_10 = arith.constant dense<0.000000e+00> : vector<384x64xf32>
    %22 = tpu.matmul %13, %21, %cst_10 {dimension_numbers = #tpu.dot_dimension_numbers<[0], [0], [1], [1], [0, 1, 1, 1], [], []>} : vector<128x384xbf16>, vector<128x64xbf16>, vector<384x64xf32> -> vector<384x64xf32>
    %23 = arith.addf %19, %22 : vector<384x64xf32>
    %c0_11 = arith.constant 0 : index
    %c0_12 = arith.constant 0 : index
    %24 = vector.load %arg21[%c0_11, %c0_12] : memref<384x64xf32, #tpu.memory_space<vmem>>, vector<384x64xf32>
    tpu.vector_store %arg21[%c0_11, %c0_12], %23 {strides = array<i32>} : memref<384x64xf32, #tpu.memory_space<vmem>>, vector<384x64xf32>,
    %c2_i32 = arith.constant 2 : i32
    %25 = arith.cmpi eq, %arg1, %c2_i32 : i32
    %26 = arith.extui %25 : i1 to i32
    %c0_i32_13 = arith.constant 0 : i32
    %27 = arith.cmpi ne, %26, %c0_i32_13 : i32
    scf.if %27 {
      %c0_16 = arith.constant 0 : index
      %c0_17 = arith.constant 0 : index
      %33 = vector.load %arg17[%c0_16, %c0_17] : memref<384x64xf32, #tpu.memory_space<vmem>>, vector<384x64xf32>
      %34 = arith.truncf %33 : vector<384x64xf32> to vector<384x64xbf16>
      %c0_18 = arith.constant 0 : index
      %c0_19 = arith.constant 0 : index
      %35 = vector.load %arg8[%c0_18, %c0_19] : memref<64x64xbf16, #tpu.memory_space<vmem>>, vector<64x64xbf16>
      %cst_20 = arith.constant dense<0.000000e+00> : vector<384x64xf32>
      %36 = tpu.matmul %34, %35, %cst_20 {dimension_numbers = #tpu.dot_dimension_numbers<[1], [0], [0], [1], [0, 0, 1, 1], [], []>} : vector<384x64xbf16>, vector<64x64xbf16>, vector<384x64xf32> -> vector<384x64xf32>
      %c0_21 = arith.constant 0 : index
      %c0_22 = arith.constant 0 : index
      %37 = vector.load %arg20[%c0_21, %c0_22] : memref<384x64xbf16, #tpu.memory_space<vmem>>, vector<384x64xbf16>
      %c0_23 = arith.constant 0 : index
      %c0_24 = arith.constant 0 : index
      %38 = vector.load %arg9[%c0_23, %c0_24] : memref<64x64xbf16, #tpu.memory_space<vmem>>, vector<64x64xbf16>
      %cst_25 = arith.constant dense<0.000000e+00> : vector<384x64xf32>
      %39 = tpu.matmul %37, %38, %cst_25 {dimension_numbers = #tpu.dot_dimension_numbers<[1], [0], [0], [1], [0, 0, 1, 1], [], []>} : vector<384x64xbf16>, vector<64x64xbf16>, vector<384x64xf32> -> vector<384x64xf32>
      %40 = arith.addf %36, %39 : vector<384x64xf32>
      %c0_26 = arith.constant 0 : index
      %c0_27 = arith.constant 0 : index
      %41 = vector.load %arg21[%c0_26, %c0_27] : memref<384x64xf32, #tpu.memory_space<vmem>>, vector<384x64xf32>
      %42 = arith.truncf %41 : vector<384x64xf32> to vector<384x64xbf16>
      %c0_28 = arith.constant 0 : index
      %c0_29 = arith.constant 0 : index
      %43 = vector.load %arg10[%c0_28, %c0_29] : memref<64x64xbf16, #tpu.memory_space<vmem>>, vector<64x64xbf16>
      %cst_30 = arith.constant dense<0.000000e+00> : vector<384x64xf32>
      %44 = tpu.matmul %42, %43, %cst_30 {dimension_numbers = #tpu.dot_dimension_numbers<[1], [0], [0], [1], [0, 0, 1, 1], [], []>} : vector<384x64xbf16>, vector<64x64xbf16>, vector<384x64xf32> -> vector<384x64xf32>
      %45 = arith.addf %40, %44 : vector<384x64xf32>
      %c0_31 = arith.constant 0 : index
      %c0_32 = arith.constant 0 : index
      %46 = vector.load %arg11[%c0_31, %c0_32] : memref<1x64xf32, #tpu.memory_space<vmem>>, vector<1x64xf32>
      %47 = vector.broadcast %46 : vector<1x64xf32> to vector<384x64xf32>
      %48 = arith.addf %45, %47 : vector<384x64xf32>
      %cst_33 = arith.constant 0.000000e+00 : f32
      %49 = vector.broadcast %cst_33 : f32 to vector<384x64xf32>
      %50 = arith.maximumf %48, %49 : vector<384x64xf32>
      %51 = arith.truncf %50 : vector<384x64xf32> to vector<384x64xbf16>
      %c0_34 = arith.constant 0 : index
      %c0_35 = arith.constant 0 : index
      %52 = vector.load %arg12[%c0_34, %c0_35] : memref<64x64xbf16, #tpu.memory_space<vmem>>, vector<64x64xbf16>
      %cst_36 = arith.constant dense<0.000000e+00> : vector<384x64xf32>
      %53 = tpu.matmul %51, %52, %cst_36 {dimension_numbers = #tpu.dot_dimension_numbers<[1], [0], [0], [1], [0, 0, 1, 1], [], []>} : vector<384x64xbf16>, vector<64x64xbf16>, vector<384x64xf32> -> vector<384x64xf32>
      %c0_37 = arith.constant 0 : index
      %c0_38 = arith.constant 0 : index
      %54 = vector.load %arg13[%c0_37, %c0_38] : memref<1x64xf32, #tpu.memory_space<vmem>>, vector<1x64xf32>
      %55 = vector.broadcast %54 : vector<1x64xf32> to vector<384x64xf32>
      %56 = arith.addf %53, %55 : vector<384x64xf32>
      %57 = arith.addf %33, %56 : vector<384x64xf32>
      %c0_39 = arith.constant 0 : index
      %c0_40 = arith.constant 0 : index
      %58 = vector.load %arg17[%c0_39, %c0_40] : memref<384x64xf32, #tpu.memory_space<vmem>>, vector<384x64xf32>
      tpu.vector_store %arg17[%c0_39, %c0_40], %57 {strides = array<i32>} : memref<384x64xf32, #tpu.memory_space<vmem>>, vector<384x64xf32>,
    } else {
    }
    %c1_i32 = arith.constant 1 : i32
    %28 = arith.cmpi eq, %arg0, %c1_i32 : i32
    %c2_i32_14 = arith.constant 2 : i32
    %29 = arith.cmpi eq, %arg1, %c2_i32_14 : i32
    %30 = arith.andi %28, %29 : i1
    %31 = arith.extui %30 : i1 to i32
    %c0_i32_15 = arith.constant 0 : i32
    %32 = arith.cmpi ne, %31, %c0_i32_15 : i32
    scf.if %32 {
      %c0_16 = arith.constant 0 : index
      %c0_17 = arith.constant 0 : index
      %33 = vector.load %arg17[%c0_16, %c0_17] : memref<384x64xf32, #tpu.memory_space<vmem>>, vector<384x64xf32>
      %34 = arith.truncf %33 : vector<384x64xf32> to vector<384x64xbf16>
      %c0_18 = arith.constant 0 : index
      %c0_19 = arith.constant 0 : index
      %35 = vector.load %arg14[%c0_18, %c0_19] : memref<64x128xbf16, #tpu.memory_space<vmem>>, vector<64x128xbf16>
      %cst_20 = arith.constant dense<0.000000e+00> : vector<384x128xf32>
      %36 = tpu.matmul %34, %35, %cst_20 {dimension_numbers = #tpu.dot_dimension_numbers<[1], [0], [0], [1], [0, 0, 1, 1], [], []>} : vector<384x64xbf16>, vector<64x128xbf16>, vector<384x128xf32> -> vector<384x128xf32>
      %c0_21 = arith.constant 0 : index
      %c0_22 = arith.constant 0 : index
      %37 = vector.load %arg15[%c0_21, %c0_22] : memref<1x128xf32, #tpu.memory_space<vmem>>, vector<1x128xf32>
      %38 = vector.broadcast %37 : vector<1x128xf32> to vector<384x128xf32>
      %39 = arith.addf %36, %38 : vector<384x128xf32>
      %c0_23 = arith.constant 0 : index
      %c0_24 = arith.constant 0 : index
      %40 = vector.load %arg16[%c0_23, %c0_24] : memref<384x128xf32, #tpu.memory_space<vmem>>, vector<384x128xf32>
      tpu.vector_store %arg16[%c0_23, %c0_24], %39 {strides = array<i32>} : memref<384x128xf32, #tpu.memory_space<vmem>>, vector<384x128xf32>,
    } else {
    }
    return
  }
  func.func @transform_0(%arg0: i32, %arg1: i32) -> (i32, i32) {
    %c0_i32 = arith.constant 0 : i32
    %c0_i32_0 = arith.constant 0 : i32
    %c0_i32_1 = arith.constant 0 : i32
    return %c0_i32, %c0_i32_0 : i32, i32
  }
  func.func @transform_1(%arg0: i32, %arg1: i32) -> (i32, i32) {
    %c0_i32 = arith.constant 0 : i32
    %c0_i32_0 = arith.constant 0 : i32
    %c0_i32_1 = arith.constant 0 : i32
    return %c0_i32, %c0_i32_0 : i32, i32
  }
  func.func @transform_2(%arg0: i32, %arg1: i32) -> (i32, i32) {
    %c0_i32 = arith.constant 0 : i32
    %c0_i32_0 = arith.constant 0 : i32
    %c0_i32_1 = arith.constant 0 : i32
    return %c0_i32, %c0_i32_0 : i32, i32
  }
  func.func @transform_3(%arg0: i32, %arg1: i32) -> (i32, i32) {
    %c0_i32 = arith.constant 0 : i32
    %c0_i32_0 = arith.constant 0 : i32
    %c0_i32_1 = arith.constant 0 : i32
    return %c0_i32, %c0_i32_0 : i32, i32
  }
  func.func @transform_4(%arg0: i32, %arg1: i32) -> (i32, i32) {
    %c0_i32 = arith.constant 0 : i32
    %c0_i32_0 = arith.constant 0 : i32
    %c0_i32_1 = arith.constant 0 : i32
    return %c0_i32, %c0_i32_0 : i32, i32
  }
  func.func @transform_5(%arg0: i32, %arg1: i32) -> (i32, i32) {
    %c0_i32 = arith.constant 0 : i32
    %c0_i32_0 = arith.constant 0 : i32
    %c0_i32_1 = arith.constant 0 : i32
    return %c0_i32, %c0_i32_0 : i32, i32
  }
  func.func @transform_6(%arg0: i32, %arg1: i32) -> (i32, i32) {
    %c0_i32 = arith.constant 0 : i32
    %c0_i32_0 = arith.constant 0 : i32
    %c0_i32_1 = arith.constant 0 : i32
    return %c0_i32, %c0_i32_0 : i32, i32
  }
  func.func @transform_7(%arg0: i32, %arg1: i32) -> (i32, i32) {
    %c0_i32 = arith.constant 0 : i32
    %c0_i32_0 = arith.constant 0 : i32
    %c0_i32_1 = arith.constant 0 : i32
    return %c0_i32, %c0_i32_0 : i32, i32
  }
  func.func @transform_8(%arg0: i32, %arg1: i32) -> (i32, i32) {
    %c0_i32 = arith.constant 0 : i32
    %c0_i32_0 = arith.constant 0 : i32
    %c0_i32_1 = arith.constant 0 : i32
    return %c0_i32, %c0_i32_0 : i32, i32
  }
  func.func @transform_9(%arg0: i32, %arg1: i32) -> (i32, i32) {
    %c0_i32 = arith.constant 0 : i32
    %c0_i32_0 = arith.constant 0 : i32
    %c0_i32_1 = arith.constant 0 : i32
    return %c0_i32, %c0_i32_0 : i32, i32
  }
  func.func @transform_10(%arg0: i32, %arg1: i32) -> (i32, i32) {
    %c0_i32 = arith.constant 0 : i32
    %c0_i32_0 = arith.constant 0 : i32
    %c0_i32_1 = arith.constant 0 : i32
    return %c0_i32, %c0_i32_0 : i32, i32
  }
  func.func @transform_11(%arg0: i32, %arg1: i32) -> (i32, i32) {
    %c0_i32 = arith.constant 0 : i32
    %c0_i32_0 = arith.constant 0 : i32
    %c0_i32_1 = arith.constant 0 : i32
    return %c0_i32, %c0_i32_0 : i32, i32
  }
  func.func @transform_12(%arg0: i32, %arg1: i32) -> (i32, i32) {
    %c0_i32 = arith.constant 0 : i32
    %c0_i32_0 = arith.constant 0 : i32
    %c0_i32_1 = arith.constant 0 : i32
    return %c0_i32, %c0_i32_0 : i32, i32
  }
  func.func @transform_13(%arg0: i32, %arg1: i32) -> (i32, i32) {
    %c0_i32 = arith.constant 0 : i32
    %c0_i32_0 = arith.constant 0 : i32
    %c0_i32_1 = arith.constant 0 : i32
    return %c0_i32, %c0_i32_0 : i32, i32
  }
  func.func @transform_14(%arg0: i32, %arg1: i32) -> (i32, i32) {
    %c0_i32 = arith.constant 0 : i32
    %c0_i32_0 = arith.constant 0 : i32
    %c0_i32_1 = arith.constant 0 : i32
    return %c0_i32, %c0_i32_0 : i32, i32
  }
}

</mosaic_0001>

<bundles_post_ra>
// kernel: tpu_custom_call.1
= control target key start
LH: loop header
LB: loop body
LE: loop exit
PB: predicated region body
PF: predicated region fallthrough
CT: control target
= control target key end

     0   :  { %s6394_s0 = inlined_call_operand.vmem [shape: f32[384,64], index: 0, kind: input, shape index: {}]   ;;  %s6395_s1 = inlined_call_operand.vmem [shape: s8[384,384], index: 1, kind: input, shape index: {}]   ;;  %s6396_s2 = inlined_call_operand.vmem [shape: bf16[64,64], index: 2, kind: input, shape index: {}]   ;;  %s6397_s3 = inlined_call_operand.vmem [shape: f32[1,64], index: 3, kind: input, shape index: {}]   ;;  %s6398_s4 = inlined_call_operand.vmem [shape: bf16[64,64], index: 4, kind: input, shape index: {}]   ;;  %s6399_s5 = inlined_call_operand.vmem [shape: f32[1,64], index: 5, kind: input, shape index: {}]   ;;  %s6400_s6 = inlined_call_operand.vmem [shape: bf16[64,64], index: 6, kind: input, shape index: {}]   ;;  %s6401_s7 = inlined_call_operand.vmem [shape: bf16[64,64], index: 7, kind: input, shape index: {}]   ;;  %s6402_s8 = inlined_call_operand.vmem [shape: bf16[64,64], index: 8, kind: input, shape index: {}]   ;;  %s6403_s9 = inlined_call_operand.vmem [shape: f32[1,64], index: 9, kind: input, shape index: {}]   ;;  %s6404_s10 = inlined_call_operand.vmem [shape: bf16[64,64], index: 10, kind: input, shape index: {}]   ;;  %s6405_s11 = inlined_call_operand.vmem [shape: f32[1,64], index: 11, kind: input, shape index: {}]   ;;  %s6406_s12 = inlined_call_operand.vmem [shape: bf16[64,128], index: 12, kind: input, shape index: {}]   ;;  %s6407_s13 = inlined_call_operand.vmem [shape: f32[1,128], index: 13, kind: input, shape index: {}]   ;;  %s6408_s14 = inlined_call_operand.hbm [shape: f32[384,128], index: 14, kind: output, shape index: {}]  }
   0x1   :  { %6409 = sst [smem:[#allocation10_spill]] %s6394_s0 }
   0x2   :  { %19 = vsyncpa [#allocation8], 0  ;;  %s4984_s29 = smov 0   ;;  %s4986_s30 = smov 0  }
   0x3   :  { %s4988_s15 = smov 0   ;;  %s4990_s16 = smov 0  }
   0x4   :  { %s4992_s17 = smov 0  }
   0x5 LB: > { %s34_s19 = sadd.s32 1, %s4894_s15  ;;  %s37_s20 = sadd.s32 1, %s4898_s16  ;;  %s4902_s17 = sphi %s4992_s17, %s25_s17   ;;  %s4898_s16 = sphi %s4990_s16, %s6415_s16   ;;  %s4894_s15 = sphi %s4988_s15, %s6414_s15   ;;  %s4890_s30 = sphi %s4986_s30, %s6413_s30   ;;  %s4886_s29 = sphi %s4984_s29, %s6412_s29  }
   0x6   : > { %p35_p0 = scmp.ge.s32.totalorder %s34_s19, 3  ;;  %p4103_p1 = scmp.ge.s32.totalorder %s4902_s17, 1 }
   0x7   : > { %p410_p2 = scmp.lt.s32.totalorder %s4902_s17, 7 }
   0x8   : > { %s6417_s19 = smov (%p35_p0, %s34_s19), 0  ;;  %s6419_s20 = smov (!%p35_p0, %s37_s20), %s4898_s16 }
   0x9   : > { %p411_p3 = pnand %p4103_p1, %p410_p2  ;;  %p39_p4 = scmp.ge.s32.totalorder %s6419_s20, 2 }
   0xa   : > { %p447_p5 = scmp.eq.s32.totalorder (!%p411_p3), %s4890_s30, 0  ;;  %p448_p6 = scmp.eq.s32.totalorder (!%p411_p3), %s4886_s29, 0 }
   0xb   : > { %s6421_s20 = smov (%p39_p4, %s6419_s20), 0  ;;  %414 = sbr.rel (%p411_p3) target bundleno = 1943 (0x797), region = 76 }
   0xc   : > { %p449_p7 = pnand (!%p411_p3), %p448_p6, %p447_p5 }
  0x10   : > { %452 = sbr.rel (%p449_p7) target bundleno = 71 (0x47), region = 80  ;;  %s6410_s0 = sld [smem:[#allocation10_spill]] (!%p449_p7) }
  0x15   : > { %vm501_vm0 = vcmask 523264  }
  0x16   : > { %v453_v0 = vld [vmem:[%s6410_s0] sm:$0xff]  ;;  %v454_v1 = vld [vmem:[%s6410_s0 + $0x8] sm:$0xff]  ;;  %v455_v2 = vld [vmem:[%s6410_s0 + $0x10] sm:$0xff] }
  0x17   : > { %502 = vst.msk [vmem:[#allocation2] sm:$0xff] %vm501_vm0, %v453_v0  ;;  %v456_v3 = vld [vmem:[%s6410_s0 + $0x18] sm:$0xff]  ;;  %v457_v4 = vld [vmem:[%s6410_s0 + $0x20] sm:$0xff]  ;;  %v458_v5 = vld [vmem:[%s6410_s0 + $0x28] sm:$0xff] }
  0x18   : > { %503 = vst.msk [vmem:[#allocation2 + $0x8] sm:$0xff] %vm501_vm0, %v454_v1  ;;  %v459_v6 = vld [vmem:[%s6410_s0 + $0x30] sm:$0xff]  ;;  %v460_v7 = vld [vmem:[%s6410_s0 + $0x38] sm:$0xff]  ;;  %v461_v8 = vld [vmem:[%s6410_s0 + $0x40] sm:$0xff] }
  0x19   : > { %504 = vst.msk [vmem:[#allocation2 + $0x10] sm:$0xff] %vm501_vm0, %v455_v2  ;;  %v462_v9 = vld [vmem:[%s6410_s0 + $0x48] sm:$0xff]  ;;  %v463_v10 = vld [vmem:[%s6410_s0 + $0x50] sm:$0xff]  ;;  %v464_v11 = vld [vmem:[%s6410_s0 + $0x58] sm:$0xff] }
  0x1a   : > { %505 = vst.msk [vmem:[#allocation2 + $0x18] sm:$0xff] %vm501_vm0, %v456_v3  ;;  %v465_v12 = vld [vmem:[%s6410_s0 + $0x60] sm:$0xff]  ;;  %v466_v13 = vld [vmem:[%s6410_s0 + $0x68] sm:$0xff]  ;;  %v467_v14 = vld [vmem:[%s6410_s0 + $0x70] sm:$0xff] }
  0x1b   : > { %506 = vst.msk [vmem:[#allocation2 + $0x20] sm:$0xff] %vm501_vm0, %v457_v4  ;;  %v468_v15 = vld [vmem:[%s6410_s0 + $0x78] sm:$0xff]  ;;  %v469_v16 = vld [vmem:[%s6410_s0 + $0x80] sm:$0xff]  ;;  %v470_v17 = vld [vmem:[%s6410_s0 + $0x88] sm:$0xff] }
  0x1c   : > { %507 = vst.msk [vmem:[#allocation2 + $0x28] sm:$0xff] %vm501_vm0, %v458_v5  ;;  %v471_v18 = vld [vmem:[%s6410_s0 + $0x90] sm:$0xff]  ;;  %v472_v19 = vld [vmem:[%s6410_s0 + $0x98] sm:$0xff]  ;;  %v473_v20 = vld [vmem:[%s6410_s0 + $0xa0] sm:$0xff] }
  0x1d   : > { %508 = vst.msk [vmem:[#allocation2 + $0x30] sm:$0xff] %vm501_vm0, %v459_v6  ;;  %v474_v21 = vld [vmem:[%s6410_s0 + $0xa8] sm:$0xff]  ;;  %v475_v22 = vld [vmem:[%s6410_s0 + $0xb0] sm:$0xff]  ;;  %v476_v23 = vld [vmem:[%s6410_s0 + $0xb8] sm:$0xff] }
  0x1e   : > { %509 = vst.msk [vmem:[#allocation2 + $0x38] sm:$0xff] %vm501_vm0, %v460_v7  ;;  %v477_v24 = vld [vmem:[%s6410_s0 + $0xc0] sm:$0xff]  ;;  %v478_v25 = vld [vmem:[%s6410_s0 + $0xc8] sm:$0xff]  ;;  %v479_v26 = vld [vmem:[%s6410_s0 + $0xd0] sm:$0xff] }
  0x1f   : > { %510 = vst.msk [vmem:[#allocation2 + $0x40] sm:$0xff] %vm501_vm0, %v461_v8  ;;  %v480_v27 = vld [vmem:[%s6410_s0 + $0xd8] sm:$0xff]  ;;  %v481_v28 = vld [vmem:[%s6410_s0 + $0xe0] sm:$0xff]  ;;  %v482_v29 = vld [vmem:[%s6410_s0 + $0xe8] sm:$0xff] }
  0x20   : > { %511 = vst.msk [vmem:[#allocation2 + $0x48] sm:$0xff] %vm501_vm0, %v462_v9  ;;  %v483_v30 = vld [vmem:[%s6410_s0 + $0xf0] sm:$0xff]  ;;  %v484_v31 = vld [vmem:[%s6410_s0 + $0xf8] sm:$0xff]  ;;  %v485_v32 = vld [vmem:[%s6410_s0 + $0x100] sm:$0xff] }
  0x21   : > { %512 = vst.msk [vmem:[#allocation2 + $0x50] sm:$0xff] %vm501_vm0, %v463_v10  ;;  %v486_v33 = vld [vmem:[%s6410_s0 + $0x108] sm:$0xff]  ;;  %v487_v34 = vld [vmem:[%s6410_s0 + $0x110] sm:$0xff]  ;;  %v488_v35 = vld [vmem:[%s6410_s0 + $0x118] sm:$0xff] }
  0x22   : > { %513 = vst.msk [vmem:[#allocation2 + $0x58] sm:$0xff] %vm501_vm0, %v464_v11  ;;  %v489_v36 = vld [vmem:[%s6410_s0 + $0x120] sm:$0xff]  ;;  %v490_v37 = vld [vmem:[%s6410_s0 + $0x128] sm:$0xff]  ;;  %v491_v38 = vld [vmem:[%s6410_s0 + $0x130] sm:$0xff] }
  0x23   : > { %514 = vst.msk [vmem:[#allocation2 + $0x60] sm:$0xff] %vm501_vm0, %v465_v12  ;;  %v492_v39 = vld [vmem:[%s6410_s0 + $0x138] sm:$0xff]  ;;  %v493_v40 = vld [vmem:[%s6410_s0 + $0x140] sm:$0xff]  ;;  %v494_v41 = vld [vmem:[%s6410_s0 + $0x148] sm:$0xff] }
  0x24   : > { %515 = vst.msk [vmem:[#allocation2 + $0x68] sm:$0xff] %vm501_vm0, %v466_v13  ;;  %v495_v42 = vld [vmem:[%s6410_s0 + $0x150] sm:$0xff]  ;;  %v496_v43 = vld [vmem:[%s6410_s0 + $0x158] sm:$0xff]  ;;  %v497_v44 = vld [vmem:[%s6410_s0 + $0x160] sm:$0xff] }
  0x25   : > { %516 = vst.msk [vmem:[#allocation2 + $0x70] sm:$0xff] %vm501_vm0, %v467_v14  ;;  %v498_v45 = vld [vmem:[%s6410_s0 + $0x168] sm:$0xff]  ;;  %v499_v46 = vld [vmem:[%s6410_s0 + $0x170] sm:$0xff]  ;;  %v500_v47 = vld [vmem:[%s6410_s0 + $0x178] sm:$0xff] }
  0x26   : > { %517 = vst.msk [vmem:[#allocation2 + $0x78] sm:$0xff] %vm501_vm0, %v468_v15 }
  0x27   : > { %518 = vst.msk [vmem:[#allocation2 + $0x80] sm:$0xff] %vm501_vm0, %v469_v16 }
  0x28   : > { %519 = vst.msk [vmem:[#allocation2 + $0x88] sm:$0xff] %vm501_vm0, %v470_v17 }
  0x29   : > { %520 = vst.msk [vmem:[#allocation2 + $0x90] sm:$0xff] %vm501_vm0, %v471_v18 }
  0x2a   : > { %521 = vst.msk [vmem:[#allocation2 + $0x98] sm:$0xff] %vm501_vm0, %v472_v19 }
  0x2b   : > { %522 = vst.msk [vmem:[#allocation2 + $0xa0] sm:$0xff] %vm501_vm0, %v473_v20 }
  0x2c   : > { %523 = vst.msk [vmem:[#allocation2 + $0xa8] sm:$0xff] %vm501_vm0, %v474_v21 }
  0x2d   : > { %524 = vst.msk [vmem:[#allocation2 + $0xb0] sm:$0xff] %vm501_vm0, %v475_v22 }
  0x2e   : > { %525 = vst.msk [vmem:[#allocation2 + $0xb8] sm:$0xff] %vm501_vm0, %v476_v23 }
  0x2f   : > { %526 = vst.msk [vmem:[#allocation2 + $0xc0] sm:$0xff] %vm501_vm0, %v477_v24 }
  0x30   : > { %527 = vst.msk [vmem:[#allocation2 + $0xc8] sm:$0xff] %vm501_vm0, %v478_v25 }
  0x31   : > { %528 = vst.msk [vmem:[#allocation2 + $0xd0] sm:$0xff] %vm501_vm0, %v479_v26 }
  0x32   : > { %529 = vst.msk [vmem:[#allocation2 + $0xd8] sm:$0xff] %vm501_vm0, %v480_v27 }
  0x33   : > { %530 = vst.msk [vmem:[#allocation2 + $0xe0] sm:$0xff] %vm501_vm0, %v481_v28 }
  0x34   : > { %531 = vst.msk [vmem:[#allocation2 + $0xe8] sm:$0xff] %vm501_vm0, %v482_v29 }
  0x35   : > { %532 = vst.msk [vmem:[#allocation2 + $0xf0] sm:$0xff] %vm501_vm0, %v483_v30 }
  0x36   : > { %533 = vst.msk [vmem:[#allocation2 + $0xf8] sm:$0xff] %vm501_vm0, %v484_v31 }
  0x37   : > { %534 = vst.msk [vmem:[#allocation2 + $0x100] sm:$0xff] %vm501_vm0, %v485_v32 }
  0x38   : > { %535 = vst.msk [vmem:[#allocation2 + $0x108] sm:$0xff] %vm501_vm0, %v486_v33 }
  0x39   : > { %536 = vst.msk [vmem:[#allocation2 + $0x110] sm:$0xff] %vm501_vm0, %v487_v34 }
  0x3a   : > { %537 = vst.msk [vmem:[#allocation2 + $0x118] sm:$0xff] %vm501_vm0, %v488_v35 }
  0x3b   : > { %538 = vst.msk [vmem:[#allocation2 + $0x120] sm:$0xff] %vm501_vm0, %v489_v36 }
  0x3c   : > { %539 = vst.msk [vmem:[#allocation2 + $0x128] sm:$0xff] %vm501_vm0, %v490_v37 }
  0x3d   : > { %540 = vst.msk [vmem:[#allocation2 + $0x130] sm:$0xff] %vm501_vm0, %v491_v38 }
  0x3e   : > { %541 = vst.msk [vmem:[#allocation2 + $0x138] sm:$0xff] %vm501_vm0, %v492_v39 }
  0x3f   : > { %542 = vst.msk [vmem:[#allocation2 + $0x140] sm:$0xff] %vm501_vm0, %v493_v40 }
  0x40   : > { %543 = vst.msk [vmem:[#allocation2 + $0x148] sm:$0xff] %vm501_vm0, %v494_v41 }
  0x41   : > { %544 = vst.msk [vmem:[#allocation2 + $0x150] sm:$0xff] %vm501_vm0, %v495_v42 }
  0x42   : > { %545 = vst.msk [vmem:[#allocation2 + $0x158] sm:$0xff] %vm501_vm0, %v496_v43 }
  0x43   : > { %546 = vst.msk [vmem:[#allocation2 + $0x160] sm:$0xff] %vm501_vm0, %v497_v44 }
  0x44   : > { %547 = vst.msk [vmem:[#allocation2 + $0x168] sm:$0xff] %vm501_vm0, %v498_v45 }
  0x45   : > { %548 = vst.msk [vmem:[#allocation2 + $0x170] sm:$0xff] %vm501_vm0, %v499_v46 }
  0x46   : > { %549 = vst.msk [vmem:[#allocation2 + $0x178] sm:$0xff] %vm501_vm0, %v500_v47 }
  0x47 PF: > { %p4104_p8 = scmp.ne.s32.totalorder %s4886_s29, 0 }
  0x49   : > { %552 = sbr.rel (%p4104_p8) target bundleno = 431 (0x1af), region = 84 }
  0x4e   : > { %v4621_v48 = vld [vmem:[%s6396_s2 + $0x18] sm:$0xff]  ;;  %v4620_v50 = vld [vmem:[%s6396_s2 + $0x10] sm:$0xff]  ;;  %v4619_v52 = vld [vmem:[%s6396_s2 + $0x8] sm:$0xff]  ;;  %vm661_vm1 = vcmask 523264   ;;  %vm911_vm2 = vcmask 519168  }
  0x4f   : > { %v4625_v49 = vld [vmem:[%s6398_s4 + $0x18] sm:$0xff]  ;;  %738 = vmatpush.bf16.msra.mxu0 %v4621_v48  ;;  %4703 = vmatpush.bf16.msra.mxu2 %v4621_v48  ;;  %v4624_v51 = vld [vmem:[%s6398_s4 + $0x10] sm:$0xff]  ;;  %v4623_v53 = vld [vmem:[%s6398_s4 + $0x8] sm:$0xff] }
  0x50   : > { %1000 = vmatpush.bf16.msra.mxu1 %v4625_v49  ;;  %4707 = vmatpush.bf16.msra.mxu3 %v4625_v49  ;;  %v4618_v54 = vld [vmem:[%s6396_s2] sm:$0xff]  ;;  %v554_v56 = vld [vmem:[#allocation2 + $0x8] sm:$0xff]  ;;  %v555_v62 = vld [vmem:[#allocation2 + $0x10] sm:$0xff] }
  0x51   : > { %v553_v55 = vld [vmem:[#allocation2] sm:$0xff]  ;;  %v578_v58 = vld [vmem:[#allocation2 + $0xc8] sm:$0xff]  ;;  %v556_v63 = vld [vmem:[#allocation2 + $0x18] sm:$0xff] }
  0x52   : > { %v577_v57 = vld [vmem:[#allocation2 + $0xc0] sm:$0xff]  ;;  %v601_v60 = vpack.c.bf16 %v554_v56, %v553_v55  ;;  %v579_v0 = vld [vmem:[#allocation2 + $0xd0] sm:$0xff]  ;;  %v580_v1 = vld [vmem:[#allocation2 + $0xd8] sm:$0xff]  ;;  %v602_v2 = vpack.c.bf16 %v556_v63, %v555_v62 }
  0x53   : > { %739 = vmatpush.bf16.msra.mxu0 %v4620_v50  ;;  %4704 = vmatpush.bf16.msra.mxu2 %v4620_v50  ;;  %v4622_v59 = vld [vmem:[%s6398_s4] sm:$0xff]  ;;  %v613_v61 = vpack.c.bf16 %v578_v58, %v577_v57  ;;  %v614_v3 = vpack.c.bf16 %v580_v1, %v579_v0  ;;  %v558_v5 = vld [vmem:[#allocation2 + $0x28] sm:$0xff]  ;;  %v559_v10 = vld [vmem:[#allocation2 + $0x30] sm:$0xff] }
  0x54   : > { %1001 = vmatpush.bf16.msra.mxu1 %v4624_v51  ;;  %4708 = vmatpush.bf16.msra.mxu3 %v4624_v51  ;;  %v557_v4 = vld [vmem:[#allocation2 + $0x20] sm:$0xff]  ;;  %v582_v7 = vld [vmem:[#allocation2 + $0xe8] sm:$0xff]  ;;  %v560_v11 = vld [vmem:[#allocation2 + $0x38] sm:$0xff] }
  0x55   : > { %v581_v6 = vld [vmem:[#allocation2 + $0xe0] sm:$0xff]  ;;  %v603_v8 = vpack.c.bf16 %v558_v5, %v557_v4  ;;  %v583_v12 = vld [vmem:[#allocation2 + $0xf0] sm:$0xff]  ;;  %v584_v13 = vld [vmem:[#allocation2 + $0xf8] sm:$0xff]  ;;  %v604_v14 = vpack.c.bf16 %v560_v11, %v559_v10 }
  0x56   : > { %v615_v9 = vpack.c.bf16 %v582_v7, %v581_v6  ;;  %v616_v15 = vpack.c.bf16 %v584_v13, %v583_v12  ;;  %v561_v16 = vld [vmem:[#allocation2 + $0x40] sm:$0xff]  ;;  %v562_v17 = vld [vmem:[#allocation2 + $0x48] sm:$0xff]  ;;  %v563_v22 = vld [vmem:[#allocation2 + $0x50] sm:$0xff] }
  0x57   : > { %740 = vmatpush.bf16.msra.mxu0 %v4619_v52  ;;  %4705 = vmatpush.bf16.msra.mxu2 %v4619_v52  ;;  %v585_v18 = vld [vmem:[#allocation2 + $0x100] sm:$0xff]  ;;  %v586_v19 = vld [vmem:[#allocation2 + $0x108] sm:$0xff]  ;;  %v605_v20 = vpack.c.bf16 %v562_v17, %v561_v16  ;;  %v564_v23 = vld [vmem:[#allocation2 + $0x58] sm:$0xff] }
  0x58   : > { %1002 = vmatpush.bf16.msra.mxu1 %v4623_v53  ;;  %4709 = vmatpush.bf16.msra.mxu3 %v4623_v53  ;;  %v617_v21 = vpack.c.bf16 %v586_v19, %v585_v18  ;;  %v587_v24 = vld [vmem:[#allocation2 + $0x110] sm:$0xff]  ;;  %v588_v25 = vld [vmem:[#allocation2 + $0x118] sm:$0xff]  ;;  %v606_v26 = vpack.c.bf16 %v564_v23, %v563_v22  ;;  %v565_v28 = vld [vmem:[#allocation2 + $0x60] sm:$0xff] }
  0x59   : > { %v618_v27 = vpack.c.bf16 %v588_v25, %v587_v24  ;;  %v566_v29 = vld [vmem:[#allocation2 + $0x68] sm:$0xff]  ;;  %v589_v30 = vld [vmem:[#allocation2 + $0x120] sm:$0xff]  ;;  %v567_v34 = vld [vmem:[#allocation2 + $0x70] sm:$0xff] }
  0x5a   : > { %v590_v31 = vld [vmem:[#allocation2 + $0x128] sm:$0xff]  ;;  %v607_v32 = vpack.c.bf16 %v566_v29, %v565_v28  ;;  %v568_v35 = vld [vmem:[#allocation2 + $0x78] sm:$0xff]  ;;  %v591_v36 = vld [vmem:[#allocation2 + $0x130] sm:$0xff] }
  0x5b   : > { %741 = vmatpush.bf16.msra.mxu0 %v4618_v54  ;;  %4706 = vmatpush.bf16.msra.mxu2 %v4618_v54  ;;  %v619_v33 = vpack.c.bf16 %v590_v31, %v589_v30  ;;  %v592_v37 = vld [vmem:[#allocation2 + $0x138] sm:$0xff]  ;;  %v608_v38 = vpack.c.bf16 %v568_v35, %v567_v34  ;;  %v569_v40 = vld [vmem:[#allocation2 + $0x80] sm:$0xff]  ;;  %v570_v41 = vld [vmem:[#allocation2 + $0x88] sm:$0xff] }
  0x5c   : > { %1003 = vmatpush.bf16.msra.mxu1 %v4622_v59  ;;  %4710 = vmatpush.bf16.msra.mxu3 %v4622_v59  ;;  %v620_v39 = vpack.c.bf16 %v592_v37, %v591_v36  ;;  %v593_v42 = vld [vmem:[#allocation2 + $0x140] sm:$0xff]  ;;  %v594_v43 = vld [vmem:[#allocation2 + $0x148] sm:$0xff]  ;;  %v609_v46 = vpack.c.bf16 %v570_v41, %v569_v40  ;;  %v571_v1 = vld [vmem:[#allocation2 + $0x90] sm:$0xff] }
  0x5d   : > { %v5273_v44 = vld [vmem:[%s6397_s3] ss:$0 sm:$0xff]  ;;  %v621_v47 = vpack.c.bf16 %v594_v43, %v593_v42  ;;  %v595_v4 = vld [vmem:[#allocation2 + $0x150] sm:$0xff]  ;;  %v596_v5 = vld [vmem:[#allocation2 + $0x158] sm:$0xff] }
  0x5e   : > { %4121 = vmatmul.msk.bf16.vlgmr.msra.gmra.mxu0 %vm661_vm1, %v601_v60  ;;  %4133 = vmatmul.msk.bf16.vlgmr.msra.gmra.mxu2 %vm661_vm1, %v613_v61  ;;  %v5278_v45 = vld [vmem:[%s6399_s5] ss:$0 sm:$0xff]  ;;  %v622_v10 = vpack.c.bf16 %v596_v5, %v595_v4  ;;  %v598_v35 = vld [vmem:[#allocation2 + $0x168] sm:$0xff] }
  0x5f   : > { %4161 = vmatmul.msk.bf16.vlgmr.msra.gmra.mxu1 %vm661_vm1, %v601_v60  ;;  %4173 = vmatmul.msk.bf16.vlgmr.msra.gmra.mxu3 %vm661_vm1, %v613_v61  ;;  %v573_v31 = vld [vmem:[#allocation2 + $0xa0] sm:$0xff] }
  0x60   : > { %v597_v34 = vld [vmem:[#allocation2 + $0x160] sm:$0xff] }
  0x61   : > { %v623_v40 = vpack.c.bf16 %v598_v35, %v597_v34 }
  0x6e   : > { %4122 = vmatmul.msk.bf16.gmra.mxu0 %vm661_vm1, %v602_v2  ;;  %4134 = vmatmul.msk.bf16.gmra.mxu2 %vm661_vm1, %v614_v3 }
  0x6f   : > { %4162 = vmatmul.msk.bf16.gmra.mxu1 %vm661_vm1, %v602_v2  ;;  %4174 = vmatmul.msk.bf16.gmra.mxu3 %vm661_vm1, %v614_v3  ;;  %v572_v3 = vld [vmem:[#allocation2 + $0x98] sm:$0xff] }
  0x7e   : > { %4123 = vmatmul.msk.bf16.gmra.mxu0 %vm661_vm1, %v603_v8  ;;  %4135 = vmatmul.msk.bf16.gmra.mxu2 %vm661_vm1, %v615_v9 }
  0x7f   : > { %4163 = vmatmul.msk.bf16.gmra.mxu1 %vm661_vm1, %v603_v8  ;;  %4175 = vmatmul.msk.bf16.gmra.mxu3 %vm661_vm1, %v615_v9  ;;  %v610_v9 = vpack.c.bf16 %v572_v3, %v571_v1  ;;  %v576_v1 = vld [vmem:[#allocation2 + $0xb8] sm:$0xff] }
  0x80   : > { %v600_v3 = vld [vmem:[#allocation2 + $0x178] sm:$0xff] }
  0x8e   : > { %4124 = vmatmul.msk.bf16.gmra.mxu0 %vm661_vm1, %v604_v14  ;;  %4136 = vmatmul.msk.bf16.gmra.mxu2 %vm661_vm1, %v616_v15 }
  0x8f   : > { %4164 = vmatmul.msk.bf16.gmra.mxu1 %vm661_vm1, %v604_v14  ;;  %4176 = vmatmul.msk.bf16.gmra.mxu3 %vm661_vm1, %v616_v15 }
  0x9e   : > { %4125 = vmatmul.msk.bf16.gmra.mxu0 %vm661_vm1, %v605_v20  ;;  %4137 = vmatmul.msk.bf16.gmra.mxu2 %vm661_vm1, %v617_v21 }
  0x9f   : > { %4165 = vmatmul.msk.bf16.gmra.mxu1 %vm661_vm1, %v605_v20  ;;  %4177 = vmatmul.msk.bf16.gmra.mxu3 %vm661_vm1, %v617_v21 }
  0xae   : > { %4126 = vmatmul.msk.bf16.gmra.mxu0 %vm661_vm1, %v606_v26  ;;  %4138 = vmatmul.msk.bf16.gmra.mxu2 %vm661_vm1, %v618_v27 }
  0xaf   : > { %4166 = vmatmul.msk.bf16.gmra.mxu1 %vm661_vm1, %v606_v26  ;;  %4178 = vmatmul.msk.bf16.gmra.mxu3 %vm661_vm1, %v618_v27 }
  0xbe   : > { %4127 = vmatmul.msk.bf16.gmra.mxu0 %vm661_vm1, %v607_v32  ;;  %4139 = vmatmul.msk.bf16.gmra.mxu2 %vm661_vm1, %v619_v33 }
  0xbf   : > { %4167 = vmatmul.msk.bf16.gmra.mxu1 %vm661_vm1, %v607_v32  ;;  %4179 = vmatmul.msk.bf16.gmra.mxu3 %vm661_vm1, %v619_v33  ;;  %v574_v33 = vld [vmem:[#allocation2 + $0xa8] sm:$0xff] }
  0xce   : > { %4128 = vmatmul.msk.bf16.gmra.mxu0 %vm661_vm1, %v608_v38  ;;  %4140 = vmatmul.msk.bf16.gmra.mxu2 %vm661_vm1, %v620_v39 }
  0xcf   : > { %4168 = vmatmul.msk.bf16.gmra.mxu1 %vm661_vm1, %v608_v38  ;;  %4180 = vmatmul.msk.bf16.gmra.mxu3 %vm661_vm1, %v620_v39  ;;  %v611_v39 = vpack.c.bf16 %v574_v33, %v573_v31 }
  0xdb   : > { %v743_v48 = vpop.f32.mrf.mxu0 }
  0xdc   : > { %v744_v49 = vadd.f32 %v5273_v44, %v743_v48  ;;  %v1005_v50 = vpop.f32.mrf.mxu1 }
  0xdd   : > { %v1006_v51 = vadd.f32 %v5278_v45, %v1005_v50 }
  0xde   : > { %v863_v52 = vpack.c.bf16 %v744_v49, %v744_v49  ;;  %4129 = vmatmul.msk.bf16.gmra.mxu0 %vm661_vm1, %v609_v46  ;;  %4141 = vmatmul.msk.bf16.gmra.mxu2 %vm661_vm1, %v621_v47 }
  0xdf   : > { %v1125_v53 = vpack.c.bf16 %v1006_v51, %v1006_v51  ;;  %4169 = vmatmul.msk.bf16.gmra.mxu1 %vm661_vm1, %v609_v46  ;;  %4181 = vmatmul.msk.bf16.gmra.mxu3 %vm661_vm1, %v621_v47 }
  0xe0   : > { %912 = vst.msk [vmem:[#allocation3] sm:$0xf] %vm911_vm2, %v863_v52 }
  0xe1   : > { %1173 = vst.msk [vmem:[#allocation4] sm:$0xf] %vm911_vm2, %v1125_v53  ;;  %v803_v54 = vpop.f32.mrf.mxu2 }
  0xe2   : > { %v804_v55 = vadd.f32 %v5273_v44, %v803_v54  ;;  %v1065_v56 = vpop.f32.mrf.mxu3 }
  0xe3   : > { %v1066_v57 = vadd.f32 %v5278_v45, %v1065_v56  ;;  %v745_v58 = vpop.f32.mrf.mxu0 }
  0xe4   : > { %v887_v59 = vpack.c.bf16 %v804_v55, %v804_v55  ;;  %v746_v60 = vadd.f32 %v5273_v44, %v745_v58  ;;  %v1007_v61 = vpop.f32.mrf.mxu1 }
  0xe5   : > { %v1149_v62 = vpack.c.bf16 %v1066_v57, %v1066_v57  ;;  %v1008_v63 = vadd.f32 %v5278_v45, %v1007_v61 }
  0xe6   : > { %936 = vst.msk [vmem:[#allocation3 + $0x60] sm:$0xf] %vm911_vm2, %v887_v59  ;;  %v864_v0 = vpack.c.bf16 %v746_v60, %v746_v60 }
  0xe7   : > { %1197 = vst.msk [vmem:[#allocation4 + $0x60] sm:$0xf] %vm911_vm2, %v1149_v62  ;;  %v1126_v2 = vpack.c.bf16 %v1008_v63, %v1008_v63  ;;  %v575_v63 = vld [vmem:[#allocation2 + $0xb0] sm:$0xff] }
  0xe8   : > { %913 = vst.msk [vmem:[#allocation3 + $0x4] sm:$0xf] %vm911_vm2, %v864_v0 }
  0xe9   : > { %1174 = vst.msk [vmem:[#allocation4 + $0x4] sm:$0xf] %vm911_vm2, %v1126_v2  ;;  %v805_v6 = vpop.f32.mrf.mxu2  ;;  %v599_v2 = vld [vmem:[#allocation2 + $0x170] sm:$0xff] }
  0xea   : > { %v806_v7 = vadd.f32 %v5273_v44, %v805_v6  ;;  %v1067_v8 = vpop.f32.mrf.mxu3 }
  0xeb   : > { %v1068_v11 = vadd.f32 %v5278_v45, %v1067_v8  ;;  %v748_v12 = vpop.f32.mrf.mxu0  ;;  %v624_v8 = vpack.c.bf16 %v600_v3, %v599_v2 }
  0xec   : > { %v888_v13 = vpack.c.bf16 %v806_v7, %v806_v7  ;;  %v749_v14 = vadd.f32 %v5273_v44, %v748_v12  ;;  %v1010_v15 = vpop.f32.mrf.mxu1  ;;  %v612_v7 = vpack.c.bf16 %v576_v1, %v575_v63 }
  0xed   : > { %v1150_v16 = vpack.c.bf16 %v1068_v11, %v1068_v11  ;;  %v1011_v17 = vadd.f32 %v5278_v45, %v1010_v15 }
  0xee   : > { %937 = vst.msk [vmem:[#allocation3 + $0x64] sm:$0xf] %vm911_vm2, %v888_v13  ;;  %v865_v18 = vpack.c.bf16 %v749_v14, %v749_v14  ;;  %4130 = vmatmul.msk.bf16.gmra.mxu0 %vm661_vm1, %v610_v9  ;;  %4142 = vmatmul.msk.bf16.gmra.mxu2 %vm661_vm1, %v622_v10 }
  0xef   : > { %1198 = vst.msk [vmem:[#allocation4 + $0x64] sm:$0xf] %vm911_vm2, %v1150_v16  ;;  %v1127_v19 = vpack.c.bf16 %v1011_v17, %v1011_v17  ;;  %4170 = vmatmul.msk.bf16.gmra.mxu1 %vm661_vm1, %v610_v9  ;;  %4182 = vmatmul.msk.bf16.gmra.mxu3 %vm661_vm1, %v622_v10 }
  0xf0   : > { %914 = vst.msk [vmem:[#allocation3 + $0x8] sm:$0xf] %vm911_vm2, %v865_v18 }
  0xf1   : > { %1175 = vst.msk [vmem:[#allocation4 + $0x8] sm:$0xf] %vm911_vm2, %v1127_v19  ;;  %v808_v20 = vpop.f32.mrf.mxu2 }
  0xf2   : > { %v809_v21 = vadd.f32 %v5273_v44, %v808_v20  ;;  %v1070_v22 = vpop.f32.mrf.mxu3 }
  0xf3   : > { %v1071_v23 = vadd.f32 %v5278_v45, %v1070_v22  ;;  %v750_v24 = vpop.f32.mrf.mxu0 }
  0xf4   : > { %v889_v25 = vpack.c.bf16 %v809_v21, %v809_v21  ;;  %v751_v26 = vadd.f32 %v5273_v44, %v750_v24  ;;  %v1012_v27 = vpop.f32.mrf.mxu1 }
  0xf5   : > { %v1151_v28 = vpack.c.bf16 %v1071_v23, %v1071_v23  ;;  %v1013_v29 = vadd.f32 %v5278_v45, %v1012_v27 }
  0xf6   : > { %938 = vst.msk [vmem:[#allocation3 + $0x68] sm:$0xf] %vm911_vm2, %v889_v25  ;;  %v866_v30 = vpack.c.bf16 %v751_v26, %v751_v26 }
  0xf7   : > { %1199 = vst.msk [vmem:[#allocation4 + $0x68] sm:$0xf] %vm911_vm2, %v1151_v28  ;;  %v1128_v32 = vpack.c.bf16 %v1013_v29, %v1013_v29 }
  0xf8   : > { %915 = vst.msk [vmem:[#allocation3 + $0xc] sm:$0xf] %vm911_vm2, %v866_v30 }
  0xf9   : > { %1176 = vst.msk [vmem:[#allocation4 + $0xc] sm:$0xf] %vm911_vm2, %v1128_v32  ;;  %v810_v36 = vpop.f32.mrf.mxu2 }
  0xfa   : > { %v811_v37 = vadd.f32 %v5273_v44, %v810_v36  ;;  %v1072_v38 = vpop.f32.mrf.mxu3 }
  0xfb   : > { %v1073_v41 = vadd.f32 %v5278_v45, %v1072_v38  ;;  %v753_v42 = vpop.f32.mrf.mxu0 }
  0xfc   : > { %v890_v43 = vpack.c.bf16 %v811_v37, %v811_v37  ;;  %v754_v46 = vadd.f32 %v5273_v44, %v753_v42  ;;  %v1015_v47 = vpop.f32.mrf.mxu1 }
  0xfd   : > { %v1152_v48 = vpack.c.bf16 %v1073_v41, %v1073_v41  ;;  %v1016_v49 = vadd.f32 %v5278_v45, %v1015_v47 }
  0xfe   : > { %939 = vst.msk [vmem:[#allocation3 + $0x6c] sm:$0xf] %vm911_vm2, %v890_v43  ;;  %v867_v50 = vpack.c.bf16 %v754_v46, %v754_v46  ;;  %4131 = vmatmul.msk.bf16.gmra.mxu0 %vm661_vm1, %v611_v39  ;;  %4143 = vmatmul.msk.bf16.gmra.mxu2 %vm661_vm1, %v623_v40 }
  0xff   : > { %1200 = vst.msk [vmem:[#allocation4 + $0x6c] sm:$0xf] %vm911_vm2, %v1152_v48  ;;  %v1129_v51 = vpack.c.bf16 %v1016_v49, %v1016_v49  ;;  %4171 = vmatmul.msk.bf16.gmra.mxu1 %vm661_vm1, %v611_v39  ;;  %4183 = vmatmul.msk.bf16.gmra.mxu3 %vm661_vm1, %v623_v40 }
 0x100   : > { %916 = vst.msk [vmem:[#allocation3 + $0x10] sm:$0xf] %vm911_vm2, %v867_v50 }
 0x101   : > { %1177 = vst.msk [vmem:[#allocation4 + $0x10] sm:$0xf] %vm911_vm2, %v1129_v51  ;;  %v813_v52 = vpop.f32.mrf.mxu2 }
 0x102   : > { %v814_v53 = vadd.f32 %v5273_v44, %v813_v52  ;;  %v1075_v54 = vpop.f32.mrf.mxu3 }
 0x103   : > { %v1076_v55 = vadd.f32 %v5278_v45, %v1075_v54  ;;  %v755_v56 = vpop.f32.mrf.mxu0 }
 0x104   : > { %v891_v57 = vpack.c.bf16 %v814_v53, %v814_v53  ;;  %v756_v58 = vadd.f32 %v5273_v44, %v755_v56  ;;  %v1017_v59 = vpop.f32.mrf.mxu1 }
 0x105   : > { %v1153_v60 = vpack.c.bf16 %v1076_v55, %v1076_v55  ;;  %v1018_v61 = vadd.f32 %v5278_v45, %v1017_v59 }
 0x106   : > { %940 = vst.msk [vmem:[#allocation3 + $0x70] sm:$0xf] %vm911_vm2, %v891_v57  ;;  %v868_v62 = vpack.c.bf16 %v756_v58, %v756_v58 }
 0x107   : > { %1201 = vst.msk [vmem:[#allocation4 + $0x70] sm:$0xf] %vm911_vm2, %v1153_v60  ;;  %v1130_v0 = vpack.c.bf16 %v1018_v61, %v1018_v61 }
 0x108   : > { %917 = vst.msk [vmem:[#allocation3 + $0x14] sm:$0xf] %vm911_vm2, %v868_v62 }
 0x109   : > { %1178 = vst.msk [vmem:[#allocation4 + $0x14] sm:$0xf] %vm911_vm2, %v1130_v0  ;;  %v815_v4 = vpop.f32.mrf.mxu2 }
 0x10a   : > { %v816_v5 = vadd.f32 %v5273_v44, %v815_v4  ;;  %v1077_v6 = vpop.f32.mrf.mxu3 }
 0x10b   : > { %v1078_v9 = vadd.f32 %v5278_v45, %v1077_v6  ;;  %v758_v10 = vpop.f32.mrf.mxu0 }
 0x10c   : > { %v892_v11 = vpack.c.bf16 %v816_v5, %v816_v5  ;;  %v759_v12 = vadd.f32 %v5273_v44, %v758_v10  ;;  %v1020_v13 = vpop.f32.mrf.mxu1 }
 0x10d   : > { %v1154_v14 = vpack.c.bf16 %v1078_v9, %v1078_v9  ;;  %v1021_v15 = vadd.f32 %v5278_v45, %v1020_v13 }
 0x10e   : > { %941 = vst.msk [vmem:[#allocation3 + $0x74] sm:$0xf] %vm911_vm2, %v892_v11  ;;  %v869_v16 = vpack.c.bf16 %v759_v12, %v759_v12  ;;  %4132 = vmatmul.msk.bf16.gmra.mxu0 %vm661_vm1, %v612_v7  ;;  %4144 = vmatmul.msk.bf16.gmra.mxu2 %vm661_vm1, %v624_v8 }
 0x10f   : > { %1202 = vst.msk [vmem:[#allocation4 + $0x74] sm:$0xf] %vm911_vm2, %v1154_v14  ;;  %v1131_v17 = vpack.c.bf16 %v1021_v15, %v1021_v15  ;;  %4172 = vmatmul.msk.bf16.gmra.mxu1 %vm661_vm1, %v612_v7  ;;  %4184 = vmatmul.msk.bf16.gmra.mxu3 %vm661_vm1, %v624_v8 }
 0x110   : > { %918 = vst.msk [vmem:[#allocation3 + $0x18] sm:$0xf] %vm911_vm2, %v869_v16 }
 0x111   : > { %1179 = vst.msk [vmem:[#allocation4 + $0x18] sm:$0xf] %vm911_vm2, %v1131_v17  ;;  %v818_v18 = vpop.f32.mrf.mxu2 }
 0x112   : > { %v819_v19 = vadd.f32 %v5273_v44, %v818_v18  ;;  %v1080_v20 = vpop.f32.mrf.mxu3 }
 0x113   : > { %v1081_v21 = vadd.f32 %v5278_v45, %v1080_v20  ;;  %v760_v22 = vpop.f32.mrf.mxu0 }
 0x114   : > { %v893_v23 = vpack.c.bf16 %v819_v19, %v819_v19  ;;  %v761_v24 = vadd.f32 %v5273_v44, %v760_v22  ;;  %v1022_v25 = vpop.f32.mrf.mxu1 }
 0x115   : > { %v1155_v26 = vpack.c.bf16 %v1081_v21, %v1081_v21  ;;  %v1023_v27 = vadd.f32 %v5278_v45, %v1022_v25 }
 0x116   : > { %942 = vst.msk [vmem:[#allocation3 + $0x78] sm:$0xf] %vm911_vm2, %v893_v23  ;;  %v870_v28 = vpack.c.bf16 %v761_v24, %v761_v24 }
 0x117   : > { %1203 = vst.msk [vmem:[#allocation4 + $0x78] sm:$0xf] %vm911_vm2, %v1155_v26  ;;  %v1132_v29 = vpack.c.bf16 %v1023_v27, %v1023_v27 }
 0x118   : > { %919 = vst.msk [vmem:[#allocation3 + $0x1c] sm:$0xf] %vm911_vm2, %v870_v28 }
 0x119   : > { %1180 = vst.msk [vmem:[#allocation4 + $0x1c] sm:$0xf] %vm911_vm2, %v1132_v29  ;;  %v820_v30 = vpop.f32.mrf.mxu2 }
 0x11a   : > { %v821_v31 = vadd.f32 %v5273_v44, %v820_v30  ;;  %v1082_v32 = vpop.f32.mrf.mxu3 }
 0x11b   : > { %v1083_v33 = vadd.f32 %v5278_v45, %v1082_v32  ;;  %v763_v34 = vpop.f32.mrf.mxu0 }
 0x11c   : > { %v894_v35 = vpack.c.bf16 %v821_v31, %v821_v31  ;;  %v764_v36 = vadd.f32 %v5273_v44, %v763_v34  ;;  %v1025_v37 = vpop.f32.mrf.mxu1 }
 0x11d   : > { %v1156_v38 = vpack.c.bf16 %v1083_v33, %v1083_v33  ;;  %v1026_v39 = vadd.f32 %v5278_v45, %v1025_v37 }
 0x11e   : > { %943 = vst.msk [vmem:[#allocation3 + $0x7c] sm:$0xf] %vm911_vm2, %v894_v35  ;;  %v871_v40 = vpack.c.bf16 %v764_v36, %v764_v36 }
 0x11f   : > { %1204 = vst.msk [vmem:[#allocation4 + $0x7c] sm:$0xf] %vm911_vm2, %v1156_v38  ;;  %v1133_v41 = vpack.c.bf16 %v1026_v39, %v1026_v39 }
 0x120   : > { %920 = vst.msk [vmem:[#allocation3 + $0x20] sm:$0xf] %vm911_vm2, %v871_v40 }
 0x121   : > { %1181 = vst.msk [vmem:[#allocation4 + $0x20] sm:$0xf] %vm911_vm2, %v1133_v41  ;;  %v823_v42 = vpop.f32.mrf.mxu2 }
 0x122   : > { %v824_v43 = vadd.f32 %v5273_v44, %v823_v42  ;;  %v1085_v46 = vpop.f32.mrf.mxu3 }
 0x123   : > { %v1086_v47 = vadd.f32 %v5278_v45, %v1085_v46  ;;  %v765_v48 = vpop.f32.mrf.mxu0 }
 0x124   : > { %v895_v49 = vpack.c.bf16 %v824_v43, %v824_v43  ;;  %v766_v50 = vadd.f32 %v5273_v44, %v765_v48  ;;  %v1027_v51 = vpop.f32.mrf.mxu1 }
 0x125   : > { %v1157_v52 = vpack.c.bf16 %v1086_v47, %v1086_v47  ;;  %v1028_v53 = vadd.f32 %v5278_v45, %v1027_v51 }
 0x126   : > { %944 = vst.msk [vmem:[#allocation3 + $0x80] sm:$0xf] %vm911_vm2, %v895_v49  ;;  %v872_v54 = vpack.c.bf16 %v766_v50, %v766_v50 }
 0x127   : > { %1205 = vst.msk [vmem:[#allocation4 + $0x80] sm:$0xf] %vm911_vm2, %v1157_v52  ;;  %v1134_v55 = vpack.c.bf16 %v1028_v53, %v1028_v53 }
 0x128   : > { %921 = vst.msk [vmem:[#allocation3 + $0x24] sm:$0xf] %vm911_vm2, %v872_v54 }
 0x129   : > { %1182 = vst.msk [vmem:[#allocation4 + $0x24] sm:$0xf] %vm911_vm2, %v1134_v55  ;;  %v825_v56 = vpop.f32.mrf.mxu2 }
 0x12a   : > { %v826_v57 = vadd.f32 %v5273_v44, %v825_v56  ;;  %v1087_v58 = vpop.f32.mrf.mxu3 }
 0x12b   : > { %v1088_v59 = vadd.f32 %v5278_v45, %v1087_v58  ;;  %v768_v60 = vpop.f32.mrf.mxu0 }
 0x12c   : > { %v896_v61 = vpack.c.bf16 %v826_v57, %v826_v57  ;;  %v769_v62 = vadd.f32 %v5273_v44, %v768_v60  ;;  %v1030_v63 = vpop.f32.mrf.mxu1 }
 0x12d   : > { %v1158_v0 = vpack.c.bf16 %v1088_v59, %v1088_v59  ;;  %v1031_v1 = vadd.f32 %v5278_v45, %v1030_v63 }
 0x12e   : > { %945 = vst.msk [vmem:[#allocation3 + $0x84] sm:$0xf] %vm911_vm2, %v896_v61  ;;  %v873_v2 = vpack.c.bf16 %v769_v62, %v769_v62 }
 0x12f   : > { %1206 = vst.msk [vmem:[#allocation4 + $0x84] sm:$0xf] %vm911_vm2, %v1158_v0  ;;  %v1135_v3 = vpack.c.bf16 %v1031_v1, %v1031_v1 }
 0x130   : > { %922 = vst.msk [vmem:[#allocation3 + $0x28] sm:$0xf] %vm911_vm2, %v873_v2 }
 0x131   : > { %1183 = vst.msk [vmem:[#allocation4 + $0x28] sm:$0xf] %vm911_vm2, %v1135_v3  ;;  %v828_v4 = vpop.f32.mrf.mxu2 }
 0x132   : > { %v829_v5 = vadd.f32 %v5273_v44, %v828_v4  ;;  %v1090_v6 = vpop.f32.mrf.mxu3 }
 0x133   : > { %v1091_v7 = vadd.f32 %v5278_v45, %v1090_v6  ;;  %v770_v8 = vpop.f32.mrf.mxu0 }
 0x134   : > { %v897_v9 = vpack.c.bf16 %v829_v5, %v829_v5  ;;  %v771_v10 = vadd.f32 %v5273_v44, %v770_v8  ;;  %v1032_v11 = vpop.f32.mrf.mxu1 }
 0x135   : > { %v1159_v12 = vpack.c.bf16 %v1091_v7, %v1091_v7  ;;  %v1033_v13 = vadd.f32 %v5278_v45, %v1032_v11 }
 0x136   : > { %946 = vst.msk [vmem:[#allocation3 + $0x88] sm:$0xf] %vm911_vm2, %v897_v9  ;;  %v874_v14 = vpack.c.bf16 %v771_v10, %v771_v10 }
 0x137   : > { %1207 = vst.msk [vmem:[#allocation4 + $0x88] sm:$0xf] %vm911_vm2, %v1159_v12  ;;  %v1136_v15 = vpack.c.bf16 %v1033_v13, %v1033_v13 }
 0x138   : > { %923 = vst.msk [vmem:[#allocation3 + $0x2c] sm:$0xf] %vm911_vm2, %v874_v14 }
 0x139   : > { %1184 = vst.msk [vmem:[#allocation4 + $0x2c] sm:$0xf] %vm911_vm2, %v1136_v15  ;;  %v830_v16 = vpop.f32.mrf.mxu2 }
 0x13a   : > { %v831_v17 = vadd.f32 %v5273_v44, %v830_v16  ;;  %v1092_v18 = vpop.f32.mrf.mxu3 }
 0x13b   : > { %v1093_v19 = vadd.f32 %v5278_v45, %v1092_v18  ;;  %v773_v20 = vpop.f32.mrf.mxu0 }
 0x13c   : > { %v898_v21 = vpack.c.bf16 %v831_v17, %v831_v17  ;;  %v774_v22 = vadd.f32 %v5273_v44, %v773_v20  ;;  %v1035_v23 = vpop.f32.mrf.mxu1 }
 0x13d   : > { %v1160_v24 = vpack.c.bf16 %v1093_v19, %v1093_v19  ;;  %v1036_v25 = vadd.f32 %v5278_v45, %v1035_v23 }
 0x13e   : > { %947 = vst.msk [vmem:[#allocation3 + $0x8c] sm:$0xf] %vm911_vm2, %v898_v21  ;;  %v875_v26 = vpack.c.bf16 %v774_v22, %v774_v22 }
 0x13f   : > { %1208 = vst.msk [vmem:[#allocation4 + $0x8c] sm:$0xf] %vm911_vm2, %v1160_v24  ;;  %v1137_v27 = vpack.c.bf16 %v1036_v25, %v1036_v25 }
 0x140   : > { %924 = vst.msk [vmem:[#allocation3 + $0x30] sm:$0xf] %vm911_vm2, %v875_v26 }
 0x141   : > { %1185 = vst.msk [vmem:[#allocation4 + $0x30] sm:$0xf] %vm911_vm2, %v1137_v27  ;;  %v833_v28 = vpop.f32.mrf.mxu2 }
 0x142   : > { %v834_v29 = vadd.f32 %v5273_v44, %v833_v28  ;;  %v1095_v30 = vpop.f32.mrf.mxu3 }
 0x143   : > { %v1096_v31 = vadd.f32 %v5278_v45, %v1095_v30  ;;  %v775_v32 = vpop.f32.mrf.mxu0 }
 0x144   : > { %v899_v33 = vpack.c.bf16 %v834_v29, %v834_v29  ;;  %v776_v34 = vadd.f32 %v5273_v44, %v775_v32  ;;  %v1037_v35 = vpop.f32.mrf.mxu1 }
 0x145   : > { %v1161_v36 = vpack.c.bf16 %v1096_v31, %v1096_v31  ;;  %v1038_v37 = vadd.f32 %v5278_v45, %v1037_v35 }
 0x146   : > { %948 = vst.msk [vmem:[#allocation3 + $0x90] sm:$0xf] %vm911_vm2, %v899_v33  ;;  %v876_v38 = vpack.c.bf16 %v776_v34, %v776_v34 }
 0x147   : > { %1209 = vst.msk [vmem:[#allocation4 + $0x90] sm:$0xf] %vm911_vm2, %v1161_v36  ;;  %v1138_v39 = vpack.c.bf16 %v1038_v37, %v1038_v37 }
 0x148   : > { %925 = vst.msk [vmem:[#allocation3 + $0x34] sm:$0xf] %vm911_vm2, %v876_v38 }
 0x149   : > { %1186 = vst.msk [vmem:[#allocation4 + $0x34] sm:$0xf] %vm911_vm2, %v1138_v39  ;;  %v835_v40 = vpop.f32.mrf.mxu2 }
 0x14a   : > { %v836_v41 = vadd.f32 %v5273_v44, %v835_v40  ;;  %v1097_v42 = vpop.f32.mrf.mxu3 }
 0x14b   : > { %v1098_v43 = vadd.f32 %v5278_v45, %v1097_v42  ;;  %v778_v46 = vpop.f32.mrf.mxu0 }
 0x14c   : > { %v900_v47 = vpack.c.bf16 %v836_v41, %v836_v41  ;;  %v779_v48 = vadd.f32 %v5273_v44, %v778_v46  ;;  %v1040_v49 = vpop.f32.mrf.mxu1 }
 0x14d   : > { %v1162_v50 = vpack.c.bf16 %v1098_v43, %v1098_v43  ;;  %v1041_v51 = vadd.f32 %v5278_v45, %v1040_v49 }
 0x14e   : > { %949 = vst.msk [vmem:[#allocation3 + $0x94] sm:$0xf] %vm911_vm2, %v900_v47  ;;  %v877_v52 = vpack.c.bf16 %v779_v48, %v779_v48 }
 0x14f   : > { %1210 = vst.msk [vmem:[#allocation4 + $0x94] sm:$0xf] %vm911_vm2, %v1162_v50  ;;  %v1139_v53 = vpack.c.bf16 %v1041_v51, %v1041_v51 }
 0x150   : > { %926 = vst.msk [vmem:[#allocation3 + $0x38] sm:$0xf] %vm911_vm2, %v877_v52 }
 0x151   : > { %1187 = vst.msk [vmem:[#allocation4 + $0x38] sm:$0xf] %vm911_vm2, %v1139_v53  ;;  %v838_v54 = vpop.f32.mrf.mxu2 }
 0x152   : > { %v839_v55 = vadd.f32 %v5273_v44, %v838_v54  ;;  %v1100_v56 = vpop.f32.mrf.mxu3 }
 0x153   : > { %v1101_v57 = vadd.f32 %v5278_v45, %v1100_v56  ;;  %v780_v58 = vpop.f32.mrf.mxu0 }
 0x154   : > { %v901_v59 = vpack.c.bf16 %v839_v55, %v839_v55  ;;  %v781_v60 = vadd.f32 %v5273_v44, %v780_v58  ;;  %v1042_v61 = vpop.f32.mrf.mxu1 }
 0x155   : > { %v1163_v62 = vpack.c.bf16 %v1101_v57, %v1101_v57  ;;  %v1043_v63 = vadd.f32 %v5278_v45, %v1042_v61 }
 0x156   : > { %950 = vst.msk [vmem:[#allocation3 + $0x98] sm:$0xf] %vm911_vm2, %v901_v59  ;;  %v878_v0 = vpack.c.bf16 %v781_v60, %v781_v60 }
 0x157   : > { %1211 = vst.msk [vmem:[#allocation4 + $0x98] sm:$0xf] %vm911_vm2, %v1163_v62  ;;  %v1140_v1 = vpack.c.bf16 %v1043_v63, %v1043_v63 }
 0x158   : > { %927 = vst.msk [vmem:[#allocation3 + $0x3c] sm:$0xf] %vm911_vm2, %v878_v0 }
 0x159   : > { %1188 = vst.msk [vmem:[#allocation4 + $0x3c] sm:$0xf] %vm911_vm2, %v1140_v1  ;;  %v840_v2 = vpop.f32.mrf.mxu2 }
 0x15a   : > { %v841_v3 = vadd.f32 %v5273_v44, %v840_v2  ;;  %v1102_v4 = vpop.f32.mrf.mxu3 }
 0x15b   : > { %v1103_v5 = vadd.f32 %v5278_v45, %v1102_v4  ;;  %v783_v6 = vpop.f32.mrf.mxu0 }
 0x15c   : > { %v902_v7 = vpack.c.bf16 %v841_v3, %v841_v3  ;;  %v784_v8 = vadd.f32 %v5273_v44, %v783_v6  ;;  %v1045_v9 = vpop.f32.mrf.mxu1  ;;  %v4904_v3 = vmov 0.0  }
 0x15d   : > { %v1164_v10 = vpack.c.bf16 %v1103_v5, %v1103_v5  ;;  %v1046_v11 = vadd.f32 %v5278_v45, %v1045_v9  ;;  %1221 = vst.msk [vmem:[#allocation6] sm:$0xff] %vm661_vm1, %v4904_v3 }
 0x15e   : > { %951 = vst.msk [vmem:[#allocation3 + $0x9c] sm:$0xf] %vm911_vm2, %v902_v7  ;;  %v879_v12 = vpack.c.bf16 %v784_v8, %v784_v8 }
 0x15f   : > { %1212 = vst.msk [vmem:[#allocation4 + $0x9c] sm:$0xf] %vm911_vm2, %v1164_v10  ;;  %v1141_v13 = vpack.c.bf16 %v1046_v11, %v1046_v11 }
 0x160   : > { %928 = vst.msk [vmem:[#allocation3 + $0x40] sm:$0xf] %vm911_vm2, %v879_v12 }
 0x161   : > { %1189 = vst.msk [vmem:[#allocation4 + $0x40] sm:$0xf] %vm911_vm2, %v1141_v13  ;;  %v843_v14 = vpop.f32.mrf.mxu2 }
 0x162   : > { %v844_v15 = vadd.f32 %v5273_v44, %v843_v14  ;;  %v1105_v16 = vpop.f32.mrf.mxu3  ;;  %1222 = vst.msk [vmem:[#allocation6 + $0x8] sm:$0xff] %vm661_vm1, %v4904_v3 }
 0x163   : > { %v1106_v17 = vadd.f32 %v5278_v45, %v1105_v16  ;;  %v785_v18 = vpop.f32.mrf.mxu0  ;;  %1223 = vst.msk [vmem:[#allocation6 + $0x10] sm:$0xff] %vm661_vm1, %v4904_v3 }
 0x164   : > { %v903_v19 = vpack.c.bf16 %v844_v15, %v844_v15  ;;  %v786_v20 = vadd.f32 %v5273_v44, %v785_v18  ;;  %v1047_v21 = vpop.f32.mrf.mxu1  ;;  %1224 = vst.msk [vmem:[#allocation6 + $0x18] sm:$0xff] %vm661_vm1, %v4904_v3 }
 0x165   : > { %v1165_v22 = vpack.c.bf16 %v1106_v17, %v1106_v17  ;;  %v1048_v23 = vadd.f32 %v5278_v45, %v1047_v21  ;;  %1225 = vst.msk [vmem:[#allocation6 + $0x20] sm:$0xff] %vm661_vm1, %v4904_v3 }
 0x166   : > { %952 = vst.msk [vmem:[#allocation3 + $0xa0] sm:$0xf] %vm911_vm2, %v903_v19  ;;  %v880_v24 = vpack.c.bf16 %v786_v20, %v786_v20 }
 0x167   : > { %1213 = vst.msk [vmem:[#allocation4 + $0xa0] sm:$0xf] %vm911_vm2, %v1165_v22  ;;  %v1142_v25 = vpack.c.bf16 %v1048_v23, %v1048_v23 }
 0x168   : > { %929 = vst.msk [vmem:[#allocation3 + $0x44] sm:$0xf] %vm911_vm2, %v880_v24 }
 0x169   : > { %1190 = vst.msk [vmem:[#allocation4 + $0x44] sm:$0xf] %vm911_vm2, %v1142_v25  ;;  %v845_v26 = vpop.f32.mrf.mxu2 }
 0x16a   : > { %v846_v27 = vadd.f32 %v5273_v44, %v845_v26  ;;  %v1107_v28 = vpop.f32.mrf.mxu3  ;;  %1226 = vst.msk [vmem:[#allocation6 + $0x28] sm:$0xff] %vm661_vm1, %v4904_v3 }
 0x16b   : > { %v1108_v29 = vadd.f32 %v5278_v45, %v1107_v28  ;;  %v788_v30 = vpop.f32.mrf.mxu0  ;;  %1227 = vst.msk [vmem:[#allocation6 + $0x30] sm:$0xff] %vm661_vm1, %v4904_v3 }
 0x16c   : > { %v904_v31 = vpack.c.bf16 %v846_v27, %v846_v27  ;;  %v789_v32 = vadd.f32 %v5273_v44, %v788_v30  ;;  %v1050_v33 = vpop.f32.mrf.mxu1  ;;  %1228 = vst.msk [vmem:[#allocation6 + $0x38] sm:$0xff] %vm661_vm1, %v4904_v3 }
 0x16d   : > { %v1166_v34 = vpack.c.bf16 %v1108_v29, %v1108_v29  ;;  %v1051_v35 = vadd.f32 %v5278_v45, %v1050_v33  ;;  %1229 = vst.msk [vmem:[#allocation6 + $0x40] sm:$0xff] %vm661_vm1, %v4904_v3 }
 0x16e   : > { %953 = vst.msk [vmem:[#allocation3 + $0xa4] sm:$0xf] %vm911_vm2, %v904_v31  ;;  %v881_v36 = vpack.c.bf16 %v789_v32, %v789_v32 }
 0x16f   : > { %1214 = vst.msk [vmem:[#allocation4 + $0xa4] sm:$0xf] %vm911_vm2, %v1166_v34  ;;  %v1143_v37 = vpack.c.bf16 %v1051_v35, %v1051_v35 }
 0x170   : > { %930 = vst.msk [vmem:[#allocation3 + $0x48] sm:$0xf] %vm911_vm2, %v881_v36 }
 0x171   : > { %1191 = vst.msk [vmem:[#allocation4 + $0x48] sm:$0xf] %vm911_vm2, %v1143_v37  ;;  %v848_v38 = vpop.f32.mrf.mxu2 }
 0x172   : > { %v849_v39 = vadd.f32 %v5273_v44, %v848_v38  ;;  %v1110_v40 = vpop.f32.mrf.mxu3  ;;  %1230 = vst.msk [vmem:[#allocation6 + $0x48] sm:$0xff] %vm661_vm1, %v4904_v3 }
 0x173   : > { %v1111_v41 = vadd.f32 %v5278_v45, %v1110_v40  ;;  %v790_v42 = vpop.f32.mrf.mxu0  ;;  %1231 = vst.msk [vmem:[#allocation6 + $0x50] sm:$0xff] %vm661_vm1, %v4904_v3 }
 0x174   : > { %v905_v43 = vpack.c.bf16 %v849_v39, %v849_v39  ;;  %v791_v46 = vadd.f32 %v5273_v44, %v790_v42  ;;  %v1052_v47 = vpop.f32.mrf.mxu1  ;;  %1232 = vst.msk [vmem:[#allocation6 + $0x58] sm:$0xff] %vm661_vm1, %v4904_v3 }
 0x175   : > { %v1167_v48 = vpack.c.bf16 %v1111_v41, %v1111_v41  ;;  %v1053_v49 = vadd.f32 %v5278_v45, %v1052_v47  ;;  %1233 = vst.msk [vmem:[#allocation6 + $0x60] sm:$0xff] %vm661_vm1, %v4904_v3 }
 0x176   : > { %954 = vst.msk [vmem:[#allocation3 + $0xa8] sm:$0xf] %vm911_vm2, %v905_v43  ;;  %v882_v50 = vpack.c.bf16 %v791_v46, %v791_v46 }
 0x177   : > { %1215 = vst.msk [vmem:[#allocation4 + $0xa8] sm:$0xf] %vm911_vm2, %v1167_v48  ;;  %v1144_v51 = vpack.c.bf16 %v1053_v49, %v1053_v49 }
 0x178   : > { %931 = vst.msk [vmem:[#allocation3 + $0x4c] sm:$0xf] %vm911_vm2, %v882_v50 }
 0x179   : > { %1192 = vst.msk [vmem:[#allocation4 + $0x4c] sm:$0xf] %vm911_vm2, %v1144_v51  ;;  %v850_v52 = vpop.f32.mrf.mxu2 }
 0x17a   : > { %v851_v53 = vadd.f32 %v5273_v44, %v850_v52  ;;  %v1112_v54 = vpop.f32.mrf.mxu3  ;;  %1234 = vst.msk [vmem:[#allocation6 + $0x68] sm:$0xff] %vm661_vm1, %v4904_v3 }
 0x17b   : > { %v1113_v55 = vadd.f32 %v5278_v45, %v1112_v54  ;;  %v793_v56 = vpop.f32.mrf.mxu0  ;;  %1235 = vst.msk [vmem:[#allocation6 + $0x70] sm:$0xff] %vm661_vm1, %v4904_v3 }
 0x17c   : > { %v906_v57 = vpack.c.bf16 %v851_v53, %v851_v53  ;;  %v794_v58 = vadd.f32 %v5273_v44, %v793_v56  ;;  %v1055_v59 = vpop.f32.mrf.mxu1  ;;  %1236 = vst.msk [vmem:[#allocation6 + $0x78] sm:$0xff] %vm661_vm1, %v4904_v3 }
 0x17d   : > { %v1168_v60 = vpack.c.bf16 %v1113_v55, %v1113_v55  ;;  %v1056_v61 = vadd.f32 %v5278_v45, %v1055_v59  ;;  %1237 = vst.msk [vmem:[#allocation6 + $0x80] sm:$0xff] %vm661_vm1, %v4904_v3 }
 0x17e   : > { %955 = vst.msk [vmem:[#allocation3 + $0xac] sm:$0xf] %vm911_vm2, %v906_v57  ;;  %v883_v62 = vpack.c.bf16 %v794_v58, %v794_v58 }
 0x17f   : > { %1216 = vst.msk [vmem:[#allocation4 + $0xac] sm:$0xf] %vm911_vm2, %v1168_v60  ;;  %v1145_v63 = vpack.c.bf16 %v1056_v61, %v1056_v61 }
 0x180   : > { %932 = vst.msk [vmem:[#allocation3 + $0x50] sm:$0xf] %vm911_vm2, %v883_v62 }
 0x181   : > { %1193 = vst.msk [vmem:[#allocation4 + $0x50] sm:$0xf] %vm911_vm2, %v1145_v63  ;;  %v853_v0 = vpop.f32.mrf.mxu2 }
 0x182   : > { %v854_v1 = vadd.f32 %v5273_v44, %v853_v0  ;;  %v1115_v2 = vpop.f32.mrf.mxu3  ;;  %1238 = vst.msk [vmem:[#allocation6 + $0x88] sm:$0xff] %vm661_vm1, %v4904_v3 }
 0x183   : > { %v1116_v4 = vadd.f32 %v5278_v45, %v1115_v2  ;;  %v795_v5 = vpop.f32.mrf.mxu0  ;;  %1239 = vst.msk [vmem:[#allocation6 + $0x90] sm:$0xff] %vm661_vm1, %v4904_v3 }
 0x184   : > { %v907_v6 = vpack.c.bf16 %v854_v1, %v854_v1  ;;  %v796_v7 = vadd.f32 %v5273_v44, %v795_v5  ;;  %v1057_v8 = vpop.f32.mrf.mxu1  ;;  %1240 = vst.msk [vmem:[#allocation6 + $0x98] sm:$0xff] %vm661_vm1, %v4904_v3 }
 0x185   : > { %v1169_v9 = vpack.c.bf16 %v1116_v4, %v1116_v4  ;;  %v1058_v10 = vadd.f32 %v5278_v45, %v1057_v8  ;;  %1241 = vst.msk [vmem:[#allocation6 + $0xa0] sm:$0xff] %vm661_vm1, %v4904_v3 }
 0x186   : > { %956 = vst.msk [vmem:[#allocation3 + $0xb0] sm:$0xf] %vm911_vm2, %v907_v6  ;;  %v884_v11 = vpack.c.bf16 %v796_v7, %v796_v7 }
 0x187   : > { %1217 = vst.msk [vmem:[#allocation4 + $0xb0] sm:$0xf] %vm911_vm2, %v1169_v9  ;;  %v1146_v12 = vpack.c.bf16 %v1058_v10, %v1058_v10 }
 0x188   : > { %933 = vst.msk [vmem:[#allocation3 + $0x54] sm:$0xf] %vm911_vm2, %v884_v11 }
 0x189   : > { %1194 = vst.msk [vmem:[#allocation4 + $0x54] sm:$0xf] %vm911_vm2, %v1146_v12  ;;  %v855_v13 = vpop.f32.mrf.mxu2 }
 0x18a   : > { %v856_v14 = vadd.f32 %v5273_v44, %v855_v13  ;;  %v1117_v15 = vpop.f32.mrf.mxu3  ;;  %1242 = vst.msk [vmem:[#allocation6 + $0xa8] sm:$0xff] %vm661_vm1, %v4904_v3 }
 0x18b   : > { %v1118_v16 = vadd.f32 %v5278_v45, %v1117_v15  ;;  %v798_v17 = vpop.f32.mrf.mxu0  ;;  %1243 = vst.msk [vmem:[#allocation6 + $0xb0] sm:$0xff] %vm661_vm1, %v4904_v3 }
 0x18c   : > { %v908_v18 = vpack.c.bf16 %v856_v14, %v856_v14  ;;  %v799_v19 = vadd.f32 %v5273_v44, %v798_v17  ;;  %v1060_v20 = vpop.f32.mrf.mxu1  ;;  %1244 = vst.msk [vmem:[#allocation6 + $0xb8] sm:$0xff] %vm661_vm1, %v4904_v3 }
 0x18d   : > { %v1170_v21 = vpack.c.bf16 %v1118_v16, %v1118_v16  ;;  %v1061_v22 = vadd.f32 %v5278_v45, %v1060_v20  ;;  %1245 = vst.msk [vmem:[#allocation6 + $0xc0] sm:$0xff] %vm661_vm1, %v4904_v3 }
 0x18e   : > { %957 = vst.msk [vmem:[#allocation3 + $0xb4] sm:$0xf] %vm911_vm2, %v908_v18  ;;  %v885_v23 = vpack.c.bf16 %v799_v19, %v799_v19 }
 0x18f   : > { %1218 = vst.msk [vmem:[#allocation4 + $0xb4] sm:$0xf] %vm911_vm2, %v1170_v21  ;;  %v1147_v24 = vpack.c.bf16 %v1061_v22, %v1061_v22 }
 0x190   : > { %934 = vst.msk [vmem:[#allocation3 + $0x58] sm:$0xf] %vm911_vm2, %v885_v23 }
 0x191   : > { %1195 = vst.msk [vmem:[#allocation4 + $0x58] sm:$0xf] %vm911_vm2, %v1147_v24  ;;  %v858_v25 = vpop.f32.mrf.mxu2 }
 0x192   : > { %v859_v26 = vadd.f32 %v5273_v44, %v858_v25  ;;  %v1120_v27 = vpop.f32.mrf.mxu3  ;;  %1246 = vst.msk [vmem:[#allocation6 + $0xc8] sm:$0xff] %vm661_vm1, %v4904_v3 }
 0x193   : > { %v1121_v28 = vadd.f32 %v5278_v45, %v1120_v27  ;;  %v800_v29 = vpop.f32.mrf.mxu0  ;;  %1247 = vst.msk [vmem:[#allocation6 + $0xd0] sm:$0xff] %vm661_vm1, %v4904_v3 }
 0x194   : > { %v909_v30 = vpack.c.bf16 %v859_v26, %v859_v26  ;;  %v801_v31 = vadd.f32 %v5273_v44, %v800_v29  ;;  %v1062_v32 = vpop.f32.mrf.mxu1  ;;  %1248 = vst.msk [vmem:[#allocation6 + $0xd8] sm:$0xff] %vm661_vm1, %v4904_v3 }
 0x195   : > { %v1171_v33 = vpack.c.bf16 %v1121_v28, %v1121_v28  ;;  %v1063_v34 = vadd.f32 %v5278_v45, %v1062_v32  ;;  %1249 = vst.msk [vmem:[#allocation6 + $0xe0] sm:$0xff] %vm661_vm1, %v4904_v3 }
 0x196   : > { %958 = vst.msk [vmem:[#allocation3 + $0xb8] sm:$0xf] %vm911_vm2, %v909_v30  ;;  %v886_v35 = vpack.c.bf16 %v801_v31, %v801_v31 }
 0x197   : > { %1219 = vst.msk [vmem:[#allocation4 + $0xb8] sm:$0xf] %vm911_vm2, %v1171_v33  ;;  %v1148_v36 = vpack.c.bf16 %v1063_v34, %v1063_v34 }
 0x198   : > { %935 = vst.msk [vmem:[#allocation3 + $0x5c] sm:$0xf] %vm911_vm2, %v886_v35 }
 0x199   : > { %1196 = vst.msk [vmem:[#allocation4 + $0x5c] sm:$0xf] %vm911_vm2, %v1148_v36  ;;  %v860_v37 = vpop.f32.mrf.mxu2 }
 0x19a   : > { %v861_v38 = vadd.f32 %v5273_v44, %v860_v37  ;;  %v1122_v39 = vpop.f32.mrf.mxu3  ;;  %1250 = vst.msk [vmem:[#allocation6 + $0xe8] sm:$0xff] %vm661_vm1, %v4904_v3 }
 0x19b   : > { %v1123_v40 = vadd.f32 %v5278_v45, %v1122_v39  ;;  %1251 = vst.msk [vmem:[#allocation6 + $0xf0] sm:$0xff] %vm661_vm1, %v4904_v3 }
 0x19c   : > { %v910_v41 = vpack.c.bf16 %v861_v38, %v861_v38  ;;  %1252 = vst.msk [vmem:[#allocation6 + $0xf8] sm:$0xff] %vm661_vm1, %v4904_v3 }
 0x19d   : > { %v1172_v42 = vpack.c.bf16 %v1123_v40, %v1123_v40  ;;  %1253 = vst.msk [vmem:[#allocation6 + $0x100] sm:$0xff] %vm661_vm1, %v4904_v3 }
 0x19e   : > { %959 = vst.msk [vmem:[#allocation3 + $0xbc] sm:$0xf] %vm911_vm2, %v910_v41 }
 0x19f   : > { %1220 = vst.msk [vmem:[#allocation4 + $0xbc] sm:$0xf] %vm911_vm2, %v1172_v42 }
 0x1a0   : > { %1254 = vst.msk [vmem:[#allocation6 + $0x108] sm:$0xff] %vm661_vm1, %v4904_v3 }
 0x1a1   : > { %1255 = vst.msk [vmem:[#allocation6 + $0x110] sm:$0xff] %vm661_vm1, %v4904_v3 }
 0x1a2   : > { %1256 = vst.msk [vmem:[#allocation6 + $0x118] sm:$0xff] %vm661_vm1, %v4904_v3 }
 0x1a3   : > { %1257 = vst.msk [vmem:[#allocation6 + $0x120] sm:$0xff] %vm661_vm1, %v4904_v3 }
 0x1a4   : > { %1258 = vst.msk [vmem:[#allocation6 + $0x128] sm:$0xff] %vm661_vm1, %v4904_v3 }
 0x1a5   : > { %1259 = vst.msk [vmem:[#allocation6 + $0x130] sm:$0xff] %vm661_vm1, %v4904_v3 }
 0x1a6   : > { %1260 = vst.msk [vmem:[#allocation6 + $0x138] sm:$0xff] %vm661_vm1, %v4904_v3 }
 0x1a7   : > { %1261 = vst.msk [vmem:[#allocation6 + $0x140] sm:$0xff] %vm661_vm1, %v4904_v3 }
 0x1a8   : > { %1262 = vst.msk [vmem:[#allocation6 + $0x148] sm:$0xff] %vm661_vm1, %v4904_v3 }
 0x1a9   : > { %1263 = vst.msk [vmem:[#allocation6 + $0x150] sm:$0xff] %vm661_vm1, %v4904_v3 }
 0x1aa   : > { %1264 = vst.msk [vmem:[#allocation6 + $0x158] sm:$0xff] %vm661_vm1, %v4904_v3 }
 0x1ab   : > { %1265 = vst.msk [vmem:[#allocation6 + $0x160] sm:$0xff] %vm661_vm1, %v4904_v3 }
 0x1ac   : > { %1266 = vst.msk [vmem:[#allocation6 + $0x168] sm:$0xff] %vm661_vm1, %v4904_v3 }
 0x1ad   : > { %1267 = vst.msk [vmem:[#allocation6 + $0x170] sm:$0xff] %vm661_vm1, %v4904_v3 }
 0x1ae   : > { %1268 = vst.msk [vmem:[#allocation6 + $0x178] sm:$0xff] %vm661_vm1, %v4904_v3 }
 0x1af PF: > { %s4185_s28 = sshll.u32 %s4886_s29, 7  ;;  %v4634_v13 = vld [vmem:[#allocation3 + $0x38] sm:$0xff]  ;;  %v4633_v24 = vld [vmem:[#allocation3 + $0x30] sm:$0xff]  ;;  %v4632_v27 = vld [vmem:[#allocation3 + $0x28] sm:$0xff]  ;;  %vm1766_vm3 = vcmask 519168   ;;  %vm2114_vm4 = vcmask 523264  }
 0x1b0   : > { %s1270_s21 = sshra.s32 %s4185_s28, 5  ;;  %4711 = vmatpush.bf16.msra.mxu2 %v4634_v13  ;;  %1599 = vmatpush.bf16.msra.mxu1 %v4634_v13  ;;  %v4631_v32 = vld [vmem:[#allocation3 + $0x20] sm:$0xff]  ;;  %v4630_v37 = vld [vmem:[#allocation3 + $0x18] sm:$0xff]  ;;  %v4629_v40 = vld [vmem:[#allocation3 + $0x10] sm:$0xff]  ;;  %s5627_s26 = sshra.s32 %s4185_s28, 3 }
 0x1b1   : > { %s4626_s22 = smul.u32 24, %s1270_s21  ;;  %v4628_v41 = vld [vmem:[#allocation3 + $0x8] sm:$0xff]  ;;  %s4283_s27 = sshll.u32 %s5627_s26, 2  ;;  %v4647_v13 = vld [vmem:[#allocation3 + $0xa0] sm:$0xff] }
 0x1b2   : > { %s5636_s18 = scalar_lea.vmem [#allocation4], %s4283_s27  ;;  %s5724_s28 = scalar_lea.vmem [#allocation5], %s4283_s27 }
 0x1b3   : > { %s5590_s25 = scalar_lea.vmem %s6395_s1, %s4626_s22  ;;  %p2163_p9 = scmp.eq.s32.totalorder %s4886_s29, 2 }
 0x1b4   : > { %v1275_v44 = vld [vmem:[%s5590_s25] sm:$0xff]  ;;  %v1276_v45 = vld [vmem:[%s5590_s25 + $0x8] sm:$0xff]  ;;  %v1278_v1 = vld [vmem:[%s5590_s25 + $0x18] sm:$0xff]  ;;  %4712 = vmatpush.bf16.msra.mxu2 %v4633_v24  ;;  %1600 = vmatpush.bf16.msra.mxu1 %v4633_v24  ;;  %p4317_p10 = scmp.ne.s32.totalorder %s4886_s29, 2 }
 0x1b5   : > { %v1287_v43 = vunpack.c.0.s8 %v1275_v44  ;;  %v1288_v46 = vunpack.c.0.s8 %v1276_v45  ;;  %v1290_v47 = vunpack.c.1.s8 %v1275_v44  ;;  %v1291_v48 = vunpack.c.1.s8 %v1276_v45  ;;  %v1279_v2 = vld [vmem:[%s5590_s25 + $0x20] sm:$0xff]  ;;  %v1281_v25 = vld [vmem:[%s5590_s25 + $0x30] sm:$0xff]  ;;  %v1282_v26 = vld [vmem:[%s5590_s25 + $0x38] sm:$0xff] }
 0x1b6   : > { %v1293_v55 = vunpack.c.2.s8 %v1275_v44  ;;  %v1294_v56 = vunpack.c.2.s8 %v1276_v45  ;;  %v1296_v57 = vunpack.c.3.s8 %v1275_v44  ;;  %v1297_v58 = vunpack.c.3.s8 %v1276_v45  ;;  %v4653_v24 = vld [vmem:[%s5636_s18 + $0x10] sm:$0xff] }
 0x1b7   : > { %v1335_v49 = vcvt.s32.f32 %v1287_v43  ;;  %v1336_v50 = vcvt.s32.f32 %v1288_v46  ;;  %v1338_v51 = vcvt.s32.f32 %v1290_v47  ;;  %v1339_v52 = vcvt.s32.f32 %v1291_v48  ;;  %v4627_v46 = vld [vmem:[#allocation3] sm:$0xff] }
 0x1b8   : > { %v1341_v59 = vcvt.s32.f32 %v1293_v55  ;;  %v1342_v60 = vcvt.s32.f32 %v1294_v56  ;;  %v1344_v61 = vcvt.s32.f32 %v1296_v57  ;;  %v1345_v62 = vcvt.s32.f32 %v1297_v58  ;;  %4713 = vmatpush.bf16.msra.mxu2 %v4632_v27  ;;  %1601 = vmatpush.bf16.msra.mxu1 %v4632_v27  ;;  %v4650_v55 = vld [vmem:[#allocation3 + $0xb8] sm:$0xff]  ;;  %v5640_v58 = vld [vmem:[%s5590_s25 + $0x48] sm:$0xff] }
 0x1b9   : > { %v5594_v53 = vpack.c.bf16 %v1338_v51, %v1335_v49  ;;  %v5596_v54 = vpack.c.bf16 %v1339_v52, %v1336_v50  ;;  %v1299_v3 = vunpack.c.0.s8 %v1278_v1  ;;  %v1300_v4 = vunpack.c.0.s8 %v1279_v2  ;;  %v4658_v56 = vld [vmem:[%s5636_s18 + $0x38] sm:$0xff] }
 0x1ba   : > { %v5600_v63 = vpack.c.bf16 %v1344_v61, %v1341_v59  ;;  %v5602_v0 = vpack.c.bf16 %v1345_v62, %v1342_v60  ;;  %v1302_v5 = vunpack.c.1.s8 %v1278_v1  ;;  %v1303_v6 = vunpack.c.1.s8 %v1279_v2  ;;  %v4642_v57 = vld [vmem:[#allocation3 + $0x78] sm:$0xff]  ;;  %v5643_v59 = vld [vmem:[%s5590_s25 + $0x50] sm:$0xff]  ;;  %1937 = vmatpush.bf16.msra.mxu0 %v4658_v56  ;;  %4719 = vmatpush.bf16.msra.mxu3 %v4658_v56 }
 0x1bb   : > { %1849 = vxpose.binary.xlu0.c.b16.start [1/16] %v5596_v54, %v5594_v53, 128  ;;  %v1347_v7 = vcvt.s32.f32 %v1299_v3  ;;  %v1348_v8 = vcvt.s32.f32 %v1300_v4  ;;  %v1305_v14 = vunpack.c.2.s8 %v1278_v1  ;;  %v1306_v15 = vunpack.c.2.s8 %v1279_v2  ;;  %v4649_v60 = vld [vmem:[#allocation3 + $0xb0] sm:$0xff]  ;;  %v4648_v4 = vld [vmem:[#allocation3 + $0xa8] sm:$0xff] }
 0x1bc   : > { %v1350_v9 = vcvt.s32.f32 %v1302_v5  ;;  %v1351_v10 = vcvt.s32.f32 %v1303_v6  ;;  %v1308_v16 = vunpack.c.3.s8 %v1278_v1  ;;  %v1309_v17 = vunpack.c.3.s8 %v1279_v2  ;;  %4714 = vmatpush.bf16.msra.mxu2 %v4631_v32  ;;  %1602 = vmatpush.bf16.msra.mxu1 %v4631_v32  ;;  %v4657_v61 = vld [vmem:[%s5636_s18 + $0x30] sm:$0xff]  ;;  %v4656_v5 = vld [vmem:[%s5636_s18 + $0x28] sm:$0xff] }
 0x1bd   : > { %v1353_v18 = vcvt.s32.f32 %v1305_v14  ;;  %v1354_v19 = vcvt.s32.f32 %v1306_v15  ;;  %v1311_v28 = vunpack.c.0.s8 %v1281_v25  ;;  %v1312_v29 = vunpack.c.0.s8 %v1282_v26  ;;  %v4640_v6 = vld [vmem:[#allocation3 + $0x68] sm:$0xff]  ;;  %v4655_v14 = vld [vmem:[%s5636_s18 + $0x20] sm:$0xff] }
 0x1be   : > { %v5608_v11 = vpack.c.bf16 %v1350_v9, %v1347_v7  ;;  %v5610_v12 = vpack.c.bf16 %v1351_v10, %v1348_v8  ;;  %v1356_v20 = vcvt.s32.f32 %v1308_v16  ;;  %v1357_v21 = vcvt.s32.f32 %v1309_v17  ;;  %1938 = vmatpush.bf16.msra.mxu0 %v4657_v61  ;;  %4720 = vmatpush.bf16.msra.mxu3 %v4657_v61  ;;  %v4639_v17 = vld [vmem:[#allocation3 + $0x60] sm:$0xff] }
 0x1bf   : > { %v1314_v30 = vunpack.c.1.s8 %v1281_v25  ;;  %v1315_v31 = vunpack.c.1.s8 %v1282_v26  ;;  %v1359_v33 = vcvt.s32.f32 %v1311_v28  ;;  %v1360_v34 = vcvt.s32.f32 %v1312_v29  ;;  %v4644_v29 = vld [vmem:[#allocation3 + $0x88] sm:$0xff] }
 0x1c0   : > { %v5614_v22 = vpack.c.bf16 %v1356_v20, %v1353_v18  ;;  %v5616_v23 = vpack.c.bf16 %v1357_v21, %v1354_v19  ;;  %4715 = vmatpush.bf16.msra.mxu2 %v4630_v37  ;;  %1603 = vmatpush.bf16.msra.mxu1 %v4630_v37  ;;  %v1317_v42 = vunpack.c.2.s8 %v1281_v25  ;;  %v1318_v44 = vunpack.c.2.s8 %v1282_v26  ;;  %v4646_v18 = vld [vmem:[#allocation3 + $0x98] sm:$0xff]  ;;  %v4645_v21 = vld [vmem:[#allocation3 + $0x90] sm:$0xff]  ;;  %v4651_v37 = vld [vmem:[%s5636_s18] sm:$0xff] }
 0x1c1   : > { %v1362_v35 = vcvt.s32.f32 %v1314_v30  ;;  %v1363_v36 = vcvt.s32.f32 %v1315_v31  ;;  %v1320_v45 = vunpack.c.3.s8 %v1281_v25  ;;  %v1321_v43 = vunpack.c.3.s8 %v1282_v26  ;;  %v4654_v19 = vld [vmem:[%s5636_s18 + $0x18] sm:$0xff]  ;;  %v4637_v25 = vld [vmem:[#allocation3 + $0x50] sm:$0xff]  ;;  %v4652_v30 = vld [vmem:[%s5636_s18 + $0x8] sm:$0xff] }
 0x1c2   : > { %v1365_v47 = vcvt.s32.f32 %v1317_v42  ;;  %v1366_v48 = vcvt.s32.f32 %v1318_v44  ;;  %v1323_v62 = vunpack.c.0.s8 %v5640_v58  ;;  %v1324_v1 = vunpack.c.0.s8 %v5643_v59  ;;  %1939 = vmatpush.bf16.msra.mxu0 %v4656_v5  ;;  %4721 = vmatpush.bf16.msra.mxu3 %v4656_v5  ;;  %v4638_v20 = vld [vmem:[#allocation3 + $0x58] sm:$0xff]  ;;  %v4636_v31 = vld [vmem:[#allocation3 + $0x48] sm:$0xff] }
 0x1c3   : > { %v1395_v38 = vpack.c.bf16 %v1362_v35, %v1359_v33  ;;  %v5622_v39 = vpack.c.bf16 %v1363_v36, %v1360_v34  ;;  %v1368_v49 = vcvt.s32.f32 %v1320_v45  ;;  %v1369_v50 = vcvt.s32.f32 %v1321_v43  ;;  %v4643_v36 = vld [vmem:[#allocation3 + $0x80] sm:$0xff] }
 0x1c4   : > { %4716 = vmatpush.bf16.msra.mxu2 %v4629_v40  ;;  %1604 = vmatpush.bf16.msra.mxu1 %v4629_v40  ;;  %v1326_v2 = vunpack.c.1.s8 %v5640_v58  ;;  %v1327_v3 = vunpack.c.1.s8 %v5643_v59  ;;  %v1371_v7 = vcvt.s32.f32 %v1323_v62  ;;  %v1372_v8 = vcvt.s32.f32 %v1324_v1 }
 0x1c5   : > { %v1398_v51 = vpack.c.bf16 %v1368_v49, %v1365_v47  ;;  %v5630_v52 = vpack.c.bf16 %v1369_v50, %v1366_v48  ;;  %v1330_v26 = vunpack.c.2.s8 %v5643_v59  ;;  %v1332_v27 = vunpack.c.3.s8 %v5640_v58  ;;  %v4635_v47 = vld [vmem:[#allocation3 + $0x40] sm:$0xff] }
 0x1c6   : > { %v1374_v9 = vcvt.s32.f32 %v1326_v2  ;;  %v1375_v10 = vcvt.s32.f32 %v1327_v3  ;;  %1940 = vmatpush.bf16.msra.mxu0 %v4655_v14  ;;  %4722 = vmatpush.bf16.msra.mxu3 %v4655_v14  ;;  %v1333_v28 = vunpack.c.3.s8 %v5643_v59 }
 0x1c7   : > { %v1378_v33 = vcvt.s32.f32 %v1330_v26  ;;  %v1380_v34 = vcvt.s32.f32 %v1332_v27 }
 0x1c8   : > { %4717 = vmatpush.bf16.msra.mxu2 %v4628_v41  ;;  %1605 = vmatpush.bf16.msra.mxu1 %v4628_v41  ;;  %v1401_v15 = vpack.c.bf16 %v1374_v9, %v1371_v7  ;;  %v5652_v16 = vpack.c.bf16 %v1375_v10, %v1372_v8  ;;  %v1381_v35 = vcvt.s32.f32 %v1333_v28  ;;  %v1277_v41 = vld [vmem:[%s5590_s25 + $0x10] sm:$0xff] }
 0x1c9   : > { %v1289_v42 = vunpack.c.0.s8 %v1277_v41  ;;  %v1292_v44 = vunpack.c.1.s8 %v1277_v41  ;;  %v1298_v48 = vunpack.c.3.s8 %v1277_v41 }
 0x1ca   : > { %1941 = vmatpush.bf16.msra.mxu0 %v4654_v19  ;;  %4723 = vmatpush.bf16.msra.mxu3 %v4654_v19  ;;  %v5664_v40 = vpack.c.bf16 %v1381_v35, %v1378_v33 }
 0x1cb   : > { %1850 = vxpose.binary.xlu0.c.b16.cont [2/16] %v5602_v0, %v5600_v63, 128  ;;  %v1337_v45 = vcvt.s32.f32 %v1289_v42  ;;  %v1340_v43 = vcvt.s32.f32 %v1292_v44  ;;  %v1346_v50 = vcvt.s32.f32 %v1298_v48 }
 0x1cc   : > { %4718 = vmatpush.bf16.msra.mxu2 %v4627_v46  ;;  %1606 = vmatpush.bf16.msra.mxu1 %v4627_v46 }
 0x1cd   : > { %v5670_v46 = vpack.c.bf16 %v1340_v43, %v1337_v45 }
 0x1ce   : > { %1942 = vmatpush.bf16.msra.mxu0 %v4653_v24  ;;  %4724 = vmatpush.bf16.msra.mxu3 %v4653_v24 }
 0x1cf   : > { %1627 = vmatmul.bf16.vlgmr.msra.gmra.mxu2 %v1395_v38  ;;  %1607 = vmatmul.bf16.vlgmr.msra.gmra.mxu1 %v5594_v53  ;;  %v4641_v53 = vld [vmem:[#allocation3 + $0x70] sm:$0xff] }
 0x1d0   : > { %1697 = vmatpush.bf16.msrb.mxu2 %v4650_v55  ;;  %1648 = vmatpush.bf16.msrb.mxu1 %v4642_v57 }
 0x1d2   : > { %1943 = vmatpush.bf16.msra.mxu0 %v4652_v30  ;;  %4725 = vmatpush.bf16.msra.mxu3 %v4652_v30 }
 0x1d4   : > { %1698 = vmatpush.bf16.msrb.mxu2 %v4649_v60  ;;  %1649 = vmatpush.bf16.msrb.mxu1 %v4641_v53 }
 0x1d6   : > { %1944 = vmatpush.bf16.msra.mxu0 %v4651_v37  ;;  %4726 = vmatpush.bf16.msra.mxu3 %v4651_v37 }
 0x1d8   : > { %1699 = vmatpush.bf16.msrb.mxu2 %v4648_v4  ;;  %1650 = vmatpush.bf16.msrb.mxu1 %v4640_v6  ;;  %v1283_v4 = vld [vmem:[%s5590_s25 + $0x40] sm:$0xff] }
 0x1d9   : > { %v1313_v5 = vunpack.c.0.s8 %v1283_v4  ;;  %v1316_v6 = vunpack.c.1.s8 %v1283_v4  ;;  %v1319_v27 = vunpack.c.2.s8 %v1283_v4  ;;  %v1322_v28 = vunpack.c.3.s8 %v1283_v4 }
 0x1db   : > { %1851 = vxpose.binary.xlu0.c.b16.cont [3/16] %v5610_v12, %v5608_v11, 128  ;;  %v1361_v7 = vcvt.s32.f32 %v1313_v5 }
 0x1dc   : > { %1700 = vmatpush.bf16.msrb.mxu2 %v4647_v13  ;;  %1651 = vmatpush.bf16.msrb.mxu1 %v4639_v17  ;;  %v1286_v13 = vld [vmem:[%s5590_s25 + $0x58] sm:$0xff] }
 0x1dd   : > { %v1334_v17 = vunpack.c.3.s8 %v1286_v13  ;;  %v1328_v24 = vunpack.c.1.s8 %v1286_v13 }
 0x1df   : > { %1632 = vmatmul.bf16.gmra.mxu2 %v1398_v51  ;;  %1612 = vmatmul.bf16.gmra.mxu1 %v5600_v63  ;;  %v1329_v63 = vunpack.c.2.s8 %v5640_v58  ;;  %v1376_v26 = vcvt.s32.f32 %v1328_v24 }
 0x1e0   : > { %1701 = vmatpush.bf16.msrb.mxu2 %v4646_v18  ;;  %1652 = vmatpush.bf16.msrb.mxu1 %v4638_v20  ;;  %v1382_v18 = vcvt.s32.f32 %v1334_v17 }
 0x1e1   : > { %v1377_v32 = vcvt.s32.f32 %v1329_v63 }
 0x1e4   : > { %1702 = vmatpush.bf16.msrb.mxu2 %v4645_v21  ;;  %1653 = vmatpush.bf16.msrb.mxu1 %v4637_v25  ;;  %v1325_v21 = vunpack.c.0.s8 %v1286_v13 }
 0x1e6   : > { %v1373_v63 = vcvt.s32.f32 %v1325_v21 }
 0x1e8   : > { %1703 = vmatpush.bf16.msrb.mxu2 %v4644_v29  ;;  %1654 = vmatpush.bf16.msrb.mxu1 %v4636_v31  ;;  %v1403_v30 = vpack.c.bf16 %v1376_v26, %v1373_v63  ;;  %v1367_v31 = vcvt.s32.f32 %v1319_v27 }
 0x1eb   : > { %1852 = vxpose.binary.xlu0.c.b16.cont [4/16] %v5616_v23, %v5614_v22, 128 }
 0x1ec   : > { %1704 = vmatpush.bf16.msrb.mxu2 %v4643_v36  ;;  %1655 = vmatpush.bf16.msrb.mxu1 %v4635_v47 }
 0x1ef   : > { %1637 = vmatmul.bf16.gmra.mxu2 %v1401_v15  ;;  %1617 = vmatmul.bf16.gmra.mxu1 %v5608_v11  ;;  %v1295_v11 = vunpack.c.2.s8 %v1277_v41 }
 0x1f1   : > { %v1343_v49 = vcvt.s32.f32 %v1295_v11 }
 0x1fb   : > { %1853 = vxpose.binary.xlu0.c.b16.cont [5/16] %v5622_v39, %v1395_v38, 128  ;;  %v1404_v38 = vpack.c.bf16 %v1380_v34, %v1377_v32  ;;  %v1370_v32 = vcvt.s32.f32 %v1322_v28 }
 0x1ff   : > { %1642 = vmatmul.bf16.gmra.mxu2 %v1404_v38  ;;  %1622 = vmatmul.bf16.gmra.mxu1 %v5614_v22  ;;  %v1280_v22 = vld [vmem:[%s5590_s25 + $0x28] sm:$0xff] }
 0x200   : > { %v1301_v55 = vunpack.c.0.s8 %v1280_v22  ;;  %v1304_v56 = vunpack.c.1.s8 %v1280_v22  ;;  %v1307_v61 = vunpack.c.2.s8 %v1280_v22  ;;  %v1310_v53 = vunpack.c.3.s8 %v1280_v22 }
 0x202   : > { %v1349_v57 = vcvt.s32.f32 %v1301_v55  ;;  %v1352_v58 = vcvt.s32.f32 %v1304_v56  ;;  %v1355_v62 = vcvt.s32.f32 %v1307_v61  ;;  %v1358_v1 = vcvt.s32.f32 %v1310_v53 }
 0x204   : > { %v1391_v59 = vpack.c.bf16 %v1352_v58, %v1349_v57  ;;  %v1394_v2 = vpack.c.bf16 %v1358_v1, %v1355_v62 }
 0x20b   : > { %1854 = vxpose.binary.xlu0.c.b16.cont [6/16] %v5630_v52, %v1398_v51, 128  ;;  %v5674_v51 = vpack.c.bf16 %v1346_v50, %v1343_v49 }
 0x20f   : > { %1705 = vmatmul.bf16.vlgmr.msrb.gmra.mxu2 %v5670_v46  ;;  %1656 = vmatmul.bf16.vlgmr.msrb.gmra.mxu1 %v5596_v54 }
 0x21b   : > { %1855 = vxpose.binary.xlu0.c.b16.cont [7/16] %v5652_v16, %v1401_v15, 128  ;;  %v1331_v15 = vunpack.c.2.s8 %v1286_v13 }
 0x21f   : > { %1710 = vmatmul.bf16.gmra.mxu2 %v5674_v51  ;;  %1661 = vmatmul.bf16.gmra.mxu1 %v5602_v0 }
 0x22b   : > { %1856 = vxpose.binary.xlu0.c.b16.end [8/16] %v5664_v40, %v1404_v38, 128 }
 0x22f   : > { %1715 = vmatmul.bf16.gmra.mxu2 %v1391_v59  ;;  %1666 = vmatmul.bf16.gmra.mxu1 %v5610_v12  ;;  %v1364_v12 = vcvt.s32.f32 %v1316_v6 }
 0x231   : > { %v1397_v8 = vpack.c.bf16 %v1364_v12, %v1361_v7 }
 0x23f   : > { %1720 = vmatmul.bf16.gmra.mxu2 %v1394_v2  ;;  %1671 = vmatmul.bf16.gmra.mxu1 %v5616_v23  ;;  %v1379_v23 = vcvt.s32.f32 %v1331_v15 }
 0x241   : > { %v1406_v20 = vpack.c.bf16 %v1382_v18, %v1379_v23 }
 0x243   : > { %4742 = vmatpush.lsf.bf16.msrb.mxu3 %v1406_v20 }
 0x247   : > { %4743 = vmatpush.lsf.bf16.msrb.mxu3 %v1403_v30 }
 0x24c   : > { %v5686_v10 = vpop.f32.mrf.mxu1 }
 0x24f   : > { %1725 = vmatmul.bf16.gmra.mxu2 %v1397_v8  ;;  %1676 = vmatmul.bf16.gmra.mxu1 %v5622_v39  ;;  %v1400_v39 = vpack.c.bf16 %v1370_v32, %v1367_v31 }
 0x251   : > { %4744 = vmatpush.lsf.bf16.msrb.mxu3 %v1400_v39 }
 0x252   : > { %v5689_v14 = vpop.f32.mrf.mxu2 }
 0x254   : > { %v1610_v25 = vpop.f32.mrf.mxu1 }
 0x255   : > { %4745 = vmatpush.lsf.bf16.msrb.mxu3 %v1397_v8  ;;  %v1783_v8 = vld [vmem:[#allocation6] sm:$0xff] }
 0x259   : > { %4746 = vmatpush.lsf.bf16.msrb.mxu3 %v1394_v2 }
 0x25a   : > { %v5694_v29 = vpop.f32.mrf.mxu2 }
 0x25c   : > { %v1613_v34 = vpop.f32.mrf.mxu1 }
 0x25d   : > { %4747 = vmatpush.lsf.bf16.msrb.mxu3 %v1391_v59 }
 0x25f   : > { %1730 = vmatmul.bf16.gmra.mxu2 %v1400_v39  ;;  %1681 = vmatmul.bf16.gmra.mxu1 %v5630_v52 }
 0x261   : > { %4748 = vmatpush.lsf.bf16.msrb.mxu3 %v5674_v51 }
 0x262   : > { %v5696_v35 = vpop.f32.mrf.mxu2 }
 0x264   : > { %v1615_v37 = vpop.f32.mrf.mxu1 }
 0x265   : > { %4749 = vmatpush.lsf.bf16.msrb.mxu3 %v5670_v46 }
 0x267   : > { %v1857_v60 = vpop.trf.xlu0  ;;  %4750 = vllmr.16.mxu3 }
 0x268   : > { %1945 = vmatmul.bf16.vlgmr.msra.gmra.mxu0 %v1857_v60 }
 0x26a   : > { %v5701_v38 = vpop.f32.mrf.mxu2 }
 0x26c   : > { %v1618_v42 = vpop.f32.mrf.mxu1 }
 0x26f   : > { %v5680_v54 = vpop.trf.xlu0  ;;  %1735 = vmatmul.bf16.gmra.mxu2 %v1403_v30  ;;  %1686 = vmatmul.bf16.gmra.mxu1 %v5652_v16 }
 0x272   : > { %v5704_v44 = vpop.f32.mrf.mxu2 }
 0x274   : > { %v5708_v45 = vpop.f32.mrf.mxu1 }
 0x277   : > { %v1859_v0 = vpop.trf.xlu0 }
 0x278   : > { %1950 = vmatmul.bf16.gmra.mxu0 %v1859_v0 }
 0x27a   : > { %v5710_v43 = vpop.f32.mrf.mxu2 }
 0x27c   : > { %v5712_v11 = vpop.f32.mrf.mxu1 }
 0x27f   : > { %v5683_v3 = vpop.trf.xlu0  ;;  %1740 = vmatmul.bf16.gmra.mxu2 %v1406_v20  ;;  %1691 = vmatmul.bf16.gmra.mxu1 %v5664_v40  ;;  %v1784_v20 = vld [vmem:[#allocation6 + $0x8] sm:$0xff] }
 0x282   : > { %v5714_v48 = vpop.f32.mrf.mxu2 }
 0x284   : > { %v5717_v46 = vpop.f32.mrf.mxu1 }
 0x287   : > { %v1861_v9 = vpop.trf.xlu0 }
 0x288   : > { %1955 = vmatmul.bf16.gmra.mxu0 %v1861_v9 }
 0x28a   : > { %v5719_v49 = vpop.f32.mrf.mxu2 }
 0x28c   : > { %v1657_v51 = vpop.f32.mrf.mxu1 }
 0x28d   : > { %v1658_v22 = vadd.f32 %v1657_v51, %v5686_v10  ;;  %v1787_v51 = vld [vmem:[#allocation6 + $0x20] sm:$0xff] }
 0x28f   : > { %v5692_v19 = vpop.trf.xlu0 }
 0x292   : > { %v1706_v55 = vpop.f32.mrf.mxu2 }
 0x293   : > { %v1707_v56 = vadd.f32 %v1706_v55, %v1658_v22 }
 0x294   : > { %v1659_v40 = vpop.f32.mrf.mxu1 }
 0x295   : > { %v1746_v57 = vpack.c.bf16 %v1707_v56, %v1707_v56  ;;  %v1660_v59 = vadd.f32 %v1659_v40, %v1610_v25 }
 0x297   : > { %v1863_v33 = vpop.trf.xlu0  ;;  %1767 = vst.msk [vmem:[%s5724_s28] sm:$0xf] %vm1766_vm3, %v1746_v57 }
 0x298   : > { %1960 = vmatmul.bf16.gmra.mxu0 %v1863_v33 }
 0x29a   : > { %v1708_v60 = vpop.f32.mrf.mxu2 }
 0x29b   : > { %v1709_v61 = vadd.f32 %v1708_v60, %v1660_v59  ;;  %v1788_v59 = vld [vmem:[#allocation6 + $0x28] sm:$0xff] }
 0x29c   : > { %v1662_v1 = vpop.f32.mrf.mxu1 }
 0x29d   : > { %v1747_v53 = vpack.c.bf16 %v1709_v61, %v1709_v61  ;;  %v1663_v2 = vadd.f32 %v1662_v1, %v1613_v34 }
 0x29f   : > { %v5699_v36 = vpop.trf.xlu0  ;;  %1768 = vst.msk [vmem:[%s5724_s28 + $0x4] sm:$0xf] %vm1766_vm3, %v1747_v53 }
 0x2a2   : > { %v1711_v0 = vpop.f32.mrf.mxu2 }
 0x2a3   : > { %v1712_v4 = vadd.f32 %v1711_v0, %v1663_v2  ;;  %v1789_v2 = vld [vmem:[#allocation6 + $0x30] sm:$0xff] }
 0x2a4   : > { %v1664_v7 = vpop.f32.mrf.mxu1 }
 0x2a5   : > { %v1748_v5 = vpack.c.bf16 %v1712_v4, %v1712_v4  ;;  %v1665_v12 = vadd.f32 %v1664_v7, %v1615_v37 }
 0x2a7   : > { %v1865_v41 = vpop.trf.xlu0  ;;  %1769 = vst.msk [vmem:[%s5724_s28 + $0x8] sm:$0xf] %vm1766_vm3, %v1748_v5 }
 0x2a8   : > { %1965 = vmatmul.bf16.gmra.mxu0 %v1865_v41  ;;  %v1786_v41 = vld [vmem:[#allocation6 + $0x18] sm:$0xff] }
 0x2aa   : > { %v1713_v9 = vpop.f32.mrf.mxu2 }
 0x2ab   : > { %v1714_v10 = vadd.f32 %v1713_v9, %v1665_v12 }
 0x2ac   : > { %v1667_v23 = vpop.f32.mrf.mxu1 }
 0x2ad   : > { %v1749_v17 = vpack.c.bf16 %v1714_v10, %v1714_v10  ;;  %v1668_v18 = vadd.f32 %v1667_v23, %v1618_v42  ;;  %v1791_v23 = vld [vmem:[#allocation6 + $0x40] sm:$0xff] }
 0x2af   : > { %v1866_v52 = vpop.trf.xlu0  ;;  %1770 = vst.msk [vmem:[%s5724_s28 + $0xc] sm:$0xf] %vm1766_vm3, %v1749_v17 }
 0x2b0   : > { %2005 = vmatmul.bf16.vlgmr.msra.gmra.mxu3 %v1866_v52 }
 0x2b2   : > { %v1716_v21 = vpop.f32.mrf.mxu2 }
 0x2b3   : > { %v1717_v24 = vadd.f32 %v1716_v21, %v1668_v18 }
 0x2b4   : > { %v1669_v27 = vpop.f32.mrf.mxu1 }
 0x2b5   : > { %v1750_v26 = vpack.c.bf16 %v1717_v24, %v1717_v24  ;;  %v1670_v28 = vadd.f32 %v1669_v27, %v5708_v45 }
 0x2b7   : > { %v1867_v47 = vpop.trf.xlu0  ;;  %1771 = vst.msk [vmem:[%s5724_s28 + $0x10] sm:$0xf] %vm1766_vm3, %v1750_v26  ;;  %v1792_v26 = vld [vmem:[#allocation6 + $0x48] sm:$0xff] }
 0x2b8   : > { %1970 = vmatmul.bf16.gmra.mxu0 %v1867_v47 }
 0x2ba   : > { %v1718_v30 = vpop.f32.mrf.mxu2 }
 0x2bb   : > { %v1719_v31 = vadd.f32 %v1718_v30, %v1670_v28 }
 0x2bc   : > { %v1672_v34 = vpop.f32.mrf.mxu1 }
 0x2bd   : > { %v1751_v33 = vpack.c.bf16 %v1719_v31, %v1719_v31  ;;  %v1673_v37 = vadd.f32 %v1672_v34, %v5712_v11  ;;  %v1807_v31 = vld [vmem:[#allocation6 + $0xc0] sm:$0xff]  ;;  %v1793_v34 = vld [vmem:[#allocation6 + $0x50] sm:$0xff] }
 0x2bf   : > { %v1868_v16 = vpop.trf.xlu0  ;;  %1772 = vst.msk [vmem:[%s5724_s28 + $0x14] sm:$0xf] %vm1766_vm3, %v1751_v33 }
 0x2c0   : > { %2010 = vmatmul.bf16.gmra.mxu3 %v1868_v16 }
 0x2c2   : > { %v1721_v42 = vpop.f32.mrf.mxu2 }
 0x2c3   : > { %v1722_v52 = vadd.f32 %v1721_v42, %v1673_v37 }
 0x2c5   : > { %v1752_v16 = vpack.c.bf16 %v1722_v52, %v1722_v52 }
 0x2c7   : > { %v1869_v50 = vpop.trf.xlu0  ;;  %1773 = vst.msk [vmem:[%s5724_s28 + $0x18] sm:$0xf] %vm1766_vm3, %v1752_v16 }
 0x2c8   : > { %1975 = vmatmul.bf16.gmra.mxu0 %v1869_v50  ;;  %v1674_v50 = vpop.f32.mrf.mxu1 }
 0x2ca   : > { %v1723_v22 = vpop.f32.mrf.mxu2 }
 0x2cf   : > { %v1870_v58 = vpop.trf.xlu0 }
 0x2d0   : > { %2015 = vmatmul.bf16.gmra.mxu3 %v1870_v58  ;;  %v1677_v58 = vpop.f32.mrf.mxu1 }
 0x2d1   : > { %v1678_v40 = vadd.f32 %v1677_v58, %v5689_v14  ;;  %v1809_v58 = vld [vmem:[#allocation6 + $0xd0] sm:$0xff] }
 0x2d2   : > { %v1726_v60 = vpop.f32.mrf.mxu2 }
 0x2d7   : > { %v1871_v62 = vpop.trf.xlu0 }
 0x2d8   : > { %1980 = vmatmul.bf16.gmra.mxu0 %v1871_v62  ;;  %v1679_v1 = vpop.f32.mrf.mxu1 }
 0x2da   : > { %v1728_v0 = vpop.f32.mrf.mxu2 }
 0x2df   : > { %v1872_v6 = vpop.trf.xlu0 }
 0x2e0   : > { %2020 = vmatmul.bf16.gmra.mxu3 %v1872_v6  ;;  %v1682_v7 = vpop.f32.mrf.mxu1 }
 0x2e1   : > { %v1683_v12 = vadd.f32 %v1682_v7, %v5696_v35 }
 0x2e2   : > { %v1731_v9 = vpop.f32.mrf.mxu2 }
 0x2e5   : > { %v1946_v13 = vpop.f32.mrf.mxu0 }
 0x2e6   : > { %v2066_v15 = vadd.f32 %v1946_v13, %v1783_v8  ;;  %v1790_v8 = vld [vmem:[#allocation6 + $0x38] sm:$0xff] }
 0x2e8   : > { %2115 = vst.msk [vmem:[#allocation6] sm:$0xff] %vm2114_vm4, %v2066_v15  ;;  %1985 = vmatmul.bf16.gmra.mxu0 %v5680_v54  ;;  %v1785_v54 = vld [vmem:[#allocation6 + $0x10] sm:$0xff]  ;;  %v1684_v17 = vpop.f32.mrf.mxu1 }
 0x2ea   : > { %v1733_v18 = vpop.f32.mrf.mxu2 }
 0x2ed   : > { %v1948_v25 = vpop.f32.mrf.mxu0 }
 0x2ee   : > { %v2067_v63 = vadd.f32 %v1948_v25, %v1784_v20 }
 0x2f0   : > { %2116 = vst.msk [vmem:[#allocation6 + $0x8] sm:$0xff] %vm2114_vm4, %v2067_v63  ;;  %4751 = vmatmul.lmr.bf16.gmra.16.mxu3  ;;  %v1687_v25 = vpop.f32.mrf.mxu1 }
 0x2f1   : > { %v1688_v63 = vadd.f32 %v1687_v25, %v5704_v44 }
 0x2f2   : > { %v1736_v27 = vpop.f32.mrf.mxu2 }
 0x2f3   : > { %v1737_v28 = vadd.f32 %v1736_v27, %v1688_v63  ;;  %v1814_v63 = vld [vmem:[#allocation6 + $0xf8] sm:$0xff]  ;;  %v1800_v27 = vld [vmem:[#allocation6 + $0x88] sm:$0xff] }
 0x2f5   : > { %v1951_v32 = vpop.f32.mrf.mxu0  ;;  %v1758_v30 = vpack.c.bf16 %v1737_v28, %v1737_v28 }
 0x2f6   : > { %v2068_v39 = vadd.f32 %v1951_v32, %v1785_v54 }
 0x2f7   : > { %1779 = vst.msk [vmem:[%s5724_s28 + $0x30] sm:$0xf] %vm1766_vm3, %v1758_v30  ;;  %v1815_v30 = vld [vmem:[#allocation6 + $0x100] sm:$0xff] }
 0x2f8   : > { %2117 = vst.msk [vmem:[#allocation6 + $0x10] sm:$0xff] %vm2114_vm4, %v2068_v39  ;;  %1990 = vmatmul.bf16.gmra.mxu0 %v5683_v3  ;;  %4752 = vmatmul.lmr.bf16.gmra.16.mxu3  ;;  %v1675_v3 = vadd.f32 %v1674_v50, %v5717_v46  ;;  %v1727_v46 = vadd.f32 %v1726_v60, %v1678_v40  ;;  %v1689_v32 = vpop.f32.mrf.mxu1  ;;  %v1795_v60 = vld [vmem:[#allocation6 + $0x60] sm:$0xff] }
 0x2f9   : > { %v1690_v39 = vadd.f32 %v1689_v32, %v5710_v43  ;;  %v1801_v32 = vld [vmem:[#allocation6 + $0x90] sm:$0xff] }
 0x2fa   : > { %v1724_v55 = vadd.f32 %v1723_v22, %v1675_v3  ;;  %v1754_v62 = vpack.c.bf16 %v1727_v46, %v1727_v46  ;;  %v1738_v37 = vpop.f32.mrf.mxu2  ;;  %v1794_v3 = vld [vmem:[#allocation6 + $0x58] sm:$0xff] }
 0x2fc   : > { %v1753_v57 = vpack.c.bf16 %v1724_v55, %v1724_v55  ;;  %1775 = vst.msk [vmem:[%s5724_s28 + $0x20] sm:$0xf] %vm1766_vm3, %v1754_v62 }
 0x2fd   : > { %v1953_v45 = vpop.f32.mrf.mxu0 }
 0x2fe   : > { %v2069_v47 = vadd.f32 %v1953_v45, %v1786_v41  ;;  %1774 = vst.msk [vmem:[%s5724_s28 + $0x1c] sm:$0xf] %vm1766_vm3, %v1753_v57  ;;  %v1739_v41 = vadd.f32 %v1738_v37, %v1690_v39  ;;  %v1816_v37 = vld [vmem:[#allocation6 + $0x108] sm:$0xff] }
 0x300   : > { %2118 = vst.msk [vmem:[#allocation6 + $0x18] sm:$0xff] %vm2114_vm4, %v2069_v47  ;;  %4753 = vmatmul.lmr.bf16.gmra.16.mxu3  ;;  %v1759_v45 = vpack.c.bf16 %v1739_v41, %v1739_v41  ;;  %v1808_v47 = vld [vmem:[#allocation6 + $0xc8] sm:$0xff]  ;;  %v1692_v16 = vpop.f32.mrf.mxu1  ;;  %v1802_v41 = vld [vmem:[#allocation6 + $0x98] sm:$0xff] }
 0x301   : > { %v1693_v43 = vadd.f32 %v1692_v16, %v5714_v48 }
 0x302   : > { %1780 = vst.msk [vmem:[%s5724_s28 + $0x34] sm:$0xf] %vm1766_vm3, %v1759_v45 }
 0x305   : > { %v1956_v56 = vpop.f32.mrf.mxu0 }
 0x306   : > { %v2070_v11 = vadd.f32 %v1956_v56, %v1787_v51  ;;  %v1741_v51 = vpop.f32.mrf.mxu2 }
 0x307   : > { %v1742_v55 = vadd.f32 %v1741_v51, %v1693_v43  ;;  %v1803_v43 = vld [vmem:[#allocation6 + $0xa0] sm:$0xff] }
 0x308   : > { %2119 = vst.msk [vmem:[#allocation6 + $0x20] sm:$0xff] %vm2114_vm4, %v2070_v11  ;;  %1995 = vmatmul.bf16.gmra.mxu0 %v5692_v19  ;;  %4754 = vmatmul.lmr.bf16.gmra.16.mxu3  ;;  %v1680_v19 = vadd.f32 %v1679_v1, %v5694_v29  ;;  %v1732_v29 = vadd.f32 %v1731_v9, %v1683_v12  ;;  %v1694_v40 = vpop.f32.mrf.mxu1  ;;  %v1797_v12 = vld [vmem:[#allocation6 + $0x70] sm:$0xff] }
 0x309   : > { %v1760_v57 = vpack.c.bf16 %v1742_v55, %v1742_v55  ;;  %v1695_v48 = vadd.f32 %v1694_v40, %v5719_v49  ;;  %v1819_v40 = vld [vmem:[#allocation6 + $0x120] sm:$0xff] }
 0x30a   : > { %v1729_v4 = vadd.f32 %v1728_v0, %v1680_v19  ;;  %v1756_v15 = vpack.c.bf16 %v1732_v29, %v1732_v29 }
 0x30b   : > { %1781 = vst.msk [vmem:[%s5724_s28 + $0x38] sm:$0xf] %vm1766_vm3, %v1760_v57 }
 0x30c   : > { %v1755_v6 = vpack.c.bf16 %v1729_v4, %v1729_v4  ;;  %1777 = vst.msk [vmem:[%s5724_s28 + $0x28] sm:$0xf] %vm1766_vm3, %v1756_v15  ;;  %v1796_v4 = vld [vmem:[#allocation6 + $0x68] sm:$0xff]  ;;  %v1798_v15 = vld [vmem:[#allocation6 + $0x78] sm:$0xff] }
 0x30d   : > { %v1958_v61 = vpop.f32.mrf.mxu0 }
 0x30e   : > { %v2071_v53 = vadd.f32 %v1958_v61, %v1788_v59  ;;  %1776 = vst.msk [vmem:[%s5724_s28 + $0x24] sm:$0xf] %vm1766_vm3, %v1755_v6  ;;  %v1743_v46 = vpop.f32.mrf.mxu2  ;;  %v1811_v6 = vld [vmem:[#allocation6 + $0xe0] sm:$0xff] }
 0x310   : > { %2120 = vst.msk [vmem:[#allocation6 + $0x28] sm:$0xff] %vm2114_vm4, %v2071_v53  ;;  %4755 = vmatmul.lmr.bf16.gmra.16.mxu3  ;;  %v1744_v53 = vadd.f32 %v1743_v46, %v1695_v48 }
 0x312   : > { %v1761_v19 = vpack.c.bf16 %v1744_v53, %v1744_v53  ;;  %v1820_v53 = vld [vmem:[#allocation6 + $0x128] sm:$0xff] }
 0x314   : > { %1782 = vst.msk [vmem:[%s5724_s28 + $0x3c] sm:$0xf] %vm1766_vm3, %v1761_v19 }
 0x315   : > { %v1961_v5 = vpop.f32.mrf.mxu0 }
 0x316   : > { %v2072_v14 = vadd.f32 %v1961_v5, %v1789_v2  ;;  %v1810_v2 = vld [vmem:[#allocation6 + $0xd8] sm:$0xff] }
 0x318   : > { %2121 = vst.msk [vmem:[#allocation6 + $0x30] sm:$0xff] %vm2114_vm4, %v2072_v14  ;;  %2000 = vmatmul.bf16.gmra.mxu0 %v5699_v36  ;;  %4756 = vmatmul.lmr.bf16.gmra.16.mxu3  ;;  %v1685_v36 = vadd.f32 %v1684_v17, %v5701_v38 }
 0x31a   : > { %v1734_v20 = vadd.f32 %v1733_v18, %v1685_v36  ;;  %v1813_v18 = vld [vmem:[#allocation6 + $0xf0] sm:$0xff] }
 0x31c   : > { %v1757_v24 = vpack.c.bf16 %v1734_v20, %v1734_v20 }
 0x31d   : > { %v1963_v10 = vpop.f32.mrf.mxu0 }
 0x31e   : > { %v2073_v13 = vadd.f32 %v1963_v10, %v1790_v8  ;;  %1778 = vst.msk [vmem:[%s5724_s28 + $0x2c] sm:$0xf] %vm1766_vm3, %v1757_v24  ;;  %v1812_v10 = vld [vmem:[#allocation6 + $0xe8] sm:$0xff] }
 0x320   : > { %2122 = vst.msk [vmem:[#allocation6 + $0x38] sm:$0xff] %vm2114_vm4, %v2073_v13  ;;  %4757 = vmatmul.lmr.bf16.gmra.16.mxu3 }
 0x325   : > { %v1966_v21 = vpop.f32.mrf.mxu0 }
 0x326   : > { %v2074_v35 = vadd.f32 %v1966_v21, %v1791_v23  ;;  %v1799_v21 = vld [vmem:[#allocation6 + $0x80] sm:$0xff] }
 0x328   : > { %2123 = vst.msk [vmem:[#allocation6 + $0x40] sm:$0xff] %vm2114_vm4, %v2074_v35  ;;  %4758 = vmatmul.lmr.bf16.gmra.16.mxu3 }
 0x32d   : > { %v1968_v54 = vpop.f32.mrf.mxu0 }
 0x32e   : > { %v2075_v38 = vadd.f32 %v1968_v54, %v1792_v26 }
 0x330   : > { %2124 = vst.msk [vmem:[#allocation6 + $0x48] sm:$0xff] %vm2114_vm4, %v2075_v38  ;;  %4759 = vmatmul.lmr.bf16.gmra.16.mxu3 }
 0x333   : > { %v2006_v33 = vpop.f32.mrf.mxu3 }
 0x334   : > { %v2090_v44 = vadd.f32 %v2006_v33, %v1807_v31 }
 0x335   : > { %v1971_v42 = vpop.f32.mrf.mxu0 }
 0x336   : > { %2139 = vst.msk [vmem:[#allocation6 + $0xc0] sm:$0xff] %vm2114_vm4, %v2090_v44  ;;  %v2076_v52 = vadd.f32 %v1971_v42, %v1793_v34 }
 0x338   : > { %2125 = vst.msk [vmem:[#allocation6 + $0x50] sm:$0xff] %vm2114_vm4, %v2076_v52  ;;  %4760 = vmatmul.lmr.bf16.gmra.16.mxu3 }
 0x33b   : > { %v2008_v50 = vpop.f32.mrf.mxu3 }
 0x33c   : > { %v2091_v22 = vadd.f32 %v2008_v50, %v1808_v47  ;;  %v1817_v47 = vld [vmem:[#allocation6 + $0x110] sm:$0xff] }
 0x33d   : > { %v1973_v56 = vpop.f32.mrf.mxu0 }
 0x33e   : > { %2140 = vst.msk [vmem:[#allocation6 + $0xc8] sm:$0xff] %vm2114_vm4, %v2091_v22  ;;  %v2077_v11 = vadd.f32 %v1973_v56, %v1794_v3  ;;  %v1818_v22 = vld [vmem:[#allocation6 + $0x118] sm:$0xff]  ;;  %v1804_v56 = vld [vmem:[#allocation6 + $0xa8] sm:$0xff] }
 0x340   : > { %2126 = vst.msk [vmem:[#allocation6 + $0x58] sm:$0xff] %vm2114_vm4, %v2077_v11  ;;  %4761 = vmatmul.lmr.bf16.gmra.16.mxu3 }
 0x343   : > { %v2011_v59 = vpop.f32.mrf.mxu3 }
 0x344   : > { %v2092_v61 = vadd.f32 %v2011_v59, %v1809_v58  ;;  %v1805_v59 = vld [vmem:[#allocation6 + $0xb0] sm:$0xff] }
 0x345   : > { %v1976_v62 = vpop.f32.mrf.mxu0 }
 0x346   : > { %2141 = vst.msk [vmem:[#allocation6 + $0xd0] sm:$0xff] %vm2114_vm4, %v2092_v61  ;;  %v2078_v1 = vadd.f32 %v1976_v62, %v1795_v60 }
 0x348   : > { %2127 = vst.msk [vmem:[#allocation6 + $0x60] sm:$0xff] %vm2114_vm4, %v2078_v1  ;;  %4762 = vmatmul.lmr.bf16.gmra.16.mxu3  ;;  %v1806_v1 = vld [vmem:[#allocation6 + $0xb8] sm:$0xff] }
 0x34b   : > { %v2013_v0 = vpop.f32.mrf.mxu3 }
 0x34c   : > { %v2093_v5 = vadd.f32 %v2013_v0, %v1810_v2 }
 0x34d   : > { %v1978_v49 = vpop.f32.mrf.mxu0 }
 0x34e   : > { %2142 = vst.msk [vmem:[#allocation6 + $0xd8] sm:$0xff] %vm2114_vm4, %v2093_v5  ;;  %v2079_v14 = vadd.f32 %v1978_v49, %v1796_v4  ;;  %v1821_v4 = vld [vmem:[#allocation6 + $0x130] sm:$0xff] }
 0x350   : > { %2128 = vst.msk [vmem:[#allocation6 + $0x68] sm:$0xff] %vm2114_vm4, %v2079_v14  ;;  %4763 = vmatmul.lmr.bf16.gmra.16.mxu3  ;;  %v1822_v14 = vld [vmem:[#allocation6 + $0x138] sm:$0xff] }
 0x353   : > { %v2016_v7 = vpop.f32.mrf.mxu3 }
 0x354   : > { %v2094_v8 = vadd.f32 %v2016_v7, %v1811_v6 }
 0x355   : > { %v1981_v9 = vpop.f32.mrf.mxu0 }
 0x356   : > { %2143 = vst.msk [vmem:[#allocation6 + $0xe0] sm:$0xff] %vm2114_vm4, %v2094_v8  ;;  %v2080_v29 = vadd.f32 %v1981_v9, %v1797_v12  ;;  %v1823_v12 = vld [vmem:[#allocation6 + $0x140] sm:$0xff] }
 0x358   : > { %2129 = vst.msk [vmem:[#allocation6 + $0x70] sm:$0xff] %vm2114_vm4, %v2080_v29  ;;  %4764 = vmatmul.lmr.bf16.gmra.16.mxu3  ;;  %v1824_v29 = vld [vmem:[#allocation6 + $0x148] sm:$0xff] }
 0x35b   : > { %v2018_v13 = vpop.f32.mrf.mxu3 }
 0x35c   : > { %v2095_v17 = vadd.f32 %v2018_v13, %v1812_v10 }
 0x35d   : > { %v1983_v36 = vpop.f32.mrf.mxu0 }
 0x35e   : > { %2144 = vst.msk [vmem:[#allocation6 + $0xe8] sm:$0xff] %vm2114_vm4, %v2095_v17  ;;  %v2081_v23 = vadd.f32 %v1983_v36, %v1798_v15  ;;  %v1825_v15 = vld [vmem:[#allocation6 + $0x150] sm:$0xff] }
 0x360   : > { %2130 = vst.msk [vmem:[#allocation6 + $0x78] sm:$0xff] %vm2114_vm4, %v2081_v23  ;;  %4765 = vmatmul.lmr.bf16.gmra.16.mxu3  ;;  %v1826_v23 = vld [vmem:[#allocation6 + $0x158] sm:$0xff] }
 0x363   : > { %v2021_v20 = vpop.f32.mrf.mxu3 }
 0x364   : > { %v2096_v35 = vadd.f32 %v2021_v20, %v1813_v18 }
 0x365   : > { %v1986_v24 = vpop.f32.mrf.mxu0 }
 0x366   : > { %2145 = vst.msk [vmem:[#allocation6 + $0xf0] sm:$0xff] %vm2114_vm4, %v2096_v35  ;;  %v2082_v25 = vadd.f32 %v1986_v24, %v1799_v21  ;;  %v1827_v21 = vld [vmem:[#allocation6 + $0x160] sm:$0xff] }
 0x368   : > { %2131 = vst.msk [vmem:[#allocation6 + $0x80] sm:$0xff] %vm2114_vm4, %v2082_v25  ;;  %4766 = vmatmul.lmr.bf16.gmra.16.mxu3  ;;  %v1828_v25 = vld [vmem:[#allocation6 + $0x168] sm:$0xff] }
 0x36b   : > { %v2023_v26 = vpop.f32.mrf.mxu3 }
 0x36c   : > { %v2097_v28 = vadd.f32 %v2023_v26, %v1814_v63 }
 0x36d   : > { %v1988_v54 = vpop.f32.mrf.mxu0 }
 0x36e   : > { %2146 = vst.msk [vmem:[#allocation6 + $0xf8] sm:$0xff] %vm2114_vm4, %v2097_v28  ;;  %v2083_v38 = vadd.f32 %v1988_v54, %v1800_v27  ;;  %v1829_v27 = vld [vmem:[#allocation6 + $0x170] sm:$0xff] }
 0x370   : > { %2132 = vst.msk [vmem:[#allocation6 + $0x88] sm:$0xff] %vm2114_vm4, %v2083_v38  ;;  %v1830_v38 = vld [vmem:[#allocation6 + $0x178] sm:$0xff] }
 0x373   : > { %v2026_v31 = vpop.f32.mrf.mxu3 }
 0x374   : > { %v2098_v39 = vadd.f32 %v2026_v31, %v1815_v30 }
 0x375   : > { %v1991_v33 = vpop.f32.mrf.mxu0 }
 0x376   : > { %2147 = vst.msk [vmem:[#allocation6 + $0x100] sm:$0xff] %vm2114_vm4, %v2098_v39  ;;  %v2084_v34 = vadd.f32 %v1991_v33, %v1801_v32 }
 0x378   : > { %2133 = vst.msk [vmem:[#allocation6 + $0x90] sm:$0xff] %vm2114_vm4, %v2084_v34 }
 0x37b   : > { %v2028_v44 = vpop.f32.mrf.mxu3 }
 0x37c   : > { %v2099_v42 = vadd.f32 %v2028_v44, %v1816_v37 }
 0x37d   : > { %v1993_v52 = vpop.f32.mrf.mxu0 }
 0x37e   : > { %2148 = vst.msk [vmem:[#allocation6 + $0x108] sm:$0xff] %vm2114_vm4, %v2099_v42  ;;  %v2085_v45 = vadd.f32 %v1993_v52, %v1802_v41 }
 0x380   : > { %2134 = vst.msk [vmem:[#allocation6 + $0x98] sm:$0xff] %vm2114_vm4, %v2085_v45 }
 0x383   : > { %v2031_v16 = vpop.f32.mrf.mxu3 }
 0x384   : > { %v2100_v50 = vadd.f32 %v2031_v16, %v1817_v47 }
 0x385   : > { %v1996_v3 = vpop.f32.mrf.mxu0 }
 0x386   : > { %2149 = vst.msk [vmem:[#allocation6 + $0x110] sm:$0xff] %vm2114_vm4, %v2100_v50  ;;  %v2086_v51 = vadd.f32 %v1996_v3, %v1803_v43 }
 0x388   : > { %2135 = vst.msk [vmem:[#allocation6 + $0xa0] sm:$0xff] %vm2114_vm4, %v2086_v51 }
 0x38b   : > { %v2033_v55 = vpop.f32.mrf.mxu3 }
 0x38c   : > { %v2101_v11 = vadd.f32 %v2033_v55, %v1818_v22 }
 0x38d   : > { %v1998_v57 = vpop.f32.mrf.mxu0 }
 0x38e   : > { %2150 = vst.msk [vmem:[#allocation6 + $0x118] sm:$0xff] %vm2114_vm4, %v2101_v11  ;;  %v2087_v58 = vadd.f32 %v1998_v57, %v1804_v56 }
 0x390   : > { %2136 = vst.msk [vmem:[#allocation6 + $0xa8] sm:$0xff] %vm2114_vm4, %v2087_v58 }
 0x393   : > { %v2036_v48 = vpop.f32.mrf.mxu3 }
 0x394   : > { %v2102_v60 = vadd.f32 %v2036_v48, %v1819_v40 }
 0x395   : > { %v2001_v46 = vpop.f32.mrf.mxu0 }
 0x396   : > { %2151 = vst.msk [vmem:[#allocation6 + $0x120] sm:$0xff] %vm2114_vm4, %v2102_v60  ;;  %v2088_v61 = vadd.f32 %v2001_v46, %v1805_v59 }
 0x398   : > { %2137 = vst.msk [vmem:[#allocation6 + $0xb0] sm:$0xff] %vm2114_vm4, %v2088_v61 }
 0x39b   : > { %v2038_v62 = vpop.f32.mrf.mxu3 }
 0x39c   : > { %v2103_v19 = vadd.f32 %v2038_v62, %v1820_v53 }
 0x39d   : > { %v2003_v2 = vpop.f32.mrf.mxu0 }
 0x39e   : > { %2152 = vst.msk [vmem:[#allocation6 + $0x128] sm:$0xff] %vm2114_vm4, %v2103_v19  ;;  %v2089_v0 = vadd.f32 %v2003_v2, %v1806_v1 }
 0x3a0   : > { %2138 = vst.msk [vmem:[#allocation6 + $0xb8] sm:$0xff] %vm2114_vm4, %v2089_v0 }
 0x3a3   : > { %v2041_v5 = vpop.f32.mrf.mxu3 }
 0x3a4   : > { %v2104_v49 = vadd.f32 %v2041_v5, %v1821_v4 }
 0x3a6   : > { %2153 = vst.msk [vmem:[#allocation6 + $0x130] sm:$0xff] %vm2114_vm4, %v2104_v49 }
 0x3ab   : > { %v2043_v6 = vpop.f32.mrf.mxu3 }
 0x3ac   : > { %v2105_v7 = vadd.f32 %v2043_v6, %v1822_v14 }
 0x3ae   : > { %2154 = vst.msk [vmem:[#allocation6 + $0x138] sm:$0xff] %vm2114_vm4, %v2105_v7 }
 0x3b3   : > { %v2046_v8 = vpop.f32.mrf.mxu3 }
 0x3b4   : > { %v2106_v9 = vadd.f32 %v2046_v8, %v1823_v12 }
 0x3b6   : > { %2155 = vst.msk [vmem:[#allocation6 + $0x140] sm:$0xff] %vm2114_vm4, %v2106_v9 }
 0x3bb   : > { %v2048_v10 = vpop.f32.mrf.mxu3 }
 0x3bc   : > { %v2107_v13 = vadd.f32 %v2048_v10, %v1824_v29 }
 0x3be   : > { %2156 = vst.msk [vmem:[#allocation6 + $0x148] sm:$0xff] %vm2114_vm4, %v2107_v13 }
 0x3c3   : > { %v2051_v17 = vpop.f32.mrf.mxu3 }
 0x3c4   : > { %v2108_v36 = vadd.f32 %v2051_v17, %v1825_v15 }
 0x3c6   : > { %2157 = vst.msk [vmem:[#allocation6 + $0x150] sm:$0xff] %vm2114_vm4, %v2108_v36 }
 0x3cb   : > { %v2053_v18 = vpop.f32.mrf.mxu3 }
 0x3cc   : > { %v2109_v20 = vadd.f32 %v2053_v18, %v1826_v23 }
 0x3ce   : > { %2158 = vst.msk [vmem:[#allocation6 + $0x158] sm:$0xff] %vm2114_vm4, %v2109_v20 }
 0x3d3   : > { %v2056_v35 = vpop.f32.mrf.mxu3 }
 0x3d4   : > { %v2110_v24 = vadd.f32 %v2056_v35, %v1827_v21 }
 0x3d6   : > { %2159 = vst.msk [vmem:[#allocation6 + $0x160] sm:$0xff] %vm2114_vm4, %v2110_v24 }
 0x3db   : > { %v2058_v63 = vpop.f32.mrf.mxu3 }
 0x3dc   : > { %v2111_v26 = vadd.f32 %v2058_v63, %v1828_v25 }
 0x3de   : > { %2160 = vst.msk [vmem:[#allocation6 + $0x168] sm:$0xff] %vm2114_vm4, %v2111_v26 }
 0x3e3   : > { %v2061_v28 = vpop.f32.mrf.mxu3 }
 0x3e4   : > { %v2112_v54 = vadd.f32 %v2061_v28, %v1829_v27 }
 0x3e6   : > { %2161 = vst.msk [vmem:[#allocation6 + $0x170] sm:$0xff] %vm2114_vm4, %v2112_v54 }
 0x3ea   : > { %2166 = sbr.rel (%p4317_p10) target bundleno = 1686 (0x696), region = 88 }
 0x3eb   : > { %v2063_v30 = vpop.f32.mrf.mxu3 }
 0x3ec   : > { %v2113_v31 = vadd.f32 %v2063_v30, %v1830_v38 }
 0x3ee   : > { %2162 = vst.msk [vmem:[#allocation6 + $0x178] sm:$0xff] %vm2114_vm4, %v2113_v31 }
 0x3ef   : > { %v4690_v32 = vld [vmem:[%s6401_s7 + $0x18] sm:$0xff]  ;;  %v4689_v34 = vld [vmem:[%s6401_s7 + $0x10] sm:$0xff]  ;;  %v4688_v41 = vld [vmem:[%s6401_s7 + $0x8] sm:$0xff] }
 0x3f0   : > { %v4662_v39 = vld [vmem:[%s6400_s6 + $0x18] sm:$0xff]  ;;  %2523 = vmatpush.bf16.msra.mxu0 %v4690_v32  ;;  %v4661_v37 = vld [vmem:[%s6400_s6 + $0x10] sm:$0xff]  ;;  %v4660_v42 = vld [vmem:[%s6400_s6 + $0x8] sm:$0xff] }
 0x3f1   : > { %v4694_v33 = vld [vmem:[%s6402_s8 + $0x18] sm:$0xff]  ;;  %2748 = vmatpush.bf16.msra.mxu1 %v4662_v39  ;;  %v4693_v44 = vld [vmem:[%s6402_s8 + $0x10] sm:$0xff]  ;;  %v4692_v52 = vld [vmem:[%s6402_s8 + $0x8] sm:$0xff] }
 0x3f2   : > { %3053 = vmatpush.bf16.msra.mxu2 %v4694_v33  ;;  %v4687_v45 = vld [vmem:[%s6401_s7] sm:$0xff]  ;;  %v5858_v43 = vld [vmem:[#allocation2 + $0x8] sm:$0xff]  ;;  %v5868_v11 = vld [vmem:[#allocation2 + $0x10] sm:$0xff] }
 0x3f3   : > { %v4659_v47 = vld [vmem:[%s6400_s6] sm:$0xff]  ;;  %v2874_v51 = vld [vmem:[#allocation6 + $0x8] sm:$0xff]  ;;  %v5870_v57 = vld [vmem:[#allocation2 + $0x18] sm:$0xff] }
 0x3f4   : > { %2524 = vmatpush.bf16.msra.mxu0 %v4689_v34  ;;  %v5856_v16 = vld [vmem:[#allocation2] sm:$0xff]  ;;  %v2875_v58 = vld [vmem:[#allocation6 + $0x10] sm:$0xff]  ;;  %v2876_v40 = vld [vmem:[#allocation6 + $0x18] sm:$0xff]  ;;  %v2216_v59 = vpack.c.bf16 %v5870_v57, %v5868_v11 }
 0x3f5   : > { %2749 = vmatpush.bf16.msra.mxu1 %v4661_v37  ;;  %v4691_v50 = vld [vmem:[%s6402_s8] sm:$0xff]  ;;  %v2215_v55 = vpack.c.bf16 %v5858_v43, %v5856_v16  ;;  %v4664_v48 = vld [vmem:[#allocation5 + $0x8] sm:$0xff]  ;;  %v2922_v60 = vpack.c.bf16 %v2876_v40, %v2875_v58  ;;  %v4665_v1 = vld [vmem:[#allocation5 + $0x10] sm:$0xff] }
 0x3f6   : > { %3054 = vmatpush.bf16.msra.mxu2 %v4693_v44  ;;  %v2873_v3 = vld [vmem:[#allocation6] sm:$0xff]  ;;  %v5879_v61 = vld [vmem:[#allocation2 + $0x28] sm:$0xff]  ;;  %v5886_v0 = vld [vmem:[#allocation2 + $0x30] sm:$0xff] }
 0x3f7   : > { %v4663_v22 = vld [vmem:[#allocation5] sm:$0xff]  ;;  %v2921_v56 = vpack.c.bf16 %v2874_v51, %v2873_v3  ;;  %v2878_v62 = vld [vmem:[#allocation6 + $0x28] sm:$0xff]  ;;  %v5888_v4 = vld [vmem:[#allocation2 + $0x38] sm:$0xff] }
 0x3f8   : > { %2525 = vmatpush.bf16.msra.mxu0 %v4688_v41  ;;  %v5877_v46 = vld [vmem:[#allocation2 + $0x20] sm:$0xff]  ;;  %v2879_v5 = vld [vmem:[#allocation6 + $0x30] sm:$0xff]  ;;  %v2880_v49 = vld [vmem:[#allocation6 + $0x38] sm:$0xff]  ;;  %v2218_v6 = vpack.c.bf16 %v5888_v4, %v5886_v0 }
 0x3f9   : > { %2750 = vmatpush.bf16.msra.mxu1 %v4660_v42  ;;  %v2877_v53 = vld [vmem:[#allocation6 + $0x20] sm:$0xff]  ;;  %v2217_v19 = vpack.c.bf16 %v5879_v61, %v5877_v46  ;;  %v4666_v14 = vld [vmem:[#allocation5 + $0x18] sm:$0xff]  ;;  %v2924_v7 = vpack.c.bf16 %v2880_v49, %v2879_v5  ;;  %v5897_v8 = vld [vmem:[#allocation2 + $0x48] sm:$0xff] }
 0x3fa   : > { %3055 = vmatpush.bf16.msra.mxu2 %v4692_v52  ;;  %v2923_v2 = vpack.c.bf16 %v2878_v62, %v2877_v53  ;;  %v5895_v12 = vld [vmem:[#allocation2 + $0x40] sm:$0xff]  ;;  %v2882_v29 = vld [vmem:[#allocation6 + $0x48] sm:$0xff]  ;;  %v5904_v17 = vld [vmem:[#allocation2 + $0x50] sm:$0xff] }
 0x3fb   : > { %v2881_v9 = vld [vmem:[#allocation6 + $0x40] sm:$0xff]  ;;  %v2219_v13 = vpack.c.bf16 %v5897_v8, %v5895_v12  ;;  %v5906_v36 = vld [vmem:[#allocation2 + $0x58] sm:$0xff]  ;;  %v2883_v23 = vld [vmem:[#allocation6 + $0x50] sm:$0xff] }
 0x3fc   : > { %2526 = vmatpush.bf16.msra.mxu0 %v4687_v45  ;;  %v4667_v10 = vld [vmem:[#allocation5 + $0x20] sm:$0xff]  ;;  %v2925_v15 = vpack.c.bf16 %v2882_v29, %v2881_v9  ;;  %v2884_v18 = vld [vmem:[#allocation6 + $0x58] sm:$0xff]  ;;  %v4668_v20 = vld [vmem:[#allocation5 + $0x28] sm:$0xff]  ;;  %v2220_v21 = vpack.c.bf16 %v5906_v36, %v5904_v17 }
 0x3fd   : > { %2751 = vmatpush.bf16.msra.mxu1 %v4659_v47  ;;  %v2926_v35 = vpack.c.bf16 %v2884_v18, %v2883_v23  ;;  %v5913_v24 = vld [vmem:[#allocation2 + $0x60] sm:$0xff]  ;;  %v5915_v25 = vld [vmem:[#allocation2 + $0x68] sm:$0xff]  ;;  %v4669_v27 = vld [vmem:[#allocation5 + $0x30] sm:$0xff] }
 0x3fe   : > { %3056 = vmatpush.bf16.msra.mxu2 %v4691_v50  ;;  %v2885_v63 = vld [vmem:[#allocation6 + $0x60] sm:$0xff]  ;;  %v2886_v26 = vld [vmem:[#allocation6 + $0x68] sm:$0xff]  ;;  %v2221_v28 = vpack.c.bf16 %v5915_v25, %v5913_v24  ;;  %v4698_v38 = vld [vmem:[%s6404_s10 + $0x18] sm:$0xff] }
 0x3ff   : > { %4430 = vmatmul.msk.bf16.vlgmr.msra.gmra.mxu0 %vm2114_vm4, %v4663_v22  ;;  %v2927_v54 = vpack.c.bf16 %v2886_v26, %v2885_v63  ;;  %3462 = vmatpush.bf16.msra.mxu3 %v4698_v38  ;;  %v4697_v30 = vld [vmem:[%s6404_s10 + $0x10] sm:$0xff]  ;;  %v5930_v32 = vld [vmem:[#allocation2 + $0x78] sm:$0xff]  ;;  %v4696_v44 = vld [vmem:[%s6404_s10 + $0x8] sm:$0xff] }
 0x400   : > { %4470 = vmatmul.msk.bf16.vlgmr.msra.gmra.mxu1 %vm2114_vm4, %v2215_v55  ;;  %v5928_v31 = vld [vmem:[#allocation2 + $0x70] sm:$0xff]  ;;  %v2888_v33 = vld [vmem:[#allocation6 + $0x78] sm:$0xff]  ;;  %v4695_v42 = vld [vmem:[%s6404_s10] sm:$0xff] }
 0x401   : > { %4510 = vmatmul.msk.bf16.vlgmr.msra.gmra.mxu2 %vm2114_vm4, %v2921_v56  ;;  %v2887_v39 = vld [vmem:[#allocation6 + $0x70] sm:$0xff]  ;;  %v4670_v34 = vld [vmem:[#allocation5 + $0x38] sm:$0xff]  ;;  %v2222_v37 = vpack.c.bf16 %v5930_v32, %v5928_v31  ;;  %v5943_v52 = vld [vmem:[#allocation2 + $0x80] sm:$0xff] }
 0x402   : > { %v2928_v41 = vpack.c.bf16 %v2888_v33, %v2887_v39  ;;  %v2184_v45 = vld [vmem:[#allocation2 + $0x88] sm:$0xff]  ;;  %v2889_v47 = vld [vmem:[#allocation6 + $0x80] sm:$0xff]  ;;  %v2185_v62 = vld [vmem:[#allocation2 + $0x90] sm:$0xff] }
 0x403   : > { %3463 = vmatpush.bf16.msra.mxu3 %v4697_v30  ;;  %v2890_v50 = vld [vmem:[#allocation6 + $0x88] sm:$0xff]  ;;  %v4671_v3 = vld [vmem:[#allocation5 + $0x40] sm:$0xff]  ;;  %v2223_v51 = vpack.c.bf16 %v2184_v45, %v5943_v52 }
 0x404   : > { %v2929_v56 = vpack.c.bf16 %v2890_v50, %v2889_v47  ;;  %v5952_v53 = vld [vmem:[%s6403_s9] ss:$0 sm:$0xff]  ;;  %v2894_v30 = vld [vmem:[#allocation6 + $0xa8] sm:$0xff] }
 0x405   : > { %v2893_v38 = vld [vmem:[#allocation6 + $0xa0] sm:$0xff] }
 0x406   : > { %v2931_v47 = vpack.c.bf16 %v2894_v30, %v2893_v38 }
 0x407   : > { %3464 = vmatpush.bf16.msra.mxu3 %v4696_v44 }
 0x40b   : > { %3465 = vmatpush.bf16.msra.mxu3 %v4695_v42 }
 0x40f   : > { %4431 = vmatmul.msk.bf16.gmra.mxu0 %vm2114_vm4, %v4664_v48 }
 0x410   : > { %4471 = vmatmul.msk.bf16.gmra.mxu1 %vm2114_vm4, %v2216_v59 }
 0x411   : > { %4511 = vmatmul.msk.bf16.gmra.mxu2 %vm2114_vm4, %v2922_v60 }
 0x41f   : > { %4432 = vmatmul.msk.bf16.gmra.mxu0 %vm2114_vm4, %v4665_v1  ;;  %v2186_v1 = vld [vmem:[#allocation2 + $0x98] sm:$0xff] }
 0x420   : > { %4472 = vmatmul.msk.bf16.gmra.mxu1 %vm2114_vm4, %v2217_v19  ;;  %v2891_v19 = vld [vmem:[#allocation6 + $0x90] sm:$0xff] }
 0x421   : > { %4512 = vmatmul.msk.bf16.gmra.mxu2 %vm2114_vm4, %v2923_v2  ;;  %v2892_v2 = vld [vmem:[#allocation6 + $0x98] sm:$0xff] }
 0x42f   : > { %4433 = vmatmul.msk.bf16.gmra.mxu0 %vm2114_vm4, %v4666_v14  ;;  %v4672_v14 = vld [vmem:[#allocation5 + $0x48] sm:$0xff] }
 0x430   : > { %4473 = vmatmul.msk.bf16.gmra.mxu1 %vm2114_vm4, %v2218_v6  ;;  %v2224_v6 = vpack.c.bf16 %v2186_v1, %v2185_v62  ;;  %v2895_v62 = vld [vmem:[#allocation6 + $0xb0] sm:$0xff]  ;;  %v2896_v1 = vld [vmem:[#allocation6 + $0xb8] sm:$0xff] }
 0x431   : > { %4513 = vmatmul.msk.bf16.gmra.mxu2 %vm2114_vm4, %v2924_v7 }
 0x43f   : > { %4434 = vmatmul.msk.bf16.gmra.mxu0 %vm2114_vm4, %v4667_v10 }
 0x440   : > { %4474 = vmatmul.msk.bf16.gmra.mxu1 %vm2114_vm4, %v2219_v13  ;;  %v2930_v13 = vpack.c.bf16 %v2892_v2, %v2891_v19 }
 0x441   : > { %4514 = vmatmul.msk.bf16.gmra.mxu2 %vm2114_vm4, %v2925_v15 }
 0x44f   : > { %4435 = vmatmul.msk.bf16.gmra.mxu0 %vm2114_vm4, %v4668_v20 }
 0x450   : > { %4475 = vmatmul.msk.bf16.gmra.mxu1 %vm2114_vm4, %v2220_v21 }
 0x451   : > { %4515 = vmatmul.msk.bf16.gmra.mxu2 %vm2114_vm4, %v2926_v35 }
 0x45f   : > { %4436 = vmatmul.msk.bf16.gmra.mxu0 %vm2114_vm4, %v4669_v27 }
 0x460   : > { %4476 = vmatmul.msk.bf16.gmra.mxu1 %vm2114_vm4, %v2221_v28  ;;  %v2187_v28 = vld [vmem:[#allocation2 + $0xa0] sm:$0xff] }
 0x461   : > { %4516 = vmatmul.msk.bf16.gmra.mxu2 %vm2114_vm4, %v2927_v54  ;;  %v2188_v54 = vld [vmem:[#allocation2 + $0xa8] sm:$0xff] }
 0x46f   : > { %4437 = vmatmul.msk.bf16.gmra.mxu0 %vm2114_vm4, %v4670_v34  ;;  %v4673_v34 = vld [vmem:[#allocation5 + $0x50] sm:$0xff] }
 0x470   : > { %4477 = vmatmul.msk.bf16.gmra.mxu1 %vm2114_vm4, %v2222_v37  ;;  %v2225_v37 = vpack.c.bf16 %v2188_v54, %v2187_v28  ;;  %v2897_v28 = vld [vmem:[#allocation6 + $0xc0] sm:$0xff]  ;;  %v2898_v54 = vld [vmem:[#allocation6 + $0xc8] sm:$0xff] }
 0x471   : > { %4517 = vmatmul.msk.bf16.gmra.mxu2 %vm2114_vm4, %v2928_v41 }
 0x47c   : > { %v2528_v22 = vpop.f32.mrf.mxu0 }
 0x47d   : > { %v2753_v55 = vpop.f32.mrf.mxu1 }
 0x47e   : > { %v2754_v40 = vadd.f32 %v2753_v55, %v2528_v22 }
 0x47f   : > { %4438 = vmatmul.msk.bf16.gmra.mxu0 %vm2114_vm4, %v4671_v3 }
 0x480   : > { %4478 = vmatmul.msk.bf16.gmra.mxu1 %vm2114_vm4, %v2223_v51 }
 0x481   : > { %4518 = vmatmul.msk.bf16.gmra.mxu2 %vm2114_vm4, %v2929_v56 }
 0x484   : > { %v3058_v58 = vpop.f32.mrf.mxu2  ;;  %v2530_v48 = vpop.f32.mrf.mxu0 }
 0x485   : > { %v2755_v59 = vpop.f32.mrf.mxu1  ;;  %v3178_v60 = vadd.f32 %v3058_v58, %v2754_v40 }
 0x486   : > { %v2756_v5 = vadd.f32 %v2755_v59, %v2530_v48  ;;  %v5966_v59 = vld [vmem:[#allocation2 + $0xb0] sm:$0xff] }
 0x487   : > { %v3230_v7 = vadd.f32 %v5952_v53, %v3178_v60  ;;  %v2190_v60 = vld [vmem:[#allocation2 + $0xb8] sm:$0xff] }
 0x489   : > { %v3278_v23 = vmax.f32 %v3230_v7, 0.0 }
 0x48c   : > { %v3060_v49 = vpop.f32.mrf.mxu2  ;;  %v2533_v29 = vpop.f32.mrf.mxu0 }
 0x48d   : > { %v3179_v9 = vadd.f32 %v3060_v49, %v2756_v5  ;;  %v2758_v10 = vpop.f32.mrf.mxu1  ;;  %v4674_v5 = vld [vmem:[#allocation5 + $0x58] sm:$0xff]  ;;  %v2226_v49 = vpack.c.bf16 %v2190_v60, %v5966_v59  ;;  %v2899_v60 = vld [vmem:[#allocation6 + $0xd0] sm:$0xff] }
 0x48e   : > { %v2759_v35 = vadd.f32 %v2758_v10, %v2533_v29  ;;  %v2932_v29 = vpack.c.bf16 %v2896_v1, %v2895_v62  ;;  %v2900_v62 = vld [vmem:[#allocation6 + $0xd8] sm:$0xff] }
 0x48f   : > { %v3231_v15 = vadd.f32 %v5952_v53, %v3179_v9  ;;  %4439 = vmatmul.msk.bf16.gmra.mxu0 %vm2114_vm4, %v4672_v14 }
 0x490   : > { %4479 = vmatmul.msk.bf16.gmra.mxu1 %vm2114_vm4, %v2224_v6 }
 0x491   : > { %4519 = vmatmul.msk.bf16.gmra.mxu2 %vm2114_vm4, %v2930_v13  ;;  %v3279_v18 = vmax.f32 %v3231_v15, 0.0 }
 0x493   : > { %v3326_v20 = vpack.c.bf16 %v3279_v18, %v3278_v23 }
 0x494   : > { %v3063_v21 = vpop.f32.mrf.mxu2  ;;  %v2535_v63 = vpop.f32.mrf.mxu0 }
 0x495   : > { %4550 = vmatmul.msk.bf16.vlgmr.msra.gmra.mxu3 %vm2114_vm4, %v3326_v20  ;;  %v2760_v26 = vpop.f32.mrf.mxu1  ;;  %v3180_v27 = vadd.f32 %v3063_v21, %v2759_v35 }
 0x496   : > { %v2761_v39 = vadd.f32 %v2760_v26, %v2535_v63  ;;  %v5975_v26 = vld [vmem:[#allocation2 + $0xc0] sm:$0xff] }
 0x497   : > { %v3232_v44 = vadd.f32 %v5952_v53, %v3180_v27  ;;  %v2192_v27 = vld [vmem:[#allocation2 + $0xc8] sm:$0xff] }
 0x499   : > { %v3280_v3 = vmax.f32 %v3232_v44, 0.0 }
 0x49c   : > { %v3065_v33 = vpop.f32.mrf.mxu2  ;;  %v2538_v42 = vpop.f32.mrf.mxu0 }
 0x49d   : > { %v3181_v41 = vadd.f32 %v3065_v33, %v2761_v39  ;;  %v2763_v45 = vpop.f32.mrf.mxu1  ;;  %v4675_v39 = vld [vmem:[#allocation5 + $0x60] sm:$0xff]  ;;  %v2227_v33 = vpack.c.bf16 %v2192_v27, %v5975_v26  ;;  %v2196_v27 = vld [vmem:[#allocation2 + $0xe8] sm:$0xff] }
 0x49e   : > { %v2764_v56 = vadd.f32 %v2763_v45, %v2538_v42  ;;  %v2933_v42 = vpack.c.bf16 %v2898_v54, %v2897_v28  ;;  %v2901_v28 = vld [vmem:[#allocation6 + $0xe0] sm:$0xff]  ;;  %v2902_v54 = vld [vmem:[#allocation6 + $0xe8] sm:$0xff] }
 0x49f   : > { %v3233_v50 = vadd.f32 %v5952_v53, %v3181_v41  ;;  %4440 = vmatmul.msk.bf16.gmra.mxu0 %vm2114_vm4, %v4673_v34 }
 0x4a0   : > { %4480 = vmatmul.msk.bf16.gmra.mxu1 %vm2114_vm4, %v2225_v37 }
 0x4a1   : > { %4520 = vmatmul.msk.bf16.gmra.mxu2 %vm2114_vm4, %v2931_v47  ;;  %v3281_v51 = vmax.f32 %v3233_v50, 0.0 }
 0x4a3   : > { %v3327_v22 = vpack.c.bf16 %v3281_v51, %v3280_v3 }
 0x4a4   : > { %v3068_v55 = vpop.f32.mrf.mxu2  ;;  %v2540_v58 = vpop.f32.mrf.mxu0 }
 0x4a5   : > { %4551 = vmatmul.msk.bf16.gmra.mxu3 %vm2114_vm4, %v3327_v22  ;;  %v2765_v40 = vpop.f32.mrf.mxu1  ;;  %v3182_v48 = vadd.f32 %v3068_v55, %v2764_v56 }
 0x4a6   : > { %v2766_v19 = vadd.f32 %v2765_v40, %v2540_v58  ;;  %v5984_v40 = vld [vmem:[#allocation2 + $0xd0] sm:$0xff] }
 0x4a7   : > { %v3234_v14 = vadd.f32 %v5952_v53, %v3182_v48  ;;  %v2194_v48 = vld [vmem:[#allocation2 + $0xd8] sm:$0xff] }
 0x4a9   : > { %v3282_v13 = vmax.f32 %v3234_v14, 0.0 }
 0x4ac   : > { %v3070_v2 = vpop.f32.mrf.mxu2  ;;  %v2543_v7 = vpop.f32.mrf.mxu0 }
 0x4ad   : > { %v3183_v6 = vadd.f32 %v3070_v2, %v2766_v19  ;;  %v2768_v9 = vpop.f32.mrf.mxu1  ;;  %v4676_v2 = vld [vmem:[#allocation5 + $0x68] sm:$0xff] }
 0x4ae   : > { %v2769_v20 = vadd.f32 %v2768_v9, %v2543_v7  ;;  %v2934_v9 = vpack.c.bf16 %v2900_v62, %v2899_v60  ;;  %v6004_v60 = vld [vmem:[#allocation2 + $0xf8] sm:$0xff]  ;;  %v2903_v62 = vld [vmem:[#allocation6 + $0xf0] sm:$0xff] }
 0x4af   : > { %v3235_v10 = vadd.f32 %v5952_v53, %v3183_v6  ;;  %4441 = vmatmul.msk.bf16.gmra.mxu0 %vm2114_vm4, %v4674_v5  ;;  %v2228_v5 = vpack.c.bf16 %v2194_v48, %v5984_v40  ;;  %v6002_v48 = vld [vmem:[#allocation2 + $0xf0] sm:$0xff] }
 0x4b0   : > { %4481 = vmatmul.msk.bf16.gmra.mxu1 %vm2114_vm4, %v2226_v49 }
 0x4b1   : > { %4521 = vmatmul.msk.bf16.gmra.mxu2 %vm2114_vm4, %v2932_v29  ;;  %v3283_v15 = vmax.f32 %v3235_v10, 0.0 }
 0x4b3   : > { %v3328_v23 = vpack.c.bf16 %v3283_v15, %v3282_v13 }
 0x4b4   : > { %v3073_v18 = vpop.f32.mrf.mxu2  ;;  %v2545_v21 = vpop.f32.mrf.mxu0 }
 0x4b5   : > { %4552 = vmatmul.msk.bf16.gmra.mxu3 %vm2114_vm4, %v3328_v23  ;;  %v2770_v35 = vpop.f32.mrf.mxu1  ;;  %v3184_v63 = vadd.f32 %v3073_v18, %v2769_v20 }
 0x4b6   : > { %v2771_v38 = vadd.f32 %v2770_v35, %v2545_v21 }
 0x4b7   : > { %v3236_v34 = vadd.f32 %v5952_v53, %v3184_v63  ;;  %v5993_v63 = vld [vmem:[#allocation2 + $0xe0] sm:$0xff] }
 0x4b9   : > { %v3284_v47 = vmax.f32 %v3236_v34, 0.0 }
 0x4bc   : > { %v3075_v30 = vpop.f32.mrf.mxu2  ;;  %v2548_v44 = vpop.f32.mrf.mxu0 }
 0x4bd   : > { %v3185_v37 = vadd.f32 %v3075_v30, %v2771_v38  ;;  %v2773_v41 = vpop.f32.mrf.mxu1 }
 0x4be   : > { %v2774_v22 = vadd.f32 %v2773_v41, %v2548_v44 }
 0x4bf   : > { %v3237_v45 = vadd.f32 %v5952_v53, %v3185_v37  ;;  %4442 = vmatmul.msk.bf16.gmra.mxu0 %vm2114_vm4, %v4675_v39  ;;  %v4677_v39 = vld [vmem:[#allocation5 + $0x70] sm:$0xff] }
 0x4c0   : > { %4482 = vmatmul.msk.bf16.gmra.mxu1 %vm2114_vm4, %v2227_v33  ;;  %v2229_v33 = vpack.c.bf16 %v2196_v27, %v5993_v63 }
 0x4c1   : > { %4522 = vmatmul.msk.bf16.gmra.mxu2 %vm2114_vm4, %v2933_v42  ;;  %v3285_v50 = vmax.f32 %v3237_v45, 0.0  ;;  %v2935_v42 = vpack.c.bf16 %v2902_v54, %v2901_v28  ;;  %v6014_v28 = vld [vmem:[#allocation2 + $0x100] sm:$0xff]  ;;  %v6016_v54 = vld [vmem:[#allocation2 + $0x108] sm:$0xff] }
 0x4c3   : > { %v3329_v3 = vpack.c.bf16 %v3285_v50, %v3284_v47 }
 0x4c4   : > { %v3078_v51 = vpop.f32.mrf.mxu2  ;;  %v2550_v55 = vpop.f32.mrf.mxu0 }
 0x4c5   : > { %4553 = vmatmul.msk.bf16.gmra.mxu3 %vm2114_vm4, %v3329_v3  ;;  %v2775_v56 = vpop.f32.mrf.mxu1  ;;  %v3186_v58 = vadd.f32 %v3078_v51, %v2774_v22 }
 0x4c6   : > { %v2776_v1 = vadd.f32 %v2775_v56, %v2550_v55 }
 0x4c7   : > { %v3238_v49 = vadd.f32 %v5952_v53, %v3186_v58 }
 0x4c9   : > { %v3286_v10 = vmax.f32 %v3238_v49, 0.0  ;;  %v2230_v49 = vpack.c.bf16 %v6004_v60, %v6002_v48 }
 0x4cc   : > { %v3080_v19 = vpop.f32.mrf.mxu2  ;;  %v2553_v6 = vpop.f32.mrf.mxu0 }
 0x4cd   : > { %v3187_v14 = vadd.f32 %v3080_v19, %v2776_v1  ;;  %v2778_v7 = vpop.f32.mrf.mxu1  ;;  %v2904_v1 = vld [vmem:[#allocation6 + $0xf8] sm:$0xff] }
 0x4ce   : > { %v2779_v18 = vadd.f32 %v2778_v7, %v2553_v6 }
 0x4cf   : > { %v3239_v29 = vadd.f32 %v5952_v53, %v3187_v14  ;;  %4443 = vmatmul.msk.bf16.gmra.mxu0 %vm2114_vm4, %v4676_v2 }
 0x4d0   : > { %4483 = vmatmul.msk.bf16.gmra.mxu1 %vm2114_vm4, %v2228_v5  ;;  %v4678_v5 = vld [vmem:[#allocation5 + $0x78] sm:$0xff] }
 0x4d1   : > { %4523 = vmatmul.msk.bf16.gmra.mxu2 %vm2114_vm4, %v2934_v9  ;;  %v3287_v13 = vmax.f32 %v3239_v29, 0.0  ;;  %v2936_v29 = vpack.c.bf16 %v2904_v1, %v2903_v62 }
 0x4d3   : > { %v3330_v15 = vpack.c.bf16 %v3287_v13, %v3286_v10 }
 0x4d4   : > { %v3083_v23 = vpop.f32.mrf.mxu2  ;;  %v2555_v20 = vpop.f32.mrf.mxu0 }
 0x4d5   : > { %4554 = vmatmul.msk.bf16.gmra.mxu3 %vm2114_vm4, %v3330_v15  ;;  %v2780_v21 = vpop.f32.mrf.mxu1  ;;  %v3188_v35 = vadd.f32 %v3083_v23, %v2779_v18 }
 0x4d6   : > { %v2781_v38 = vadd.f32 %v2780_v21, %v2555_v20 }
 0x4d7   : > { %v3240_v34 = vadd.f32 %v5952_v53, %v3188_v35 }
 0x4d9   : > { %v3288_v47 = vmax.f32 %v3240_v34, 0.0  ;;  %v4679_v34 = vld [vmem:[#allocation5 + $0x80] sm:$0xff] }
 0x4dc   : > { %v3085_v30 = vpop.f32.mrf.mxu2  ;;  %v2558_v44 = vpop.f32.mrf.mxu0 }
 0x4dd   : > { %v3189_v37 = vadd.f32 %v3085_v30, %v2781_v38  ;;  %v2783_v41 = vpop.f32.mrf.mxu1  ;;  %v2905_v38 = vld [vmem:[#allocation6 + $0x100] sm:$0xff]  ;;  %v2906_v30 = vld [vmem:[#allocation6 + $0x108] sm:$0xff] }
 0x4de   : > { %v2784_v22 = vadd.f32 %v2783_v41, %v2558_v44 }
 0x4df   : > { %v3241_v45 = vadd.f32 %v5952_v53, %v3189_v37  ;;  %4444 = vmatmul.msk.bf16.gmra.mxu0 %vm2114_vm4, %v4677_v39  ;;  %v2231_v37 = vpack.c.bf16 %v6016_v54, %v6014_v28 }
 0x4e0   : > { %4484 = vmatmul.msk.bf16.gmra.mxu1 %vm2114_vm4, %v2229_v33 }
 0x4e1   : > { %4524 = vmatmul.msk.bf16.gmra.mxu2 %vm2114_vm4, %v2935_v42  ;;  %v3289_v50 = vmax.f32 %v3241_v45, 0.0 }
 0x4e3   : > { %v3331_v3 = vpack.c.bf16 %v3289_v50, %v3288_v47  ;;  %v2937_v47 = vpack.c.bf16 %v2906_v30, %v2905_v38 }
 0x4e4   : > { %v3088_v51 = vpop.f32.mrf.mxu2  ;;  %v2560_v55 = vpop.f32.mrf.mxu0 }
 0x4e5   : > { %4555 = vmatmul.msk.bf16.gmra.mxu3 %vm2114_vm4, %v3331_v3  ;;  %v2785_v56 = vpop.f32.mrf.mxu1  ;;  %v3190_v58 = vadd.f32 %v3088_v51, %v2784_v22 }
 0x4e6   : > { %v2786_v19 = vadd.f32 %v2785_v56, %v2560_v55 }
 0x4e7   : > { %v3242_v14 = vadd.f32 %v5952_v53, %v3190_v58 }
 0x4e9   : > { %v3290_v13 = vmax.f32 %v3242_v14, 0.0 }
 0x4ec   : > { %v3090_v2 = vpop.f32.mrf.mxu2  ;;  %v2563_v7 = vpop.f32.mrf.mxu0 }
 0x4ed   : > { %v3191_v6 = vadd.f32 %v3090_v2, %v2786_v19  ;;  %v2788_v9 = vpop.f32.mrf.mxu1  ;;  %v6026_v19 = vld [vmem:[#allocation2 + $0x110] sm:$0xff]  ;;  %v6028_v2 = vld [vmem:[#allocation2 + $0x118] sm:$0xff] }
 0x4ee   : > { %v2789_v20 = vadd.f32 %v2788_v9, %v2563_v7  ;;  %v4680_v7 = vld [vmem:[#allocation5 + $0x88] sm:$0xff]  ;;  %v2232_v9 = vpack.c.bf16 %v6028_v2, %v6026_v19 }
 0x4ef   : > { %v3243_v10 = vadd.f32 %v5952_v53, %v3191_v6  ;;  %4445 = vmatmul.msk.bf16.gmra.mxu0 %vm2114_vm4, %v4678_v5  ;;  %v2907_v5 = vld [vmem:[#allocation6 + $0x110] sm:$0xff] }
 0x4f0   : > { %4485 = vmatmul.msk.bf16.gmra.mxu1 %vm2114_vm4, %v2230_v49  ;;  %v2908_v49 = vld [vmem:[#allocation6 + $0x118] sm:$0xff] }
 0x4f1   : > { %4525 = vmatmul.msk.bf16.gmra.mxu2 %vm2114_vm4, %v2936_v29  ;;  %v3291_v15 = vmax.f32 %v3243_v10, 0.0 }
 0x4f3   : > { %v3332_v23 = vpack.c.bf16 %v3291_v15, %v3290_v13 }
 0x4f4   : > { %v3093_v18 = vpop.f32.mrf.mxu2  ;;  %v2565_v21 = vpop.f32.mrf.mxu0 }
 0x4f5   : > { %4556 = vmatmul.msk.bf16.gmra.mxu3 %vm2114_vm4, %v3332_v23  ;;  %v2790_v35 = vpop.f32.mrf.mxu1  ;;  %v3192_v27 = vadd.f32 %v3093_v18, %v2789_v20  ;;  %v2938_v23 = vpack.c.bf16 %v2908_v49, %v2907_v5 }
 0x4f6   : > { %v2791_v39 = vadd.f32 %v2790_v35, %v2565_v21 }
 0x4f7   : > { %v3244_v44 = vadd.f32 %v5952_v53, %v3192_v27 }
 0x4f9   : > { %v3292_v3 = vmax.f32 %v3244_v44, 0.0 }
 0x4fc   : > { %v3095_v33 = vpop.f32.mrf.mxu2  ;;  %v2568_v42 = vpop.f32.mrf.mxu0 }
 0x4fd   : > { %v3193_v41 = vadd.f32 %v3095_v33, %v2791_v39  ;;  %v2793_v45 = vpop.f32.mrf.mxu1  ;;  %v6041_v33 = vld [vmem:[%s6405_s11] ss:$0 sm:$0xff] }
 0x4fe   : > { %v2794_v56 = vadd.f32 %v2793_v45, %v2568_v42  ;;  %v6046_v42 = vld [vmem:[#allocation2 + $0x128] sm:$0xff]  ;;  %v2909_v45 = vld [vmem:[#allocation6 + $0x120] sm:$0xff] }
 0x4ff   : > { %v3245_v50 = vadd.f32 %v5952_v53, %v3193_v41  ;;  %4446 = vmatmul.msk.bf16.gmra.mxu0 %vm2114_vm4, %v4679_v34  ;;  %v6044_v41 = vld [vmem:[#allocation2 + $0x120] sm:$0xff] }
 0x500   : > { %4486 = vmatmul.msk.bf16.gmra.mxu1 %vm2114_vm4, %v2231_v37 }
 0x501   : > { %4526 = vmatmul.msk.bf16.gmra.mxu2 %vm2114_vm4, %v2937_v47  ;;  %v3293_v51 = vmax.f32 %v3245_v50, 0.0  ;;  %v2910_v47 = vld [vmem:[#allocation6 + $0x128] sm:$0xff] }
 0x502   : > { %v2939_v5 = vpack.c.bf16 %v2910_v47, %v2909_v45 }
 0x503   : > { %v3333_v22 = vpack.c.bf16 %v3293_v51, %v3292_v3 }
 0x504   : > { %v3098_v55 = vpop.f32.mrf.mxu2  ;;  %v2570_v58 = vpop.f32.mrf.mxu0 }
 0x505   : > { %4557 = vmatmul.msk.bf16.gmra.mxu3 %vm2114_vm4, %v3333_v22  ;;  %v2795_v62 = vpop.f32.mrf.mxu1  ;;  %v3194_v1 = vadd.f32 %v3098_v55, %v2794_v56  ;;  %v4681_v22 = vld [vmem:[#allocation5 + $0x90] sm:$0xff]  ;;  %v2233_v55 = vpack.c.bf16 %v6046_v42, %v6044_v41 }
 0x506   : > { %v2796_v14 = vadd.f32 %v2795_v62, %v2570_v58 }
 0x507   : > { %v3246_v29 = vadd.f32 %v5952_v53, %v3194_v1 }
 0x509   : > { %v3294_v20 = vmax.f32 %v3246_v29, 0.0 }
 0x50c   : > { %v3100_v6 = vpop.f32.mrf.mxu2  ;;  %v2573_v13 = vpop.f32.mrf.mxu0 }
 0x50d   : > { %v3195_v10 = vadd.f32 %v3100_v6, %v2796_v14  ;;  %v2798_v15 = vpop.f32.mrf.mxu1 }
 0x50e   : > { %v2799_v38 = vadd.f32 %v2798_v15, %v2573_v13 }
 0x50f   : > { %v3247_v18 = vadd.f32 %v5952_v53, %v3195_v10  ;;  %4447 = vmatmul.msk.bf16.gmra.mxu0 %vm2114_vm4, %v4680_v7 }
 0x510   : > { %4487 = vmatmul.msk.bf16.gmra.mxu1 %vm2114_vm4, %v2232_v9 }
 0x511   : > { %4527 = vmatmul.msk.bf16.gmra.mxu2 %vm2114_vm4, %v2938_v23  ;;  %v3295_v21 = vmax.f32 %v3247_v18, 0.0 }
 0x513   : > { %v3334_v35 = vpack.c.bf16 %v3295_v21, %v3294_v20 }
 0x514   : > { %v3103_v27 = vpop.f32.mrf.mxu2  ;;  %v2575_v30 = vpop.f32.mrf.mxu0 }
 0x515   : > { %4558 = vmatmul.msk.bf16.gmra.mxu3 %vm2114_vm4, %v3334_v35  ;;  %v2800_v39 = vpop.f32.mrf.mxu1  ;;  %v3196_v37 = vadd.f32 %v3103_v27, %v2799_v38  ;;  %v6062_v35 = vld [vmem:[#allocation2 + $0x130] sm:$0xff]  ;;  %v6064_v27 = vld [vmem:[#allocation2 + $0x138] sm:$0xff] }
 0x516   : > { %v2801_v50 = vadd.f32 %v2800_v39, %v2575_v30  ;;  %v2911_v38 = vld [vmem:[#allocation6 + $0x130] sm:$0xff]  ;;  %v2912_v30 = vld [vmem:[#allocation6 + $0x138] sm:$0xff] }
 0x517   : > { %v3248_v56 = vadd.f32 %v5952_v53, %v3196_v37  ;;  %v4682_v37 = vld [vmem:[#allocation5 + $0x98] sm:$0xff] }
 0x518   : > { %v3467_v34 = vpop.f32.mrf.mxu3 }
 0x519   : > { %v3468_v44 = vadd.f32 %v6041_v33, %v3467_v34 }
 0x51b   : > { %v3587_v3 = vadd.f32 %v3468_v44, %v5856_v16  ;;  %v3296_v16 = vmax.f32 %v3248_v56, 0.0  ;;  %v2234_v44 = vpack.c.bf16 %v6064_v27, %v6062_v35 }
 0x51c   : > { %v3105_v51 = vpop.f32.mrf.mxu2  ;;  %v2578_v62 = vpop.f32.mrf.mxu0 }
 0x51d   : > { %3635 = vst.msk [vmem:[#allocation2] sm:$0xff] %vm2114_vm4, %v3587_v3  ;;  %v3197_v58 = vadd.f32 %v3105_v51, %v2801_v50  ;;  %v2803_v1 = vpop.f32.mrf.mxu1  ;;  %v2940_v51 = vpack.c.bf16 %v2912_v30, %v2911_v38 }
 0x51e   : > { %v2804_v13 = vadd.f32 %v2803_v1, %v2578_v62 }
 0x51f   : > { %v3249_v49 = vadd.f32 %v5952_v53, %v3197_v58  ;;  %4448 = vmatmul.msk.bf16.gmra.mxu0 %vm2114_vm4, %v4681_v22 }
 0x520   : > { %v3469_v14 = vpop.f32.mrf.mxu3  ;;  %4488 = vmatmul.msk.bf16.gmra.mxu1 %vm2114_vm4, %v2233_v55 }
 0x521   : > { %v3470_v6 = vadd.f32 %v6041_v33, %v3469_v14  ;;  %4528 = vmatmul.msk.bf16.gmra.mxu2 %vm2114_vm4, %v2939_v5  ;;  %v3297_v7 = vmax.f32 %v3249_v49, 0.0 }
 0x523   : > { %v3588_v9 = vadd.f32 %v3470_v6, %v5858_v43  ;;  %v3335_v29 = vpack.c.bf16 %v3297_v7, %v3296_v16 }
 0x524   : > { %v3108_v10 = vpop.f32.mrf.mxu2  ;;  %v2580_v15 = vpop.f32.mrf.mxu0 }
 0x525   : > { %3636 = vst.msk [vmem:[#allocation2 + $0x8] sm:$0xff] %vm2114_vm4, %v3588_v9  ;;  %4559 = vmatmul.msk.bf16.gmra.mxu3 %vm2114_vm4, %v3335_v29  ;;  %v2805_v23 = vpop.f32.mrf.mxu1  ;;  %v3198_v20 = vadd.f32 %v3108_v10, %v2804_v13  ;;  %v6080_v29 = vld [vmem:[#allocation2 + $0x140] sm:$0xff]  ;;  %v6082_v10 = vld [vmem:[#allocation2 + $0x148] sm:$0xff] }
 0x526   : > { %v2806_v43 = vadd.f32 %v2805_v23, %v2580_v15  ;;  %v2913_v13 = vld [vmem:[#allocation6 + $0x140] sm:$0xff]  ;;  %v2914_v15 = vld [vmem:[#allocation6 + $0x148] sm:$0xff] }
 0x527   : > { %v3250_v45 = vadd.f32 %v5952_v53, %v3198_v20  ;;  %v4683_v20 = vld [vmem:[#allocation5 + $0xa0] sm:$0xff] }
 0x528   : > { %v3472_v18 = vpop.f32.mrf.mxu3 }
 0x529   : > { %v3473_v21 = vadd.f32 %v6041_v33, %v3472_v18 }
 0x52b   : > { %v3589_v39 = vadd.f32 %v3473_v21, %v5868_v11  ;;  %v3298_v11 = vmax.f32 %v3250_v45, 0.0  ;;  %v2235_v21 = vpack.c.bf16 %v6082_v10, %v6080_v29 }
 0x52c   : > { %v3110_v34 = vpop.f32.mrf.mxu2  ;;  %v2583_v50 = vpop.f32.mrf.mxu0 }
 0x52d   : > { %3637 = vst.msk [vmem:[#allocation2 + $0x10] sm:$0xff] %vm2114_vm4, %v3589_v39  ;;  %v3199_v47 = vadd.f32 %v3110_v34, %v2806_v43  ;;  %v2808_v3 = vpop.f32.mrf.mxu1  ;;  %v2941_v34 = vpack.c.bf16 %v2914_v15, %v2913_v13 }
 0x52e   : > { %v2809_v49 = vadd.f32 %v2808_v3, %v2583_v50 }
 0x52f   : > { %v3251_v22 = vadd.f32 %v5952_v53, %v3199_v47  ;;  %4449 = vmatmul.msk.bf16.gmra.mxu0 %vm2114_vm4, %v4682_v37 }
 0x530   : > { %v3474_v55 = vpop.f32.mrf.mxu3  ;;  %4489 = vmatmul.msk.bf16.gmra.mxu1 %vm2114_vm4, %v2234_v44 }
 0x531   : > { %v3475_v56 = vadd.f32 %v6041_v33, %v3474_v55  ;;  %4529 = vmatmul.msk.bf16.gmra.mxu2 %vm2114_vm4, %v2940_v51  ;;  %v3299_v58 = vmax.f32 %v3251_v22, 0.0 }
 0x533   : > { %v3590_v62 = vadd.f32 %v3475_v56, %v5870_v57  ;;  %v3336_v1 = vpack.c.bf16 %v3299_v58, %v3298_v11 }
 0x534   : > { %v3113_v5 = vpop.f32.mrf.mxu2  ;;  %v2585_v14 = vpop.f32.mrf.mxu0 }
 0x535   : > { %3638 = vst.msk [vmem:[#allocation2 + $0x18] sm:$0xff] %vm2114_vm4, %v3590_v62  ;;  %4560 = vmatmul.msk.bf16.gmra.mxu3 %vm2114_vm4, %v3336_v1  ;;  %v2810_v16 = vpop.f32.mrf.mxu1  ;;  %v3200_v7 = vadd.f32 %v3113_v5, %v2809_v49  ;;  %v6098_v1 = vld [vmem:[#allocation2 + $0x150] sm:$0xff]  ;;  %v6100_v5 = vld [vmem:[#allocation2 + $0x158] sm:$0xff] }
 0x536   : > { %v2811_v57 = vadd.f32 %v2810_v16, %v2585_v14  ;;  %v2915_v49 = vld [vmem:[#allocation6 + $0x150] sm:$0xff]  ;;  %v2916_v14 = vld [vmem:[#allocation6 + $0x158] sm:$0xff] }
 0x537   : > { %v3252_v38 = vadd.f32 %v5952_v53, %v3200_v7  ;;  %v4684_v7 = vld [vmem:[#allocation5 + $0xa8] sm:$0xff] }
 0x538   : > { %v3477_v6 = vpop.f32.mrf.mxu3 }
 0x539   : > { %v3478_v9 = vadd.f32 %v6041_v33, %v3477_v6 }
 0x53b   : > { %v3591_v23 = vadd.f32 %v3478_v9, %v5877_v46  ;;  %v3300_v46 = vmax.f32 %v3252_v38, 0.0  ;;  %v2236_v9 = vpack.c.bf16 %v6100_v5, %v6098_v1 }
 0x53c   : > { %v3115_v18 = vpop.f32.mrf.mxu2  ;;  %v2588_v43 = vpop.f32.mrf.mxu0 }
 0x53d   : > { %3639 = vst.msk [vmem:[#allocation2 + $0x20] sm:$0xff] %vm2114_vm4, %v3591_v23  ;;  %v3201_v30 = vadd.f32 %v3115_v18, %v2811_v57  ;;  %v2813_v39 = vpop.f32.mrf.mxu1  ;;  %v2942_v18 = vpack.c.bf16 %v2916_v14, %v2915_v49 }
 0x53e   : > { %v2814_v22 = vadd.f32 %v2813_v39, %v2588_v43 }
 0x53f   : > { %v3253_v37 = vadd.f32 %v5952_v53, %v3201_v30  ;;  %4450 = vmatmul.msk.bf16.gmra.mxu0 %vm2114_vm4, %v4683_v20 }
 0x540   : > { %v3479_v44 = vpop.f32.mrf.mxu3  ;;  %4490 = vmatmul.msk.bf16.gmra.mxu1 %vm2114_vm4, %v2235_v21 }
 0x541   : > { %v3480_v45 = vadd.f32 %v6041_v33, %v3479_v44  ;;  %4530 = vmatmul.msk.bf16.gmra.mxu2 %vm2114_vm4, %v2941_v34  ;;  %v3301_v47 = vmax.f32 %v3253_v37, 0.0 }
 0x543   : > { %v3592_v50 = vadd.f32 %v3480_v45, %v5879_v61  ;;  %v3337_v3 = vpack.c.bf16 %v3301_v47, %v3300_v46 }
 0x544   : > { %v3118_v51 = vpop.f32.mrf.mxu2  ;;  %v2590_v55 = vpop.f32.mrf.mxu0 }
 0x545   : > { %3640 = vst.msk [vmem:[#allocation2 + $0x28] sm:$0xff] %vm2114_vm4, %v3592_v50  ;;  %4561 = vmatmul.msk.bf16.gmra.mxu3 %vm2114_vm4, %v3337_v3  ;;  %v2815_v11 = vpop.f32.mrf.mxu1  ;;  %v3202_v58 = vadd.f32 %v3118_v51, %v2814_v22  ;;  %v6116_v3 = vld [vmem:[#allocation2 + $0x160] sm:$0xff]  ;;  %v6118_v51 = vld [vmem:[#allocation2 + $0x168] sm:$0xff] }
 0x546   : > { %v2816_v61 = vadd.f32 %v2815_v11, %v2590_v55  ;;  %v2917_v22 = vld [vmem:[#allocation6 + $0x160] sm:$0xff]  ;;  %v2918_v55 = vld [vmem:[#allocation6 + $0x168] sm:$0xff] }
 0x547   : > { %v3254_v13 = vadd.f32 %v5952_v53, %v3202_v58  ;;  %v4685_v58 = vld [vmem:[#allocation5 + $0xb0] sm:$0xff] }
 0x548   : > { %v3482_v56 = vpop.f32.mrf.mxu3 }
 0x549   : > { %v3483_v62 = vadd.f32 %v6041_v33, %v3482_v56 }
 0x54b   : > { %v3593_v16 = vadd.f32 %v3483_v62, %v5886_v0  ;;  %v3302_v0 = vmax.f32 %v3254_v13, 0.0  ;;  %v2237_v62 = vpack.c.bf16 %v6118_v51, %v6116_v3 }
 0x54c   : > { %v3120_v6 = vpop.f32.mrf.mxu2  ;;  %v2593_v57 = vpop.f32.mrf.mxu0 }
 0x54d   : > { %3641 = vst.msk [vmem:[#allocation2 + $0x30] sm:$0xff] %vm2114_vm4, %v3593_v16  ;;  %v3203_v15 = vadd.f32 %v3120_v6, %v2816_v61  ;;  %v2818_v23 = vpop.f32.mrf.mxu1  ;;  %v2943_v6 = vpack.c.bf16 %v2918_v55, %v2917_v22 }
 0x54e   : > { %v2819_v37 = vadd.f32 %v2818_v23, %v2593_v57 }
 0x54f   : > { %v3255_v20 = vadd.f32 %v5952_v53, %v3203_v15  ;;  %4451 = vmatmul.msk.bf16.gmra.mxu0 %vm2114_vm4, %v4684_v7 }
 0x550   : > { %v3484_v21 = vpop.f32.mrf.mxu3  ;;  %4491 = vmatmul.msk.bf16.gmra.mxu1 %vm2114_vm4, %v2236_v9 }
 0x551   : > { %v3303_v38 = vmax.f32 %v3255_v20, 0.0  ;;  %v3485_v30 = vadd.f32 %v6041_v33, %v3484_v21  ;;  %4531 = vmatmul.msk.bf16.gmra.mxu2 %vm2114_vm4, %v2942_v18 }
 0x553   : > { %v3594_v43 = vadd.f32 %v3485_v30, %v5888_v4  ;;  %v3338_v39 = vpack.c.bf16 %v3303_v38, %v3302_v0 }
 0x554   : > { %v3123_v34 = vpop.f32.mrf.mxu2  ;;  %v2595_v44 = vpop.f32.mrf.mxu0 }
 0x555   : > { %3642 = vst.msk [vmem:[#allocation2 + $0x38] sm:$0xff] %vm2114_vm4, %v3594_v43  ;;  %4562 = vmatmul.msk.bf16.gmra.mxu3 %vm2114_vm4, %v3338_v39  ;;  %v2820_v46 = vpop.f32.mrf.mxu1  ;;  %v3204_v47 = vadd.f32 %v3123_v34, %v2819_v37  ;;  %v6134_v39 = vld [vmem:[#allocation2 + $0x170] sm:$0xff]  ;;  %v6136_v34 = vld [vmem:[#allocation2 + $0x178] sm:$0xff] }
 0x556   : > { %v2821_v4 = vadd.f32 %v2820_v46, %v2595_v44  ;;  %v2919_v37 = vld [vmem:[#allocation6 + $0x170] sm:$0xff]  ;;  %v2920_v44 = vld [vmem:[#allocation6 + $0x178] sm:$0xff] }
 0x557   : > { %v3256_v49 = vadd.f32 %v5952_v53, %v3204_v47  ;;  %v4686_v47 = vld [vmem:[#allocation5 + $0xb8] sm:$0xff] }
 0x558   : > { %v3487_v45 = vpop.f32.mrf.mxu3 }
 0x559   : > { %v3488_v50 = vadd.f32 %v6041_v33, %v3487_v45 }
 0x55b   : > { %v3595_v11 = vadd.f32 %v3488_v50, %v5895_v12  ;;  %v3304_v12 = vmax.f32 %v3256_v49, 0.0  ;;  %v2238_v50 = vpack.c.bf16 %v6136_v34, %v6134_v39 }
 0x55c   : > { %v3125_v56 = vpop.f32.mrf.mxu2  ;;  %v2598_v61 = vpop.f32.mrf.mxu0 }
 0x55d   : > { %3643 = vst.msk [vmem:[#allocation2 + $0x40] sm:$0xff] %vm2114_vm4, %v3595_v11  ;;  %v3205_v14 = vadd.f32 %v3125_v56, %v2821_v4  ;;  %v2823_v16 = vpop.f32.mrf.mxu1  ;;  %v2944_v56 = vpack.c.bf16 %v2920_v44, %v2919_v37 }
 0x55e   : > { %v2824_v20 = vadd.f32 %v2823_v16, %v2598_v61 }
 0x55f   : > { %v3257_v7 = vadd.f32 %v5952_v53, %v3205_v14  ;;  %4452 = vmatmul.msk.bf16.gmra.mxu0 %vm2114_vm4, %v4685_v58 }
 0x560   : > { %v3489_v9 = vpop.f32.mrf.mxu3  ;;  %4492 = vmatmul.msk.bf16.gmra.mxu1 %vm2114_vm4, %v2237_v62 }
 0x561   : > { %v3305_v13 = vmax.f32 %v3257_v7, 0.0  ;;  %v3490_v15 = vadd.f32 %v6041_v33, %v3489_v9  ;;  %4532 = vmatmul.msk.bf16.gmra.mxu2 %vm2114_vm4, %v2943_v6 }
 0x563   : > { %v3596_v57 = vadd.f32 %v3490_v15, %v5897_v8  ;;  %v3339_v23 = vpack.c.bf16 %v3305_v13, %v3304_v12 }
 0x564   : > { %v3128_v18 = vpop.f32.mrf.mxu2  ;;  %v2600_v21 = vpop.f32.mrf.mxu0 }
 0x565   : > { %3644 = vst.msk [vmem:[#allocation2 + $0x48] sm:$0xff] %vm2114_vm4, %v3596_v57  ;;  %4563 = vmatmul.msk.bf16.gmra.mxu3 %vm2114_vm4, %v3339_v23  ;;  %v2825_v0 = vpop.f32.mrf.mxu1  ;;  %v3206_v30 = vadd.f32 %v3128_v18, %v2824_v20 }
 0x566   : > { %v2826_v8 = vadd.f32 %v2825_v0, %v2600_v21 }
 0x567   : > { %v3258_v22 = vadd.f32 %v5952_v53, %v3206_v30 }
 0x568   : > { %v3492_v38 = vpop.f32.mrf.mxu3 }
 0x569   : > { %v3493_v43 = vadd.f32 %v6041_v33, %v3492_v38 }
 0x56b   : > { %v3597_v46 = vadd.f32 %v3493_v43, %v5904_v17  ;;  %v3306_v17 = vmax.f32 %v3258_v22, 0.0 }
 0x56c   : > { %v3130_v45 = vpop.f32.mrf.mxu2  ;;  %v2603_v4 = vpop.f32.mrf.mxu0 }
 0x56d   : > { %3645 = vst.msk [vmem:[#allocation2 + $0x50] sm:$0xff] %vm2114_vm4, %v3597_v46  ;;  %v3207_v55 = vadd.f32 %v3130_v45, %v2826_v8  ;;  %v2828_v11 = vpop.f32.mrf.mxu1 }
 0x56e   : > { %v2829_v7 = vadd.f32 %v2828_v11, %v2603_v4 }
 0x56f   : > { %v3259_v58 = vadd.f32 %v5952_v53, %v3207_v55  ;;  %4453 = vmatmul.msk.bf16.gmra.mxu0 %vm2114_vm4, %v4686_v47 }
 0x570   : > { %v3494_v62 = vpop.f32.mrf.mxu3  ;;  %4493 = vmatmul.msk.bf16.gmra.mxu1 %vm2114_vm4, %v2238_v50 }
 0x571   : > { %v3307_v49 = vmax.f32 %v3259_v58, 0.0  ;;  %v3495_v14 = vadd.f32 %v6041_v33, %v3494_v62  ;;  %4533 = vmatmul.msk.bf16.gmra.mxu2 %vm2114_vm4, %v2944_v56 }
 0x573   : > { %v3598_v61 = vadd.f32 %v3495_v14, %v5906_v36  ;;  %v3340_v16 = vpack.c.bf16 %v3307_v49, %v3306_v17 }
 0x574   : > { %v3133_v6 = vpop.f32.mrf.mxu2  ;;  %v2605_v9 = vpop.f32.mrf.mxu0 }
 0x575   : > { %3646 = vst.msk [vmem:[#allocation2 + $0x58] sm:$0xff] %vm2114_vm4, %v3598_v61  ;;  %4564 = vmatmul.msk.bf16.gmra.mxu3 %vm2114_vm4, %v3340_v16  ;;  %v2830_v12 = vpop.f32.mrf.mxu1  ;;  %v3208_v15 = vadd.f32 %v3133_v6, %v2829_v7 }
 0x576   : > { %v2831_v23 = vadd.f32 %v2830_v12, %v2605_v9 }
 0x577   : > { %v3260_v21 = vadd.f32 %v5952_v53, %v3208_v15 }
 0x578   : > { %v3497_v13 = vpop.f32.mrf.mxu3 }
 0x579   : > { %v3498_v57 = vadd.f32 %v6041_v33, %v3497_v13  ;;  %v3308_v37 = vmax.f32 %v3260_v21, 0.0 }
 0x57b   : > { %v3599_v18 = vadd.f32 %v3498_v57, %v5913_v24 }
 0x57c   : > { %v3135_v20 = vpop.f32.mrf.mxu2  ;;  %v2608_v0 = vpop.f32.mrf.mxu0 }
 0x57d   : > { %3647 = vst.msk [vmem:[#allocation2 + $0x60] sm:$0xff] %vm2114_vm4, %v3599_v18  ;;  %v3209_v36 = vadd.f32 %v3135_v20, %v2831_v23  ;;  %v2833_v38 = vpop.f32.mrf.mxu1 }
 0x57e   : > { %v2834_v24 = vadd.f32 %v2833_v38, %v2608_v0 }
 0x57f   : > { %v3261_v30 = vadd.f32 %v5952_v53, %v3209_v36 }
 0x580   : > { %v3499_v43 = vpop.f32.mrf.mxu3 }
 0x581   : > { %v3309_v44 = vmax.f32 %v3261_v30, 0.0  ;;  %v3500_v8 = vadd.f32 %v6041_v33, %v3499_v43 }
 0x583   : > { %v3600_v46 = vadd.f32 %v3500_v8, %v5915_v25  ;;  %v3341_v45 = vpack.c.bf16 %v3309_v44, %v3308_v37 }
 0x584   : > { %v3138_v47 = vpop.f32.mrf.mxu2  ;;  %v2610_v50 = vpop.f32.mrf.mxu0 }
 0x585   : > { %3648 = vst.msk [vmem:[#allocation2 + $0x68] sm:$0xff] %vm2114_vm4, %v3600_v46  ;;  %4565 = vmatmul.msk.bf16.gmra.mxu3 %vm2114_vm4, %v3341_v45  ;;  %v2835_v22 = vpop.f32.mrf.mxu1  ;;  %v3210_v4 = vadd.f32 %v3138_v47, %v2834_v24  ;;  %v4821_v24 = vld [vmem:[#allocation2 + $0x88] sm:$0xff] }
 0x586   : > { %v2836_v56 = vadd.f32 %v2835_v22, %v2610_v50 }
 0x587   : > { %v3262_v17 = vadd.f32 %v5952_v53, %v3210_v4 }
 0x588   : > { %v3502_v55 = vpop.f32.mrf.mxu3 }
 0x589   : > { %v3503_v11 = vadd.f32 %v6041_v33, %v3502_v55  ;;  %v3310_v6 = vmax.f32 %v3262_v17, 0.0  ;;  %v4822_v17 = vld [vmem:[#allocation2 + $0x90] sm:$0xff] }
 0x58b   : > { %v3601_v58 = vadd.f32 %v3503_v11, %v5928_v31 }
 0x58c   : > { %v3140_v62 = vpop.f32.mrf.mxu2  ;;  %v2613_v49 = vpop.f32.mrf.mxu0 }
 0x58d   : > { %3649 = vst.msk [vmem:[#allocation2 + $0x70] sm:$0xff] %vm2114_vm4, %v3601_v58  ;;  %v3211_v25 = vadd.f32 %v3140_v62, %v2836_v56  ;;  %v2838_v14 = vpop.f32.mrf.mxu1 }
 0x58e   : > { %v2839_v31 = vadd.f32 %v2838_v14, %v2613_v49  ;;  %v6181_v14 = vld [vmem:[%s6403_s9] ss:$0 sm:$0xff] }
 0x58f   : > { %v3263_v61 = vadd.f32 %v5952_v53, %v3211_v25 }
 0x590   : > { %v3504_v16 = vpop.f32.mrf.mxu3 }
 0x591   : > { %v3311_v7 = vmax.f32 %v3263_v61, 0.0  ;;  %v3505_v9 = vadd.f32 %v6041_v33, %v3504_v16 }
 0x593   : > { %v3602_v12 = vadd.f32 %v3505_v9, %v5930_v32  ;;  %v3342_v13 = vpack.c.bf16 %v3311_v7, %v3310_v6 }
 0x594   : > { %v3143_v15 = vpop.f32.mrf.mxu2  ;;  %v2615_v57 = vpop.f32.mrf.mxu0 }
 0x595   : > { %3650 = vst.msk [vmem:[#allocation2 + $0x78] sm:$0xff] %vm2114_vm4, %v3602_v12  ;;  %4566 = vmatmul.msk.bf16.gmra.mxu3 %vm2114_vm4, %v3342_v13  ;;  %v2840_v23 = vpop.f32.mrf.mxu1  ;;  %v3212_v20 = vadd.f32 %v3143_v15, %v2839_v31 }
 0x596   : > { %v2841_v36 = vadd.f32 %v2840_v23, %v2615_v57  ;;  %v4824_v57 = vld [vmem:[#allocation2 + $0x98] sm:$0xff] }
 0x597   : > { %v3264_v30 = vadd.f32 %v5952_v53, %v3212_v20 }
 0x598   : > { %v3507_v18 = vpop.f32.mrf.mxu3 }
 0x599   : > { %v3508_v21 = vadd.f32 %v6041_v33, %v3507_v18  ;;  %v3312_v46 = vmax.f32 %v3264_v30, 0.0 }
 0x59b   : > { %v3603_v0 = vadd.f32 %v3508_v21, %v5943_v52 }
 0x59c   : > { %v3145_v38 = vpop.f32.mrf.mxu2  ;;  %v2618_v43 = vpop.f32.mrf.mxu0 }
 0x59d   : > { %3651 = vst.msk [vmem:[#allocation2 + $0x80] sm:$0xff] %vm2114_vm4, %v3603_v0  ;;  %v3213_v32 = vadd.f32 %v3145_v38, %v2841_v36  ;;  %v2843_v37 = vpop.f32.mrf.mxu1 }
 0x59e   : > { %v2844_v52 = vadd.f32 %v2843_v37, %v2618_v43  ;;  %v4825_v37 = vld [vmem:[#allocation2 + $0xa0] sm:$0xff] }
 0x59f   : > { %v3265_v44 = vadd.f32 %v5952_v53, %v3213_v32 }
 0x5a0   : > { %v3509_v8 = vpop.f32.mrf.mxu3 }
 0x5a1   : > { %v3313_v45 = vmax.f32 %v3265_v44, 0.0  ;;  %v3510_v47 = vadd.f32 %v6041_v33, %v3509_v8 }
 0x5a3   : > { %v3604_v50 = vadd.f32 %v4821_v24, %v3510_v47  ;;  %v3343_v22 = vpack.c.bf16 %v3313_v45, %v3312_v46 }
 0x5a4   : > { %v3148_v55 = vpop.f32.mrf.mxu2  ;;  %v2620_v4 = vpop.f32.mrf.mxu0 }
 0x5a5   : > { %3652 = vst.msk [vmem:[#allocation2 + $0x88] sm:$0xff] %vm2114_vm4, %v3604_v50  ;;  %4567 = vmatmul.msk.bf16.gmra.mxu3 %vm2114_vm4, %v3343_v22  ;;  %v2845_v11 = vpop.f32.mrf.mxu1  ;;  %v3214_v58 = vadd.f32 %v3148_v55, %v2844_v52 }
 0x5a6   : > { %v2846_v62 = vadd.f32 %v2845_v11, %v2620_v4  ;;  %v4826_v11 = vld [vmem:[#allocation2 + $0xa8] sm:$0xff] }
 0x5a7   : > { %v3266_v61 = vadd.f32 %v6181_v14, %v3214_v58 }
 0x5a8   : > { %v3512_v56 = vpop.f32.mrf.mxu3 }
 0x5a9   : > { %v3513_v53 = vadd.f32 %v6041_v33, %v3512_v56  ;;  %v3314_v13 = vmax.f32 %v3266_v61, 0.0 }
 0x5ab   : > { %v3605_v25 = vadd.f32 %v4822_v17, %v3513_v53 }
 0x5ac   : > { %v3150_v49 = vpop.f32.mrf.mxu2  ;;  %v2623_v6 = vpop.f32.mrf.mxu0 }
 0x5ad   : > { %3653 = vst.msk [vmem:[#allocation2 + $0x90] sm:$0xff] %vm2114_vm4, %v3605_v25  ;;  %v3215_v16 = vadd.f32 %v3150_v49, %v2846_v62  ;;  %v2848_v7 = vpop.f32.mrf.mxu1 }
 0x5ae   : > { %v2849_v21 = vadd.f32 %v2848_v7, %v2623_v6 }
 0x5af   : > { %v3267_v9 = vadd.f32 %v6181_v14, %v3215_v16 }
 0x5b0   : > { %v3514_v12 = vpop.f32.mrf.mxu3 }
 0x5b1   : > { %v3315_v15 = vmax.f32 %v3267_v9, 0.0  ;;  %v3515_v31 = vadd.f32 %v6041_v33, %v3514_v12 }
 0x5b3   : > { %v3606_v23 = vadd.f32 %v4824_v57, %v3515_v31  ;;  %v3344_v18 = vpack.c.bf16 %v3315_v15, %v3314_v13 }
 0x5b4   : > { %v3153_v20 = vpop.f32.mrf.mxu2  ;;  %v2625_v36 = vpop.f32.mrf.mxu0 }
 0x5b5   : > { %3654 = vst.msk [vmem:[#allocation2 + $0x98] sm:$0xff] %vm2114_vm4, %v3606_v23  ;;  %4568 = vmatmul.msk.bf16.gmra.mxu3 %vm2114_vm4, %v3344_v18  ;;  %v2850_v0 = vpop.f32.mrf.mxu1  ;;  %v3216_v30 = vadd.f32 %v3153_v20, %v2849_v21 }
 0x5b6   : > { %v2851_v43 = vadd.f32 %v2850_v0, %v2625_v36  ;;  %v4827_v36 = vld [vmem:[#allocation2 + $0xb8] sm:$0xff] }
 0x5b7   : > { %v3268_v46 = vadd.f32 %v6181_v14, %v3216_v30 }
 0x5b8   : > { %v3517_v38 = vpop.f32.mrf.mxu3 }
 0x5b9   : > { %v3518_v32 = vadd.f32 %v6041_v33, %v3517_v38  ;;  %v3316_v55 = vmax.f32 %v3268_v46, 0.0 }
 0x5bb   : > { %v3607_v44 = vadd.f32 %v4825_v37, %v3518_v32 }
 0x5bc   : > { %v3155_v8 = vpop.f32.mrf.mxu2  ;;  %v2628_v47 = vpop.f32.mrf.mxu0 }
 0x5bd   : > { %3655 = vst.msk [vmem:[#allocation2 + $0xa0] sm:$0xff] %vm2114_vm4, %v3607_v44  ;;  %v3217_v45 = vadd.f32 %v3155_v8, %v2851_v43  ;;  %v2853_v24 = vpop.f32.mrf.mxu1 }
 0x5be   : > { %v2854_v62 = vadd.f32 %v2853_v24, %v2628_v47 }
 0x5bf   : > { %v3269_v50 = vadd.f32 %v6181_v14, %v3217_v45 }
 0x5c0   : > { %v3519_v22 = vpop.f32.mrf.mxu3 }
 0x5c1   : > { %v3317_v52 = vmax.f32 %v3269_v50, 0.0  ;;  %v3520_v4 = vadd.f32 %v6041_v33, %v3519_v22 }
 0x5c3   : > { %v3608_v56 = vadd.f32 %v4826_v11, %v3520_v4  ;;  %v3345_v58 = vpack.c.bf16 %v3317_v52, %v3316_v55 }
 0x5c4   : > { %v3158_v53 = vpop.f32.mrf.mxu2  ;;  %v2630_v17 = vpop.f32.mrf.mxu0 }
 0x5c5   : > { %3656 = vst.msk [vmem:[#allocation2 + $0xa8] sm:$0xff] %vm2114_vm4, %v3608_v56  ;;  %4569 = vmatmul.msk.bf16.gmra.mxu3 %vm2114_vm4, %v3345_v58  ;;  %v2855_v25 = vpop.f32.mrf.mxu1  ;;  %v3218_v61 = vadd.f32 %v3158_v53, %v2854_v62  ;;  %v4828_v53 = vld [vmem:[#allocation2 + $0xc8] sm:$0xff] }
 0x5c6   : > { %v2856_v6 = vadd.f32 %v2855_v25, %v2630_v17 }
 0x5c7   : > { %v3270_v12 = vadd.f32 %v6181_v14, %v3218_v61 }
 0x5c8   : > { %v3522_v49 = vpop.f32.mrf.mxu3 }
 0x5c9   : > { %v3523_v16 = vadd.f32 %v6041_v33, %v3522_v49  ;;  %v3318_v18 = vmax.f32 %v3270_v12, 0.0 }
 0x5cb   : > { %v3609_v7 = vadd.f32 %v3523_v16, %v5966_v59 }
 0x5cc   : > { %v3160_v9 = vpop.f32.mrf.mxu2  ;;  %v2633_v15 = vpop.f32.mrf.mxu0 }
 0x5cd   : > { %3657 = vst.msk [vmem:[#allocation2 + $0xb0] sm:$0xff] %vm2114_vm4, %v3609_v7  ;;  %v3219_v13 = vadd.f32 %v3160_v9, %v2856_v6  ;;  %v2858_v31 = vpop.f32.mrf.mxu1 }
 0x5ce   : > { %v2859_v59 = vadd.f32 %v2858_v31, %v2633_v15 }
 0x5cf   : > { %v3271_v57 = vadd.f32 %v6181_v14, %v3219_v13 }
 0x5d0   : > { %v3524_v23 = vpop.f32.mrf.mxu3 }
 0x5d1   : > { %v3319_v20 = vmax.f32 %v3271_v57, 0.0  ;;  %v3525_v21 = vadd.f32 %v6041_v33, %v3524_v23 }
 0x5d3   : > { %v3610_v0 = vadd.f32 %v4827_v36, %v3525_v21  ;;  %v3346_v38 = vpack.c.bf16 %v3319_v20, %v3318_v18 }
 0x5d4   : > { %v3163_v30 = vpop.f32.mrf.mxu2  ;;  %v2635_v32 = vpop.f32.mrf.mxu0 }
 0x5d5   : > { %3658 = vst.msk [vmem:[#allocation2 + $0xb8] sm:$0xff] %vm2114_vm4, %v3610_v0  ;;  %4570 = vmatmul.msk.bf16.gmra.mxu3 %vm2114_vm4, %v3346_v38  ;;  %v2860_v43 = vpop.f32.mrf.mxu1  ;;  %v3220_v44 = vadd.f32 %v3163_v30, %v2859_v59  ;;  %v4829_v38 = vld [vmem:[#allocation2 + $0xd8] sm:$0xff] }
 0x5d6   : > { %v2861_v46 = vadd.f32 %v2860_v43, %v2635_v32 }
 0x5d7   : > { %v3272_v24 = vadd.f32 %v6181_v14, %v3220_v44 }
 0x5d8   : > { %v3527_v37 = vpop.f32.mrf.mxu3 }
 0x5d9   : > { %v3528_v8 = vadd.f32 %v6041_v33, %v3527_v37  ;;  %v3320_v11 = vmax.f32 %v3272_v24, 0.0 }
 0x5db   : > { %v3611_v45 = vadd.f32 %v3528_v8, %v5975_v26 }
 0x5dc   : > { %v3165_v47 = vpop.f32.mrf.mxu2  ;;  %v2638_v22 = vpop.f32.mrf.mxu0 }
 0x5dd   : > { %3659 = vst.msk [vmem:[#allocation2 + $0xc0] sm:$0xff] %vm2114_vm4, %v3611_v45  ;;  %v3221_v50 = vadd.f32 %v3165_v47, %v2861_v46  ;;  %v2863_v55 = vpop.f32.mrf.mxu1 }
 0x5de   : > { %v2864_v26 = vadd.f32 %v2863_v55, %v2638_v22 }
 0x5df   : > { %v3273_v52 = vadd.f32 %v6181_v14, %v3221_v50 }
 0x5e0   : > { %v3529_v4 = vpop.f32.mrf.mxu3 }
 0x5e1   : > { %v3321_v56 = vmax.f32 %v3273_v52, 0.0  ;;  %v3530_v58 = vadd.f32 %v6041_v33, %v3529_v4 }
 0x5e3   : > { %v3612_v62 = vadd.f32 %v4828_v53, %v3530_v58  ;;  %v3347_v17 = vpack.c.bf16 %v3321_v56, %v3320_v11  ;;  %v4830_v58 = vld [vmem:[#allocation2 + $0xe8] sm:$0xff] }
 0x5e4   : > { %v3168_v25 = vpop.f32.mrf.mxu2  ;;  %v2640_v49 = vpop.f32.mrf.mxu0 }
 0x5e5   : > { %3660 = vst.msk [vmem:[#allocation2 + $0xc8] sm:$0xff] %vm2114_vm4, %v3612_v62  ;;  %4571 = vmatmul.msk.bf16.gmra.mxu3 %vm2114_vm4, %v3347_v17  ;;  %v2865_v61 = vpop.f32.mrf.mxu1  ;;  %v3222_v6 = vadd.f32 %v3168_v25, %v2864_v26 }
 0x5e6   : > { %v2866_v9 = vadd.f32 %v2865_v61, %v2640_v49 }
 0x5e7   : > { %v3274_v15 = vadd.f32 %v6181_v14, %v3222_v6 }
 0x5e8   : > { %v3532_v16 = vpop.f32.mrf.mxu3 }
 0x5e9   : > { %v3533_v7 = vadd.f32 %v6041_v33, %v3532_v16  ;;  %v3322_v21 = vmax.f32 %v3274_v15, 0.0 }
 0x5eb   : > { %v3613_v12 = vadd.f32 %v3533_v7, %v5984_v40 }
 0x5ec   : > { %v3170_v13 = vpop.f32.mrf.mxu2  ;;  %v2643_v57 = vpop.f32.mrf.mxu0 }
 0x5ed   : > { %3661 = vst.msk [vmem:[#allocation2 + $0xd0] sm:$0xff] %vm2114_vm4, %v3613_v12  ;;  %v3223_v31 = vadd.f32 %v3170_v13, %v2866_v9  ;;  %v2868_v23 = vpop.f32.mrf.mxu1 }
 0x5ee   : > { %v2869_v40 = vadd.f32 %v2868_v23, %v2643_v57 }
 0x5ef   : > { %v3275_v18 = vadd.f32 %v6181_v14, %v3223_v31 }
 0x5f0   : > { %v3534_v20 = vpop.f32.mrf.mxu3 }
 0x5f1   : > { %v3323_v36 = vmax.f32 %v3275_v18, 0.0  ;;  %v3535_v0 = vadd.f32 %v6041_v33, %v3534_v20 }
 0x5f3   : > { %v3614_v30 = vadd.f32 %v4829_v38, %v3535_v0  ;;  %v3348_v59 = vpack.c.bf16 %v3323_v36, %v3322_v21 }
 0x5f4   : > { %v3173_v32 = vpop.f32.mrf.mxu2  ;;  %v2645_v43 = vpop.f32.mrf.mxu0 }
 0x5f5   : > { %3662 = vst.msk [vmem:[#allocation2 + $0xd8] sm:$0xff] %vm2114_vm4, %v3614_v30  ;;  %4572 = vmatmul.msk.bf16.gmra.mxu3 %vm2114_vm4, %v3348_v59  ;;  %v2870_v37 = vpop.f32.mrf.mxu1  ;;  %v3224_v8 = vadd.f32 %v3173_v32, %v2869_v40 }
 0x5f6   : > { %v2871_v45 = vadd.f32 %v2870_v37, %v2645_v43 }
 0x5f7   : > { %v3276_v50 = vadd.f32 %v6181_v14, %v3224_v8 }
 0x5f8   : > { %v3537_v44 = vpop.f32.mrf.mxu3 }
 0x5f9   : > { %v3538_v46 = vadd.f32 %v6041_v33, %v3537_v44  ;;  %v3324_v4 = vmax.f32 %v3276_v50, 0.0 }
 0x5fb   : > { %v3615_v47 = vadd.f32 %v3538_v46, %v5993_v63 }
 0x5fc   : > { %v3175_v24 = vpop.f32.mrf.mxu2 }
 0x5fd   : > { %3663 = vst.msk [vmem:[#allocation2 + $0xe0] sm:$0xff] %vm2114_vm4, %v3615_v47  ;;  %v3225_v22 = vadd.f32 %v3175_v24, %v2871_v45 }
 0x5ff   : > { %v3277_v55 = vadd.f32 %v6181_v14, %v3225_v22 }
 0x600   : > { %v3539_v52 = vpop.f32.mrf.mxu3 }
 0x601   : > { %v3325_v11 = vmax.f32 %v3277_v55, 0.0  ;;  %v3540_v56 = vadd.f32 %v6041_v33, %v3539_v52 }
 0x603   : > { %v3616_v53 = vadd.f32 %v4830_v58, %v3540_v56  ;;  %v3349_v62 = vpack.c.bf16 %v3325_v11, %v3324_v4 }
 0x605   : > { %3664 = vst.msk [vmem:[#allocation2 + $0xe8] sm:$0xff] %vm2114_vm4, %v3616_v53  ;;  %4573 = vmatmul.msk.bf16.gmra.mxu3 %vm2114_vm4, %v3349_v62 }
 0x608   : > { %v3542_v63 = vpop.f32.mrf.mxu3 }
 0x609   : > { %v3543_v17 = vadd.f32 %v6041_v33, %v3542_v63 }
 0x60b   : > { %v3617_v25 = vadd.f32 %v3543_v17, %v6002_v48 }
 0x60d   : > { %3665 = vst.msk [vmem:[#allocation2 + $0xf0] sm:$0xff] %vm2114_vm4, %v3617_v25 }
 0x610   : > { %v3544_v14 = vpop.f32.mrf.mxu3 }
 0x611   : > { %v3545_v26 = vadd.f32 %v6041_v33, %v3544_v14 }
 0x613   : > { %v3618_v49 = vadd.f32 %v3545_v26, %v6004_v60 }
 0x615   : > { %3666 = vst.msk [vmem:[#allocation2 + $0xf8] sm:$0xff] %vm2114_vm4, %v3618_v49 }
 0x618   : > { %v3547_v61 = vpop.f32.mrf.mxu3 }
 0x619   : > { %v3548_v16 = vadd.f32 %v6041_v33, %v3547_v61 }
 0x61b   : > { %v3619_v6 = vadd.f32 %v3548_v16, %v6014_v28 }
 0x61d   : > { %3667 = vst.msk [vmem:[#allocation2 + $0x100] sm:$0xff] %vm2114_vm4, %v3619_v6 }
 0x620   : > { %v3549_v7 = vpop.f32.mrf.mxu3 }
 0x621   : > { %v3550_v9 = vadd.f32 %v6041_v33, %v3549_v7 }
 0x623   : > { %v3620_v48 = vadd.f32 %v3550_v9, %v6016_v54 }
 0x625   : > { %3668 = vst.msk [vmem:[#allocation2 + $0x108] sm:$0xff] %vm2114_vm4, %v3620_v48 }
 0x628   : > { %v3552_v12 = vpop.f32.mrf.mxu3 }
 0x629   : > { %v3553_v13 = vadd.f32 %v6041_v33, %v3552_v12 }
 0x62b   : > { %v3621_v60 = vadd.f32 %v3553_v13, %v6026_v19 }
 0x62d   : > { %3669 = vst.msk [vmem:[#allocation2 + $0x110] sm:$0xff] %vm2114_vm4, %v3621_v60 }
 0x630   : > { %v3554_v15 = vpop.f32.mrf.mxu3 }
 0x631   : > { %v3555_v31 = vadd.f32 %v6041_v33, %v3554_v15 }
 0x633   : > { %v3622_v28 = vadd.f32 %v3555_v31, %v6028_v2 }
 0x635   : > { %3670 = vst.msk [vmem:[#allocation2 + $0x118] sm:$0xff] %vm2114_vm4, %v3622_v28 }
 0x638   : > { %v3557_v57 = vpop.f32.mrf.mxu3 }
 0x639   : > { %v3558_v23 = vadd.f32 %v6041_v33, %v3557_v57 }
 0x63b   : > { %v3623_v54 = vadd.f32 %v3558_v23, %v6044_v41 }
 0x63d   : > { %3671 = vst.msk [vmem:[#allocation2 + $0x120] sm:$0xff] %vm2114_vm4, %v3623_v54 }
 0x640   : > { %v3559_v18 = vpop.f32.mrf.mxu3 }
 0x641   : > { %v3560_v20 = vadd.f32 %v6041_v33, %v3559_v18 }
 0x643   : > { %v3624_v19 = vadd.f32 %v3560_v20, %v6046_v42 }
 0x645   : > { %3672 = vst.msk [vmem:[#allocation2 + $0x128] sm:$0xff] %vm2114_vm4, %v3624_v19 }
 0x648   : > { %v3562_v21 = vpop.f32.mrf.mxu3 }
 0x649   : > { %v3563_v36 = vadd.f32 %v6041_v33, %v3562_v21 }
 0x64b   : > { %v3625_v2 = vadd.f32 %v3563_v36, %v6062_v35 }
 0x64d   : > { %3673 = vst.msk [vmem:[#allocation2 + $0x130] sm:$0xff] %vm2114_vm4, %v3625_v2 }
 0x650   : > { %v3564_v0 = vpop.f32.mrf.mxu3 }
 0x651   : > { %v3565_v38 = vadd.f32 %v6041_v33, %v3564_v0 }
 0x653   : > { %v3626_v41 = vadd.f32 %v3565_v38, %v6064_v27 }
 0x655   : > { %3674 = vst.msk [vmem:[#allocation2 + $0x138] sm:$0xff] %vm2114_vm4, %v3626_v41 }
 0x658   : > { %v3567_v30 = vpop.f32.mrf.mxu3 }
 0x659   : > { %v3568_v59 = vadd.f32 %v6041_v33, %v3567_v30 }
 0x65b   : > { %v3627_v42 = vadd.f32 %v3568_v59, %v6080_v29 }
 0x65d   : > { %3675 = vst.msk [vmem:[#allocation2 + $0x140] sm:$0xff] %vm2114_vm4, %v3627_v42 }
 0x660   : > { %v3569_v32 = vpop.f32.mrf.mxu3 }
 0x661   : > { %v3570_v40 = vadd.f32 %v6041_v33, %v3569_v32 }
 0x663   : > { %v3628_v35 = vadd.f32 %v3570_v40, %v6082_v10 }
 0x665   : > { %3676 = vst.msk [vmem:[#allocation2 + $0x148] sm:$0xff] %vm2114_vm4, %v3628_v35 }
 0x668   : > { %v3572_v43 = vpop.f32.mrf.mxu3 }
 0x669   : > { %v3573_v37 = vadd.f32 %v6041_v33, %v3572_v43 }
 0x66b   : > { %v3629_v27 = vadd.f32 %v3573_v37, %v6098_v1 }
 0x66d   : > { %3677 = vst.msk [vmem:[#allocation2 + $0x150] sm:$0xff] %vm2114_vm4, %v3629_v27 }
 0x670   : > { %v3574_v44 = vpop.f32.mrf.mxu3 }
 0x671   : > { %v3575_v8 = vadd.f32 %v6041_v33, %v3574_v44 }
 0x673   : > { %v3630_v29 = vadd.f32 %v3575_v8, %v6100_v5 }
 0x675   : > { %3678 = vst.msk [vmem:[#allocation2 + $0x158] sm:$0xff] %vm2114_vm4, %v3630_v29 }
 0x678   : > { %v3577_v46 = vpop.f32.mrf.mxu3 }
 0x679   : > { %v3578_v45 = vadd.f32 %v6041_v33, %v3577_v46 }
 0x67b   : > { %v3631_v10 = vadd.f32 %v3578_v45, %v6116_v3 }
 0x67d   : > { %3679 = vst.msk [vmem:[#allocation2 + $0x160] sm:$0xff] %vm2114_vm4, %v3631_v10 }
 0x680   : > { %v3579_v47 = vpop.f32.mrf.mxu3 }
 0x681   : > { %v3580_v24 = vadd.f32 %v6041_v33, %v3579_v47 }
 0x683   : > { %v3632_v1 = vadd.f32 %v3580_v24, %v6118_v51 }
 0x685   : > { %3680 = vst.msk [vmem:[#allocation2 + $0x168] sm:$0xff] %vm2114_vm4, %v3632_v1 }
 0x688   : > { %v3582_v50 = vpop.f32.mrf.mxu3 }
 0x689   : > { %v3583_v22 = vadd.f32 %v6041_v33, %v3582_v50 }
 0x68b   : > { %v3633_v5 = vadd.f32 %v3583_v22, %v6134_v39 }
 0x68d   : > { %3681 = vst.msk [vmem:[#allocation2 + $0x170] sm:$0xff] %vm2114_vm4, %v3633_v5 }
 0x690   : > { %v3584_v55 = vpop.f32.mrf.mxu3 }
 0x691   : > { %v3585_v52 = vadd.f32 %v6041_v33, %v3584_v55 }
 0x693   : > { %v3634_v3 = vadd.f32 %v3585_v52, %v6136_v34 }
 0x695   : > { %3682 = vst.msk [vmem:[#allocation2 + $0x178] sm:$0xff] %vm2114_vm4, %v3634_v3 }
 0x696 PF: > { %p3683_p11 = scmp.eq.s32.totalorder %s4890_s30, 1 }
 0x698   : > { %p3684_p12 = pnand %p3683_p11, %p2163_p9 }
 0x69a   : > { %3687 = sbr.rel (%p3684_p12) target bundleno = 1936 (0x790), region = 92 }
 0x69f   : > { %v4702_v51 = vld [vmem:[%s6406_s12 + $0x18] sm:$0xff]  ;;  %v4701_v33 = vld [vmem:[%s6406_s12 + $0x10] sm:$0xff]  ;;  %v4700_v39 = vld [vmem:[%s6406_s12 + $0x8] sm:$0xff] }
 0x6a0   : > { %3872 = vmatpush.bf16.msra.mxu0 %v4702_v51  ;;  %4727 = vmatpush.bf16.msra.mxu1 %v4702_v51  ;;  %v4699_v34 = vld [vmem:[%s6406_s12] sm:$0xff]  ;;  %v3689_v11 = vld [vmem:[#allocation2 + $0x8] sm:$0xff]  ;;  %v3690_v61 = vld [vmem:[#allocation2 + $0x10] sm:$0xff] }
 0x6a1   : > { %4728 = vmatpush.bf16.msra.mxu2 %v4702_v51  ;;  %4729 = vmatpush.bf16.msra.mxu3 %v4702_v51  ;;  %v3688_v4 = vld [vmem:[#allocation2] sm:$0xff]  ;;  %v3701_v58 = vld [vmem:[#allocation2 + $0x68] sm:$0xff]  ;;  %v3691_v16 = vld [vmem:[#allocation2 + $0x18] sm:$0xff] }
 0x6a2   : > { %v3700_v56 = vld [vmem:[#allocation2 + $0x60] sm:$0xff]  ;;  %v3713_v62 = vld [vmem:[#allocation2 + $0xc8] sm:$0xff]  ;;  %v3736_v25 = vpack.c.bf16 %v3689_v11, %v3688_v4  ;;  %v3702_v6 = vld [vmem:[#allocation2 + $0x70] sm:$0xff]  ;;  %v3737_v60 = vpack.c.bf16 %v3691_v16, %v3690_v61 }
 0x6a3   : > { %v3712_v53 = vld [vmem:[#allocation2 + $0xc0] sm:$0xff]  ;;  %v3725_v17 = vld [vmem:[#allocation2 + $0x128] sm:$0xff]  ;;  %v3742_v14 = vpack.c.bf16 %v3701_v58, %v3700_v56  ;;  %v3703_v7 = vld [vmem:[#allocation2 + $0x78] sm:$0xff] }
 0x6a4   : > { %3873 = vmatpush.bf16.msra.mxu0 %v4701_v33  ;;  %4730 = vmatpush.bf16.msra.mxu1 %v4701_v33  ;;  %v3724_v63 = vld [vmem:[#allocation2 + $0x120] sm:$0xff]  ;;  %v3748_v26 = vpack.c.bf16 %v3713_v62, %v3712_v53  ;;  %v3714_v9 = vld [vmem:[#allocation2 + $0xd0] sm:$0xff]  ;;  %v3715_v48 = vld [vmem:[#allocation2 + $0xd8] sm:$0xff]  ;;  %v3743_v15 = vpack.c.bf16 %v3703_v7, %v3702_v6 }
 0x6a5   : > { %4731 = vmatpush.bf16.msra.mxu2 %v4701_v33  ;;  %4732 = vmatpush.bf16.msra.mxu3 %v4701_v33  ;;  %v3754_v49 = vpack.c.bf16 %v3725_v17, %v3724_v63  ;;  %v3726_v12 = vld [vmem:[#allocation2 + $0x130] sm:$0xff]  ;;  %v3727_v13 = vld [vmem:[#allocation2 + $0x138] sm:$0xff]  ;;  %v3749_v31 = vpack.c.bf16 %v3715_v48, %v3714_v9  ;;  %v3692_v57 = vld [vmem:[#allocation2 + $0x20] sm:$0xff] }
 0x6a6   : > { %v3755_v28 = vpack.c.bf16 %v3727_v13, %v3726_v12  ;;  %v3693_v23 = vld [vmem:[#allocation2 + $0x28] sm:$0xff]  ;;  %v3704_v54 = vld [vmem:[#allocation2 + $0x80] sm:$0xff]  ;;  %v3694_v30 = vld [vmem:[#allocation2 + $0x30] sm:$0xff] }
 0x6a7   : > { %v3705_v18 = vld [vmem:[#allocation2 + $0x88] sm:$0xff]  ;;  %v3716_v20 = vld [vmem:[#allocation2 + $0xe0] sm:$0xff]  ;;  %v3738_v2 = vpack.c.bf16 %v3693_v23, %v3692_v57  ;;  %v3695_v59 = vld [vmem:[#allocation2 + $0x38] sm:$0xff] }
 0x6a8   : > { %3874 = vmatpush.bf16.msra.mxu0 %v4700_v39  ;;  %4733 = vmatpush.bf16.msra.mxu1 %v4700_v39  ;;  %v3717_v19 = vld [vmem:[#allocation2 + $0xe8] sm:$0xff]  ;;  %v3728_v21 = vld [vmem:[#allocation2 + $0x140] sm:$0xff]  ;;  %v3744_v0 = vpack.c.bf16 %v3705_v18, %v3704_v54  ;;  %v3706_v42 = vld [vmem:[#allocation2 + $0x90] sm:$0xff]  ;;  %v3739_v27 = vpack.c.bf16 %v3695_v59, %v3694_v30 }
 0x6a9   : > { %4734 = vmatpush.bf16.msra.mxu2 %v4700_v39  ;;  %4735 = vmatpush.bf16.msra.mxu3 %v4700_v39  ;;  %v3729_v36 = vld [vmem:[#allocation2 + $0x148] sm:$0xff]  ;;  %v3750_v38 = vpack.c.bf16 %v3717_v19, %v3716_v20  ;;  %v3707_v32 = vld [vmem:[#allocation2 + $0x98] sm:$0xff]  ;;  %v3718_v40 = vld [vmem:[#allocation2 + $0xf0] sm:$0xff] }
 0x6aa   : > { %v3756_v41 = vpack.c.bf16 %v3729_v36, %v3728_v21  ;;  %v3719_v35 = vld [vmem:[#allocation2 + $0xf8] sm:$0xff]  ;;  %v3730_v43 = vld [vmem:[#allocation2 + $0x150] sm:$0xff]  ;;  %v3745_v44 = vpack.c.bf16 %v3707_v32, %v3706_v42  ;;  %v3696_v46 = vld [vmem:[#allocation2 + $0x40] sm:$0xff] }
 0x6ab   : > { %v3731_v37 = vld [vmem:[#allocation2 + $0x158] sm:$0xff]  ;;  %v3751_v8 = vpack.c.bf16 %v3719_v35, %v3718_v40  ;;  %v3697_v45 = vld [vmem:[#allocation2 + $0x48] sm:$0xff]  ;;  %v3708_v10 = vld [vmem:[#allocation2 + $0xa0] sm:$0xff] }
 0x6ac   : > { %3875 = vmatpush.bf16.msra.mxu0 %v4699_v34  ;;  %4736 = vmatpush.bf16.msra.mxu1 %v4699_v34  ;;  %v3757_v29 = vpack.c.bf16 %v3731_v37, %v3730_v43  ;;  %v3709_v47 = vld [vmem:[#allocation2 + $0xa8] sm:$0xff]  ;;  %v3720_v24 = vld [vmem:[#allocation2 + $0x100] sm:$0xff]  ;;  %v3740_v5 = vpack.c.bf16 %v3697_v45, %v3696_v46  ;;  %v3698_v51 = vld [vmem:[#allocation2 + $0x50] sm:$0xff] }
 0x6ad   : > { %4737 = vmatpush.bf16.msra.mxu2 %v4699_v34  ;;  %4738 = vmatpush.bf16.msra.mxu3 %v4699_v34  ;;  %v3721_v1 = vld [vmem:[#allocation2 + $0x108] sm:$0xff]  ;;  %v3732_v50 = vld [vmem:[#allocation2 + $0x160] sm:$0xff]  ;;  %v3746_v55 = vpack.c.bf16 %v3709_v47, %v3708_v10  ;;  %v3699_v33 = vld [vmem:[#allocation2 + $0x58] sm:$0xff] }
 0x6ae   : > { %v3733_v22 = vld [vmem:[#allocation2 + $0x168] sm:$0xff]  ;;  %v3752_v52 = vpack.c.bf16 %v3721_v1, %v3720_v24  ;;  %v3710_v39 = vld [vmem:[#allocation2 + $0xb0] sm:$0xff]  ;;  %v3711_v34 = vld [vmem:[#allocation2 + $0xb8] sm:$0xff]  ;;  %v3741_v53 = vpack.c.bf16 %v3699_v33, %v3698_v51 }
 0x6af   : > { %4590 = vmatmul.msk.bf16.vlgmr.msra.gmra.mxu0 %vm2114_vm4, %v3736_v25  ;;  %4596 = vmatmul.msk.bf16.vlgmr.msra.gmra.mxu1 %vm2114_vm4, %v3742_v14  ;;  %v3758_v3 = vpack.c.bf16 %v3733_v22, %v3732_v50  ;;  %v3722_v4 = vld [vmem:[#allocation2 + $0x110] sm:$0xff]  ;;  %v3723_v11 = vld [vmem:[#allocation2 + $0x118] sm:$0xff]  ;;  %v3747_v62 = vpack.c.bf16 %v3711_v34, %v3710_v39  ;;  %v6324_v25 = vld [vmem:[%s6407_s13] ss:$0 sm:$0xff] }
 0x6b0   : > { %4602 = vmatmul.msk.bf16.vlgmr.msra.gmra.mxu2 %vm2114_vm4, %v3748_v26  ;;  %4608 = vmatmul.msk.bf16.vlgmr.msra.gmra.mxu3 %vm2114_vm4, %v3754_v49  ;;  %v3734_v56 = vld [vmem:[#allocation2 + $0x170] sm:$0xff]  ;;  %v3735_v58 = vld [vmem:[#allocation2 + $0x178] sm:$0xff]  ;;  %v3753_v63 = vpack.c.bf16 %v3723_v11, %v3722_v4 }
 0x6b1   : > { %v3759_v17 = vpack.c.bf16 %v3735_v58, %v3734_v56 }
 0x6bf   : > { %4591 = vmatmul.msk.bf16.gmra.mxu0 %vm2114_vm4, %v3737_v60  ;;  %4597 = vmatmul.msk.bf16.gmra.mxu1 %vm2114_vm4, %v3743_v15 }
 0x6c0   : > { %4603 = vmatmul.msk.bf16.gmra.mxu2 %vm2114_vm4, %v3749_v31  ;;  %4609 = vmatmul.msk.bf16.gmra.mxu3 %vm2114_vm4, %v3755_v28 }
 0x6cf   : > { %4592 = vmatmul.msk.bf16.gmra.mxu0 %vm2114_vm4, %v3738_v2  ;;  %4598 = vmatmul.msk.bf16.gmra.mxu1 %vm2114_vm4, %v3744_v0 }
 0x6d0   : > { %4604 = vmatmul.msk.bf16.gmra.mxu2 %vm2114_vm4, %v3750_v38  ;;  %4610 = vmatmul.msk.bf16.gmra.mxu3 %vm2114_vm4, %v3756_v41 }
 0x6df   : > { %4593 = vmatmul.msk.bf16.gmra.mxu0 %vm2114_vm4, %v3739_v27  ;;  %4599 = vmatmul.msk.bf16.gmra.mxu1 %vm2114_vm4, %v3745_v44 }
 0x6e0   : > { %4605 = vmatmul.msk.bf16.gmra.mxu2 %vm2114_vm4, %v3751_v8  ;;  %4611 = vmatmul.msk.bf16.gmra.mxu3 %vm2114_vm4, %v3757_v29 }
 0x6ef   : > { %4594 = vmatmul.msk.bf16.gmra.mxu0 %vm2114_vm4, %v3740_v5  ;;  %4600 = vmatmul.msk.bf16.gmra.mxu1 %vm2114_vm4, %v3746_v55 }
 0x6f0   : > { %4606 = vmatmul.msk.bf16.gmra.mxu2 %vm2114_vm4, %v3752_v52  ;;  %4612 = vmatmul.msk.bf16.gmra.mxu3 %vm2114_vm4, %v3758_v3 }
 0x6ff   : > { %4595 = vmatmul.msk.bf16.gmra.mxu0 %vm2114_vm4, %v3741_v53  ;;  %4601 = vmatmul.msk.bf16.gmra.mxu1 %vm2114_vm4, %v3747_v62 }
 0x700   : > { %4607 = vmatmul.msk.bf16.gmra.mxu2 %vm2114_vm4, %v3753_v63  ;;  %4613 = vmatmul.msk.bf16.gmra.mxu3 %vm2114_vm4, %v3759_v17 }
 0x72c   : > { %v3877_v14 = vpop.f32.mrf.mxu0  ;;  %v3907_v26 = vpop.f32.mrf.mxu1 }
 0x72d   : > { %v3878_v49 = vadd.f32 %v6324_v25, %v3877_v14  ;;  %v3908_v61 = vadd.f32 %v6324_v25, %v3907_v26 }
 0x72f   : > { %3997 = vst [vmem:[#allocation7] sm:$0xff] %v3878_v49 }
 0x730   : > { %4009 = vst [vmem:[#allocation7 + $0x60] sm:$0xff] %v3908_v61 }
 0x733   : > { %v3937_v16 = vpop.f32.mrf.mxu2  ;;  %v3967_v6 = vpop.f32.mrf.mxu3 }
 0x734   : > { %v3938_v7 = vadd.f32 %v6324_v25, %v3937_v16  ;;  %v3968_v9 = vadd.f32 %v6324_v25, %v3967_v6  ;;  %v3879_v48 = vpop.f32.mrf.mxu0  ;;  %v3909_v12 = vpop.f32.mrf.mxu1 }
 0x735   : > { %v3880_v13 = vadd.f32 %v6324_v25, %v3879_v48  ;;  %v3910_v60 = vadd.f32 %v6324_v25, %v3909_v12 }
 0x736   : > { %4021 = vst [vmem:[#allocation7 + $0xc0] sm:$0xff] %v3938_v7 }
 0x737   : > { %4033 = vst [vmem:[#allocation7 + $0x120] sm:$0xff] %v3968_v9 }
 0x738   : > { %3998 = vst [vmem:[#allocation7 + $0x8] sm:$0xff] %v3880_v13 }
 0x739   : > { %4010 = vst [vmem:[#allocation7 + $0x68] sm:$0xff] %v3910_v60 }
 0x73b   : > { %v3939_v15 = vpop.f32.mrf.mxu2  ;;  %v3969_v31 = vpop.f32.mrf.mxu3 }
 0x73c   : > { %v3940_v28 = vadd.f32 %v6324_v25, %v3939_v15  ;;  %v3970_v57 = vadd.f32 %v6324_v25, %v3969_v31  ;;  %v3882_v23 = vpop.f32.mrf.mxu0  ;;  %v3912_v54 = vpop.f32.mrf.mxu1 }
 0x73d   : > { %v3883_v18 = vadd.f32 %v6324_v25, %v3882_v23  ;;  %v3913_v20 = vadd.f32 %v6324_v25, %v3912_v54 }
 0x73e   : > { %4022 = vst [vmem:[#allocation7 + $0xc8] sm:$0xff] %v3940_v28 }
 0x73f   : > { %4034 = vst [vmem:[#allocation7 + $0x128] sm:$0xff] %v3970_v57 }
 0x740   : > { %3999 = vst [vmem:[#allocation7 + $0x10] sm:$0xff] %v3883_v18 }
 0x741   : > { %4011 = vst [vmem:[#allocation7 + $0x70] sm:$0xff] %v3913_v20 }
 0x743   : > { %v3942_v19 = vpop.f32.mrf.mxu2  ;;  %v3972_v21 = vpop.f32.mrf.mxu3 }
 0x744   : > { %v3943_v36 = vadd.f32 %v6324_v25, %v3942_v19  ;;  %v3973_v2 = vadd.f32 %v6324_v25, %v3972_v21  ;;  %v3884_v0 = vpop.f32.mrf.mxu0  ;;  %v3914_v38 = vpop.f32.mrf.mxu1 }
 0x745   : > { %v3885_v41 = vadd.f32 %v6324_v25, %v3884_v0  ;;  %v3915_v30 = vadd.f32 %v6324_v25, %v3914_v38 }
 0x746   : > { %4023 = vst [vmem:[#allocation7 + $0xd0] sm:$0xff] %v3943_v36 }
 0x747   : > { %4035 = vst [vmem:[#allocation7 + $0x130] sm:$0xff] %v3973_v2 }
 0x748   : > { %4000 = vst [vmem:[#allocation7 + $0x18] sm:$0xff] %v3885_v41 }
 0x749   : > { %4012 = vst [vmem:[#allocation7 + $0x78] sm:$0xff] %v3915_v30 }
 0x74b   : > { %v3944_v59 = vpop.f32.mrf.mxu2  ;;  %v3974_v42 = vpop.f32.mrf.mxu3 }
 0x74c   : > { %v3945_v32 = vadd.f32 %v6324_v25, %v3944_v59  ;;  %v3975_v40 = vadd.f32 %v6324_v25, %v3974_v42  ;;  %v3887_v35 = vpop.f32.mrf.mxu0  ;;  %v3917_v43 = vpop.f32.mrf.mxu1 }
 0x74d   : > { %v3888_v37 = vadd.f32 %v6324_v25, %v3887_v35  ;;  %v3918_v27 = vadd.f32 %v6324_v25, %v3917_v43 }
 0x74e   : > { %4024 = vst [vmem:[#allocation7 + $0xd8] sm:$0xff] %v3945_v32 }
 0x74f   : > { %4036 = vst [vmem:[#allocation7 + $0x138] sm:$0xff] %v3975_v40 }
 0x750   : > { %4001 = vst [vmem:[#allocation7 + $0x20] sm:$0xff] %v3888_v37 }
 0x751   : > { %4013 = vst [vmem:[#allocation7 + $0x80] sm:$0xff] %v3918_v27 }
 0x753   : > { %v3947_v44 = vpop.f32.mrf.mxu2  ;;  %v3977_v8 = vpop.f32.mrf.mxu3 }
 0x754   : > { %v3948_v29 = vadd.f32 %v6324_v25, %v3947_v44  ;;  %v3978_v46 = vadd.f32 %v6324_v25, %v3977_v8  ;;  %v3889_v45 = vpop.f32.mrf.mxu0  ;;  %v3919_v10 = vpop.f32.mrf.mxu1 }
 0x755   : > { %v3890_v47 = vadd.f32 %v6324_v25, %v3889_v45  ;;  %v3920_v24 = vadd.f32 %v6324_v25, %v3919_v10 }
 0x756   : > { %4025 = vst [vmem:[#allocation7 + $0xe0] sm:$0xff] %v3948_v29 }
 0x757   : > { %4037 = vst [vmem:[#allocation7 + $0x140] sm:$0xff] %v3978_v46 }
 0x758   : > { %4002 = vst [vmem:[#allocation7 + $0x28] sm:$0xff] %v3890_v47 }
 0x759   : > { %4014 = vst [vmem:[#allocation7 + $0x88] sm:$0xff] %v3920_v24 }
 0x75b   : > { %v3949_v1 = vpop.f32.mrf.mxu2  ;;  %v3979_v50 = vpop.f32.mrf.mxu3 }
 0x75c   : > { %v3950_v22 = vadd.f32 %v6324_v25, %v3949_v1  ;;  %v3980_v5 = vadd.f32 %v6324_v25, %v3979_v50  ;;  %v3892_v55 = vpop.f32.mrf.mxu0  ;;  %v3922_v52 = vpop.f32.mrf.mxu1 }
 0x75d   : > { %v3893_v3 = vadd.f32 %v6324_v25, %v3892_v55  ;;  %v3923_v51 = vadd.f32 %v6324_v25, %v3922_v52 }
 0x75e   : > { %4026 = vst [vmem:[#allocation7 + $0xe8] sm:$0xff] %v3950_v22 }
 0x75f   : > { %4038 = vst [vmem:[#allocation7 + $0x148] sm:$0xff] %v3980_v5 }
 0x760   : > { %4003 = vst [vmem:[#allocation7 + $0x30] sm:$0xff] %v3893_v3 }
 0x761   : > { %4015 = vst [vmem:[#allocation7 + $0x90] sm:$0xff] %v3923_v51 }
 0x763   : > { %v3952_v33 = vpop.f32.mrf.mxu2  ;;  %v3982_v39 = vpop.f32.mrf.mxu3 }
 0x764   : > { %v3953_v34 = vadd.f32 %v6324_v25, %v3952_v33  ;;  %v3983_v4 = vadd.f32 %v6324_v25, %v3982_v39  ;;  %v3894_v11 = vpop.f32.mrf.mxu0  ;;  %v3924_v56 = vpop.f32.mrf.mxu1 }
 0x765   : > { %v3895_v58 = vadd.f32 %v6324_v25, %v3894_v11  ;;  %v3925_v53 = vadd.f32 %v6324_v25, %v3924_v56 }
 0x766   : > { %4027 = vst [vmem:[#allocation7 + $0xf0] sm:$0xff] %v3953_v34 }
 0x767   : > { %4039 = vst [vmem:[#allocation7 + $0x150] sm:$0xff] %v3983_v4 }
 0x768   : > { %4004 = vst [vmem:[#allocation7 + $0x38] sm:$0xff] %v3895_v58 }
 0x769   : > { %4016 = vst [vmem:[#allocation7 + $0x98] sm:$0xff] %v3925_v53 }
 0x76b   : > { %v3954_v62 = vpop.f32.mrf.mxu2  ;;  %v3984_v63 = vpop.f32.mrf.mxu3 }
 0x76c   : > { %v3955_v17 = vadd.f32 %v6324_v25, %v3954_v62  ;;  %v3985_v14 = vadd.f32 %v6324_v25, %v3984_v63  ;;  %v3897_v26 = vpop.f32.mrf.mxu0  ;;  %v3927_v49 = vpop.f32.mrf.mxu1 }
 0x76d   : > { %v3898_v61 = vadd.f32 %v6324_v25, %v3897_v26  ;;  %v3928_v16 = vadd.f32 %v6324_v25, %v3927_v49 }
 0x76e   : > { %4028 = vst [vmem:[#allocation7 + $0xf8] sm:$0xff] %v3955_v17 }
 0x76f   : > { %4040 = vst [vmem:[#allocation7 + $0x158] sm:$0xff] %v3985_v14 }
 0x770   : > { %4005 = vst [vmem:[#allocation7 + $0x40] sm:$0xff] %v3898_v61 }
 0x771   : > { %4017 = vst [vmem:[#allocation7 + $0xa0] sm:$0xff] %v3928_v16 }
 0x773   : > { %v3957_v6 = vpop.f32.mrf.mxu2  ;;  %v3987_v7 = vpop.f32.mrf.mxu3 }
 0x774   : > { %v3958_v9 = vadd.f32 %v6324_v25, %v3957_v6  ;;  %v3988_v48 = vadd.f32 %v6324_v25, %v3987_v7  ;;  %v3899_v12 = vpop.f32.mrf.mxu0  ;;  %v3929_v13 = vpop.f32.mrf.mxu1 }
 0x775   : > { %v3900_v60 = vadd.f32 %v6324_v25, %v3899_v12  ;;  %v3930_v15 = vadd.f32 %v6324_v25, %v3929_v13 }
 0x776   : > { %4029 = vst [vmem:[#allocation7 + $0x100] sm:$0xff] %v3958_v9 }
 0x777   : > { %4041 = vst [vmem:[#allocation7 + $0x160] sm:$0xff] %v3988_v48 }
 0x778   : > { %4006 = vst [vmem:[#allocation7 + $0x48] sm:$0xff] %v3900_v60 }
 0x779   : > { %4018 = vst [vmem:[#allocation7 + $0xa8] sm:$0xff] %v3930_v15 }
 0x77b   : > { %v3959_v31 = vpop.f32.mrf.mxu2  ;;  %v3989_v28 = vpop.f32.mrf.mxu3 }
 0x77c   : > { %v3960_v57 = vadd.f32 %v6324_v25, %v3959_v31  ;;  %v3990_v23 = vadd.f32 %v6324_v25, %v3989_v28  ;;  %v3902_v54 = vpop.f32.mrf.mxu0  ;;  %v3932_v18 = vpop.f32.mrf.mxu1 }
 0x77d   : > { %v3903_v20 = vadd.f32 %v6324_v25, %v3902_v54  ;;  %v3933_v19 = vadd.f32 %v6324_v25, %v3932_v18 }
 0x77e   : > { %4030 = vst [vmem:[#allocation7 + $0x108] sm:$0xff] %v3960_v57 }
 0x77f   : > { %4042 = vst [vmem:[#allocation7 + $0x168] sm:$0xff] %v3990_v23 }
 0x780   : > { %4007 = vst [vmem:[#allocation7 + $0x50] sm:$0xff] %v3903_v20 }
 0x781   : > { %4019 = vst [vmem:[#allocation7 + $0xb0] sm:$0xff] %v3933_v19 }
 0x783   : > { %v3962_v21 = vpop.f32.mrf.mxu2  ;;  %v3992_v36 = vpop.f32.mrf.mxu3 }
 0x784   : > { %v3963_v2 = vadd.f32 %v6324_v25, %v3962_v21  ;;  %v3993_v0 = vadd.f32 %v6324_v25, %v3992_v36  ;;  %v3904_v38 = vpop.f32.mrf.mxu0  ;;  %v3934_v41 = vpop.f32.mrf.mxu1 }
 0x785   : > { %v3905_v30 = vadd.f32 %v6324_v25, %v3904_v38  ;;  %v3935_v59 = vadd.f32 %v6324_v25, %v3934_v41 }
 0x786   : > { %4031 = vst [vmem:[#allocation7 + $0x110] sm:$0xff] %v3963_v2 }
 0x787   : > { %4043 = vst [vmem:[#allocation7 + $0x170] sm:$0xff] %v3993_v0 }
 0x788   : > { %4008 = vst [vmem:[#allocation7 + $0x58] sm:$0xff] %v3905_v30 }
 0x789   : > { %4020 = vst [vmem:[#allocation7 + $0xb8] sm:$0xff] %v3935_v59 }
 0x78b   : > { %v3964_v42 = vpop.f32.mrf.mxu2  ;;  %v3994_v32 = vpop.f32.mrf.mxu3 }
 0x78c   : > { %v3965_v40 = vadd.f32 %v6324_v25, %v3964_v42  ;;  %v3995_v35 = vadd.f32 %v6324_v25, %v3994_v32 }
 0x78e   : > { %4032 = vst [vmem:[#allocation7 + $0x118] sm:$0xff] %v3965_v40 }
 0x78f   : > { %4044 = vst [vmem:[#allocation7 + $0x178] sm:$0xff] %v3995_v35 }
 0x790 PF: > { %s6411_s27 = sadd.s32 4294967295, %s4902_s17   ;;  %s4052_s28 = sshll.u32 %s6408_s14, 4  ;;  %s4053_s28 = int_to_ptr.hbm [resolvable:$true] %s4052_s28 }
 0x791   : > { %p4771_p13 = scmp.eq.s32.totalorder %s6411_s27, 5  ;;  %s4905_s21 = smov [#allocation7]  }
 0x792   : > { %s4050_s22 = sshll.u32 %s4905_s21, 4  ;;  %s4906_s23 = smov 128   ;;  %s4051_s22 = int_to_ptr.vmem [resolvable:$true] %s4050_s22 }
 0x793   : > { %s4907_s24 = smov 8  }
 0x794   : > { %4768 = dma.vmem_to_hbm [thread:$0]  (%p4771_p13), %s4051_s22, 6144, %s4053_s28, [#allocation8], %s4906_s23, %s4906_s23, %s4907_s24  }
 0x795   : > { %4881 = dma.done.wait (%p4771_p13), [#allocation8], 6144  }
 0x796   : > { %4883 = vsyncadd (%p4771_p13), [#allocation8], 4294961152 }
 0x797 PF: > { %s25_s17 = sadd.s32 1, %s4902_s17   ;;  %s6412_s29 = smov %s4894_s15 }
 0x798   : > { %p22_p0 = scmp.ge.s32.totalorder %s25_s17, 8   ;;  %s6413_s30 = smov %s4898_s16 }
 0x799   : > { %s6414_s15 = smov %s6417_s19  ;;  %s6415_s16 = smov %s6421_s20 }
 0x79a   :  { %24 = sbr.rel (!%p22_p0) target bundleno = 5 (0x5), region = 119 }
 0x79f   :  { %4069 = vsyncpa [#allocation8], 1 }
 0x7a0   :  { %4071 = vsyncpa [#allocation8 + $0x1], 1 }

</bundles_post_ra>
